<compile_context>
chip_gen: v7x
topology: tpu7x:2x2x1
jax: 0.10.0
libtpu: 0.0.40
codegen_flags: <defaults>
</compile_context>

<pallas_src>
import math

import jax
import jax.numpy as jnp
from jax import lax
from jax.experimental import pallas as pl
from jax.experimental.pallas import tpu as pltpu

# ---------------- model hyper-parameters (synthetic, small) -----------------
IN_CH        = 8                       # in_channels
FEAT_ENC     = 16                      # feat_enc_channels
NUM_OBS      = 8                       # sum(gibli_layer.num_observers)
SOTA_IN      = FEAT_ENC + NUM_OBS      # 24 -> gibli_proj MLP width
OUT_CH       = 16                      # out_channels
KP_KPOINTS   = 4                       # number of kernel points
KP_RADIUS    = 0.5
KP_SIGMA     = 0.3
KP_NEIGHBORS = 8                       # knn
BN_EPS       = 1e-5
TILE_N       = 1024                    # points per tile (on the lane axis)

# packed-weight layout for kernel A (channel-major: weights are (out, in))
WPACK_ROWS, WPACK_COLS = 64, 32
ROW_WF, ROW_W1, ROW_W2 = 0, 24, 48     # all sublane starts 8-aligned
COL_BF, COL_B1, COL_B2 = 24, 25, 26    # bias columns (broadcast over lanes)

# packed-weight layout for kernel C: rows m*OUT_CH..+OUT_CH = kp_w[m]^T,
# rows KP_KPOINTS*OUT_CH.. = shortcut weight^T
WCPACK_ROWS = (KP_KPOINTS + 1) * OUT_CH


def _gelu(x):
    # tanh-approximate GELU: one EUP tanh instead of the erf VPU polynomial.
    # NOTE: tiny numeric deviation from torch nn.GELU()'s exact-erf default.
    c = math.sqrt(2.0 / math.pi)
    return 0.5 * x * (1.0 + jnp.tanh(c * (x + 0.044715 * x * x * x)))


# ============================================================================
# Kernel A: fused GIBLi stand-in encoder + gibli_proj MLP + residual add,
#           plus masked PointBatchNorm partial statistics.
# Channel-major: input is a single (Cin+3, T) slab = [feat ; coord].
# ============================================================================
def _gibli_proj_kernel(n_ref, fc_ref, wp_ref, x_ref, stats_ref):
    wf = wp_ref[pl.ds(ROW_WF, SOTA_IN), pl.ds(0, IN_CH + 3)]   # (24, 11) fused front end
    w1 = wp_ref[pl.ds(ROW_W1, SOTA_IN), pl.ds(0, SOTA_IN)]     # (24, 24)
    w2 = wp_ref[pl.ds(ROW_W2, IN_CH),   pl.ds(0, SOTA_IN)]     # (8, 24)
    bf = wp_ref[pl.ds(0, SOTA_IN), pl.ds(COL_BF, 1)]           # (24, 1) -> lane broadcast
    b1 = wp_ref[pl.ds(0, SOTA_IN), pl.ds(COL_B1, 1)]           # (24, 1)
    b2 = wp_ref[pl.ds(0, IN_CH),   pl.ds(COL_B2, 1)]           # (8, 1)

    # fused front end: one matmul produces [enc ; obs] on sublanes
    h0 = _gelu(jnp.dot(wf, fc_ref[...], preferred_element_type=jnp.float32) + bf)   # (24, T)
    h1 = _gelu(jnp.dot(w1, h0, preferred_element_type=jnp.float32) + b1)            # (24, T)
    feat = fc_ref[pl.ds(0, IN_CH), :]                                               # (8, T)
    x = feat + jnp.dot(w2, h1, preferred_element_type=jnp.float32) + b2             # (8, T)
    x_ref[...] = x

    # masked PointBatchNorm partial statistics (points on lanes)
    # NOTE: single-pass sum / sum-of-squares; fine for O(1) features, a shifted
    # two-pass variance would be preferable if feature means were large.
    col = pl.program_id(0) * TILE_N + lax.broadcasted_iota(jnp.int32, (1, TILE_N), 1)
    valid = (col < n_ref[0]).astype(jnp.float32)                # (1, T)
    xm = x * valid
    s = jnp.sum(xm, axis=1, keepdims=True)                      # (8, 1)
    sq = jnp.sum(xm * xm, axis=1, keepdims=True)                # (8, 1)
    c = lax.broadcasted_iota(jnp.int32, (IN_CH, 128), 1)
    stats_ref[...] = jnp.where(c == 0, s, jnp.where(c == 1, sq, 0.0))


def gibli_proj_residual(fc_cm, n_true, params):
    n_pad = fc_cm.shape[1]
    num_tiles = n_pad // TILE_N
    n_arr = jnp.full((1,), n_true, jnp.int32)
    cost = pl.CostEstimate(
        flops=int(n_pad * 2100),
        transcendentals=int(n_pad * 48),
        bytes_accessed=int(n_pad * (IN_CH + 3 + IN_CH) * 4 + WPACK_ROWS * WPACK_COLS * 4),
    )
    return pl.pallas_call(
        _gibli_proj_kernel,
        out_shape=(jax.ShapeDtypeStruct((IN_CH, n_pad), jnp.float32),
                   jax.ShapeDtypeStruct((IN_CH, num_tiles * 128), jnp.float32)),
        grid=(num_tiles,),
        in_specs=[
            pl.BlockSpec(memory_space=pltpu.MemorySpace.SMEM),            # true N
            pl.BlockSpec((IN_CH + 3, TILE_N), lambda i: (0, i)),          # [feat;coord]
            pl.BlockSpec((WPACK_ROWS, WPACK_COLS), lambda i: (0, 0)),     # packed weights
        ],
        out_specs=(pl.BlockSpec((IN_CH, TILE_N), lambda i: (0, i)),
                   pl.BlockSpec((IN_CH, 128), lambda i: (0, i))),
        compiler_params=pltpu.CompilerParams(dimension_semantics=("parallel",)),
        cost_estimate=cost,
    )(n_arr, fc_cm, params["wpack"])


# ============================================================================
# Kernel C: KPConv aggregation on pre-normalised features + linear shortcut
#           + LeakyReLU(0.1).  Channel-major; no cross-lane reductions, no
#           lane concatenation; per-kernel-point accumulating matmuls.
# ============================================================================
def _kpconv_kernel(yn_ref, rel_ref, yc_ref, kp_ref, w_ref, out_ref):
    inv_sigma = 1.0 / KP_SIGMA
    K = KP_NEIGHBORS

    # shortcut path: (OUT,Cin) x (Cin,T)
    wsc = w_ref[pl.ds(KP_KPOINTS * OUT_CH, OUT_CH), :]
    conv = jnp.dot(wsc, yc_ref[...], preferred_element_type=jnp.float32)   # (16, T)

    for m in range(KP_KPOINTS):
        kx = kp_ref[3 * m + 0]
        ky = kp_ref[3 * m + 1]
        kz = kp_ref[3 * m + 2]
        # per-axis squared distances from sublane rows (dx|dy|dz groups of K)
        t = rel_ref[pl.ds(0, K), :] - kx
        d2 = t * t
        t = rel_ref[pl.ds(K, K), :] - ky
        d2 = d2 + t * t
        t = rel_ref[pl.ds(2 * K, K), :] - kz
        d2 = d2 + t * t
        infl = jnp.maximum(1.0 - jnp.sqrt(d2) * inv_sigma, 0.0)            # (K, T)

        # weighted sum over neighbours (rows of yn are k*Cin..k*Cin+Cin-1)
        fm = infl[0:1, :] * yn_ref[pl.ds(0, IN_CH), :]
        for k in range(1, K):
            fm = fm + infl[k:k + 1, :] * yn_ref[pl.ds(k * IN_CH, IN_CH), :]

        wm = w_ref[pl.ds(m * OUT_CH, OUT_CH), :]                           # (16, 8)
        conv = conv + jnp.dot(wm, fm, preferred_element_type=jnp.float32)

    out_ref[...] = jnp.where(conv >= 0.0, conv, 0.1 * conv)                # LeakyReLU(0.1)


def kpconv_residual(yn_cm, rel_cm, yc_cm, params):
    n_pad = yc_cm.shape[1]
    num_tiles = n_pad // TILE_N
    cost = pl.CostEstimate(
        flops=int(n_pad * 2400),
        transcendentals=int(n_pad * 32),
        bytes_accessed=int(n_pad * (KP_NEIGHBORS * (IN_CH + 3) + IN_CH + OUT_CH) * 4),
    )
    return pl.pallas_call(
        _kpconv_kernel,
        out_shape=jax.ShapeDtypeStruct((OUT_CH, n_pad), jnp.float32),
        grid=(num_tiles,),
        in_specs=[
            pl.BlockSpec((KP_NEIGHBORS * IN_CH, TILE_N), lambda i: (0, i)),  # gathered y
            pl.BlockSpec((3 * KP_NEIGHBORS, TILE_N), lambda i: (0, i)),      # rel coords
            pl.BlockSpec((IN_CH, TILE_N), lambda i: (0, i)),                 # centre y
            pl.BlockSpec(memory_space=pltpu.MemorySpace.SMEM),               # kernel pts
            pl.BlockSpec((WCPACK_ROWS, IN_CH), lambda i: (0, 0)),            # packed W
        ],
        out_specs=pl.BlockSpec((OUT_CH, TILE_N), lambda i: (0, i)),
        compiler_params=pltpu.CompilerParams(dimension_semantics=("parallel",)),
        cost_estimate=cost,
    )(yn_cm, rel_cm, yc_cm, params["kpts_flat"], params["wc_pack"])


# ---------------------------- glue (plain JAX) -------------------------------
def knn_indices(coord, offset, k):
    # per-cloud kNN (self included); lax.top_k instead of a full argsort.
    n = coord.shape[0]
    batch_id = jnp.searchsorted(offset, jnp.arange(n, dtype=jnp.int32), side="right")
    sq = jnp.sum(coord * coord, axis=-1)
    d2 = sq[:, None] + sq[None, :] - 2.0 * (coord @ coord.T)
    same = batch_id[:, None] == batch_id[None, :]
    neg = jnp.where(same, -d2, -jnp.inf)
    _, idx = lax.top_k(neg, k)
    return idx


def forward(coord, feat, offset, params):
    n = coord.shape[0]
    n_pad = pl.cdiv(n, TILE_N) * TILE_N
    pad = n_pad - n
    coord_p = jnp.pad(coord, ((0, pad), (0, 0)))
    feat_p = jnp.pad(feat, ((0, pad), (0, 0)))

    # channel-major combined input for kernel A: (Cin+3, N_pad) = [feat ; coord]
    fc_cm = jnp.concatenate([feat_p.T, coord_p.T], axis=0)

    # Kernel A: encoder + gibli_proj + residual, fused with BN partial stats.
    x_cm, stats = gibli_proj_residual(fc_cm, n, params)          # (8, N_pad)

    # Finalise BN batch statistics -> per-channel scale/shift (training-mode BN).
    ntiles = n_pad // TILE_N
    st = stats.reshape(IN_CH, ntiles, 128)
    s = jnp.sum(st[:, :, 0], axis=1)
    sq = jnp.sum(st[:, :, 1], axis=1)
    mean = s / n
    var = sq / n - mean * mean
    scale = params["bn_gamma"] * lax.rsqrt(var + BN_EPS)
    shift = params["bn_beta"] - mean * scale

    # y = GELU(BN(x)) computed ONCE per point; gathered y replaces the previous
    # per-neighbour recomputation (removes ~7/8 of kernel C's pointwise work).
    y_cm = _gelu(x_cm * scale[:, None] + shift[:, None])         # (8, N_pad)

    # Neighbour search + gathers, presented as channel-major lane-dense slabs.
    idx = knn_indices(coord, offset, KP_NEIGHBORS)
    idx_p = jnp.pad(idx, ((0, pad), (0, 0)))                     # padded rows -> idx 0 (valid)

    yn = y_cm[:, idx_p]                                          # (C, N_pad, K)
    yn = jnp.transpose(yn, (2, 0, 1)).reshape(KP_NEIGHBORS * IN_CH, n_pad)

    rel = coord_p[idx_p] - coord_p[:, None, :]                   # (N_pad, K, 3)
    rel = jnp.transpose(rel, (2, 1, 0)).reshape(3 * KP_NEIGHBORS, n_pad)

    out_cm = kpconv_residual(yn, rel, y_cm, params)              # (16, N_pad)
    return {"coord": coord, "feat": out_cm[:, :n].T, "offset": offset}


def init_params(key):
    ks = jax.random.split(key, 6)

    def lin(k, fan_in, fan_out):
        lim = 1.0 / math.sqrt(fan_in)
        return jax.random.uniform(k, (fan_in, fan_out), jnp.float32, -lim, lim)

    we = lin(ks[0], IN_CH, FEAT_ENC)      # (8, 16)
    wo = lin(ks[1], 3, NUM_OBS)           # (3, 8)
    w1 = lin(ks[2], SOTA_IN, SOTA_IN)     # (24, 24)
    w2 = lin(ks[3], SOTA_IN, IN_CH)       # (24, 8)

    wpack = jnp.zeros((WPACK_ROWS, WPACK_COLS), jnp.float32)
    # fused front end: rows = [enc|obs] outputs, cols = [feat|coord] inputs
    wpack = wpack.at[ROW_WF:ROW_WF + FEAT_ENC, 0:IN_CH].set(we.T)
    wpack = wpack.at[ROW_WF + FEAT_ENC:ROW_WF + SOTA_IN, IN_CH:IN_CH + 3].set(wo.T)
    wpack = wpack.at[ROW_W1:ROW_W1 + SOTA_IN, 0:SOTA_IN].set(w1.T)
    wpack = wpack.at[ROW_W2:ROW_W2 + IN_CH, 0:SOTA_IN].set(w2.T)
    # bias columns (COL_BF / COL_B1 / COL_B2) stay zero-initialised (nn bias=0)

    lim_kp = 1.0 / math.sqrt(IN_CH * KP_KPOINTS)
    kp_w = jax.random.uniform(ks[4], (KP_KPOINTS, IN_CH, OUT_CH),
                              jnp.float32, -lim_kp, lim_kp)
    w_sc = lin(ks[5], IN_CH, OUT_CH)
    wc_pack = jnp.concatenate(
        [jnp.transpose(kp_w, (0, 2, 1)).reshape(KP_KPOINTS * OUT_CH, IN_CH), w_sc.T],
        axis=0)                                                   # (80, 8)

    kpts = 0.6 * KP_RADIUS * jnp.array(
        [[0.0, 0.0, 0.0], [1.0, 0.0, 0.0], [0.0, 1.0, 0.0], [0.0, 0.0, 1.0]],
        jnp.float32)

    return {
        "wpack": wpack,
        "bn_gamma": jnp.ones((IN_CH,), jnp.float32),
        "bn_beta": jnp.zeros((IN_CH,), jnp.float32),
        "kpts_flat": kpts.reshape(-1),                            # (12,) SMEM scalars
        "wc_pack": wc_pack,
    }


if __name__ == "__main__":
    key = jax.random.PRNGKey(0)
    k_coord, k_feat, k_param = jax.random.split(key, 3)

    n_per_cloud, n_clouds = 1000, 2
    n_total = n_per_cloud * n_clouds       # 2000 -> pads to 2048 = 2 tiles (exercises masking)
    coord = jax.random.uniform(k_coord, (n_total, 3), jnp.float32)
    feat = jax.random.normal(k_feat, (n_total, IN_CH), jnp.float32)
    offset = jnp.array([n_per_cloud, n_total], jnp.int32)         # cumulative lengths

    params = init_params(k_param)

    out = jax.jit(forward)(coord, feat, offset, params)
    jax.block_until_ready(out["feat"])

    assert out["feat"].shape == (n_total, OUT_CH)
    assert out["coord"].shape == (n_total, 3)
    print("KERNEL_OK")
</pallas_src>

<mosaic_0001>
module attributes {stable_mosaic.version = 11 : i64} {
  func.func @_gibli_proj_kernel(%arg0: i32, %arg1: memref<1xi32, #tpu.memory_space<smem>>, %arg2: memref<11x1024xf32, #tpu.memory_space<vmem>>, %arg3: memref<64x32xf32, #tpu.memory_space<vmem>>, %arg4: memref<8x1024xf32, #tpu.memory_space<vmem>>, %arg5: memref<8x128xf32, #tpu.memory_space<vmem>>) attributes {dimension_semantics = [#tpu.dimension_semantics<parallel>], iteration_bounds = array<i64: 2>, scalar_prefetch = 0 : i64, scratch_operands = 0 : i64, tpu.core_type = #tpu.core_type<tc>, window_params = [{transform_indices = @transform_0, window_bounds = array<i64: 1>}, {transform_indices = @transform_1, window_bounds = array<i64: 11, 1024>}, {pipeline_mode = #tpu.pipeline_mode<synchronous>, transform_indices = @transform_2, window_bounds = array<i64: 64, 32>}, {transform_indices = @transform_3, window_bounds = array<i64: 8, 1024>}, {transform_indices = @transform_4, window_bounds = array<i64: 8, 128>}]} {
    %c0 = arith.constant 0 : index
    %c0_0 = arith.constant 0 : index
    %0 = vector.load %arg3[%c0, %c0_0] : memref<64x32xf32, #tpu.memory_space<vmem>>, vector<24x11xf32>
    %c24 = arith.constant 24 : index
    %c0_1 = arith.constant 0 : index
    %1 = vector.load %arg3[%c24, %c0_1] : memref<64x32xf32, #tpu.memory_space<vmem>>, vector<24x24xf32>
    %c48 = arith.constant 48 : index
    %c0_2 = arith.constant 0 : index
    %2 = vector.load %arg3[%c48, %c0_2] : memref<64x32xf32, #tpu.memory_space<vmem>>, vector<8x24xf32>
    %c0_3 = arith.constant 0 : index
    %c24_4 = arith.constant 24 : index
    %3 = vector.load %arg3[%c0_3, %c24_4] : memref<64x32xf32, #tpu.memory_space<vmem>>, vector<24x1xf32>
    %c0_5 = arith.constant 0 : index
    %c25 = arith.constant 25 : index
    %4 = vector.load %arg3[%c0_5, %c25] : memref<64x32xf32, #tpu.memory_space<vmem>>, vector<24x1xf32>
    %c0_6 = arith.constant 0 : index
    %c26 = arith.constant 26 : index
    %5 = vector.load %arg3[%c0_6, %c26] : memref<64x32xf32, #tpu.memory_space<vmem>>, vector<8x1xf32>
    %c0_7 = arith.constant 0 : index
    %c0_8 = arith.constant 0 : index
    %6 = vector.load %arg2[%c0_7, %c0_8] : memref<11x1024xf32, #tpu.memory_space<vmem>>, vector<11x1024xf32>
    %cst = arith.constant dense<0.000000e+00> : vector<24x1024xf32>
    %7 = tpu.matmul %0, %6, %cst {dimension_numbers = #tpu.dot_dimension_numbers<[1], [0], [0], [1], [0, 0, 1, 1], [], []>} : vector<24x11xf32>, vector<11x1024xf32>, vector<24x1024xf32> -> vector<24x1024xf32>
    %8 = vector.broadcast %3 : vector<24x1xf32> to vector<24x1024xf32>
    %9 = arith.addf %7, %8 : vector<24x1024xf32>
    %cst_9 = arith.constant 5.000000e-01 : f32
    %10 = vector.broadcast %cst_9 : f32 to vector<24x1024xf32>
    %11 = arith.mulf %10, %9 : vector<24x1024xf32>
    %cst_10 = arith.constant 4.471500e-02 : f32
    %12 = vector.broadcast %cst_10 : f32 to vector<24x1024xf32>
    %13 = arith.mulf %12, %9 : vector<24x1024xf32>
    %14 = arith.mulf %13, %9 : vector<24x1024xf32>
    %15 = arith.mulf %14, %9 : vector<24x1024xf32>
    %16 = arith.addf %9, %15 : vector<24x1024xf32>
    %cst_11 = arith.constant 0.797884583 : f32
    %17 = vector.broadcast %cst_11 : f32 to vector<24x1024xf32>
    %18 = arith.mulf %17, %16 : vector<24x1024xf32>
    %19 = math.tanh %18 : vector<24x1024xf32>
    %cst_12 = arith.constant 1.000000e+00 : f32
    %20 = vector.broadcast %cst_12 : f32 to vector<24x1024xf32>
    %21 = arith.addf %20, %19 : vector<24x1024xf32>
    %22 = arith.mulf %11, %21 : vector<24x1024xf32>
    %cst_13 = arith.constant dense<0.000000e+00> : vector<24x1024xf32>
    %23 = tpu.matmul %1, %22, %cst_13 {dimension_numbers = #tpu.dot_dimension_numbers<[1], [0], [0], [1], [0, 0, 1, 1], [], []>} : vector<24x24xf32>, vector<24x1024xf32>, vector<24x1024xf32> -> vector<24x1024xf32>
    %24 = vector.broadcast %4 : vector<24x1xf32> to vector<24x1024xf32>
    %25 = arith.addf %23, %24 : vector<24x1024xf32>
    %cst_14 = arith.constant 5.000000e-01 : f32
    %26 = vector.broadcast %cst_14 : f32 to vector<24x1024xf32>
    %27 = arith.mulf %26, %25 : vector<24x1024xf32>
    %cst_15 = arith.constant 4.471500e-02 : f32
    %28 = vector.broadcast %cst_15 : f32 to vector<24x1024xf32>
    %29 = arith.mulf %28, %25 : vector<24x1024xf32>
    %30 = arith.mulf %29, %25 : vector<24x1024xf32>
    %31 = arith.mulf %30, %25 : vector<24x1024xf32>
    %32 = arith.addf %25, %31 : vector<24x1024xf32>
    %cst_16 = arith.constant 0.797884583 : f32
    %33 = vector.broadcast %cst_16 : f32 to vector<24x1024xf32>
    %34 = arith.mulf %33, %32 : vector<24x1024xf32>
    %35 = math.tanh %34 : vector<24x1024xf32>
    %cst_17 = arith.constant 1.000000e+00 : f32
    %36 = vector.broadcast %cst_17 : f32 to vector<24x1024xf32>
    %37 = arith.addf %36, %35 : vector<24x1024xf32>
    %38 = arith.mulf %27, %37 : vector<24x1024xf32>
    %c0_18 = arith.constant 0 : index
    %c0_19 = arith.constant 0 : index
    %39 = vector.load %arg2[%c0_18, %c0_19] : memref<11x1024xf32, #tpu.memory_space<vmem>>, vector<8x1024xf32>
    %cst_20 = arith.constant dense<0.000000e+00> : vector<8x1024xf32>
    %40 = tpu.matmul %2, %38, %cst_20 {dimension_numbers = #tpu.dot_dimension_numbers<[1], [0], [0], [1], [0, 0, 1, 1], [], []>} : vector<8x24xf32>, vector<24x1024xf32>, vector<8x1024xf32> -> vector<8x1024xf32>
    %41 = arith.addf %39, %40 : vector<8x1024xf32>
    %42 = vector.broadcast %5 : vector<8x1xf32> to vector<8x1024xf32>
    %43 = arith.addf %41, %42 : vector<8x1024xf32>
    %c0_21 = arith.constant 0 : index
    %c0_22 = arith.constant 0 : index
    %44 = vector.load %arg4[%c0_21, %c0_22] : memref<8x1024xf32, #tpu.memory_space<vmem>>, vector<8x1024xf32>
    tpu.vector_store %arg4[%c0_21, %c0_22], %43 {strides = array<i32>} : memref<8x1024xf32, #tpu.memory_space<vmem>>, vector<8x1024xf32>,
    %c1024_i32 = arith.constant 1024 : i32
    %45 = arith.muli %arg0, %c1024_i32 : i32
    %46 = tpu.iota {dimensions = array<i32: 1>} : vector<1x1024xi32>
    %47 = vector.broadcast %45 : i32 to vector<1x1024xi32>
    %48 = arith.addi %47, %46 : vector<1x1024xi32>
    %c0_23 = arith.constant 0 : index
    %49 = memref.load %arg1[%c0_23] : memref<1xi32, #tpu.memory_space<smem>>
    %50 = vector.broadcast %49 : i32 to vector<1x1024xi32>
    %51 = arith.cmpi slt, %48, %50 : vector<1x1024xi32>
    %52 = arith.extui %51 : vector<1x1024xi1> to vector<1x1024xi32>
    %53 = arith.sitofp %52 : vector<1x1024xi32> to vector<1x1024xf32>
    %54 = vector.broadcast %53 : vector<1x1024xf32> to vector<8x1024xf32>
    %55 = arith.mulf %43, %54 : vector<8x1024xf32>
    %cst_24 = arith.constant dense<0.000000e+00> : vector<8xf32>
    %56 = vector.multi_reduction <add>, %55, %cst_24 [1] : vector<8x1024xf32> to vector<8xf32>
    %57 = vector.shape_cast %56 : vector<8xf32> to vector<8x1xf32>
    %58 = arith.mulf %55, %55 : vector<8x1024xf32>
    %cst_25 = arith.constant dense<0.000000e+00> : vector<8xf32>
    %59 = vector.multi_reduction <add>, %58, %cst_25 [1] : vector<8x1024xf32> to vector<8xf32>
    %60 = vector.shape_cast %59 : vector<8xf32> to vector<8x1xf32>
    %61 = tpu.iota {dimensions = array<i32: 1>} : vector<8x128xi32>
    %c0_i32 = arith.constant 0 : i32
    %62 = vector.broadcast %c0_i32 : i32 to vector<8x128xi32>
    %63 = arith.cmpi eq, %61, %62 : vector<8x128xi32>
    %c1_i32 = arith.constant 1 : i32
    %64 = vector.broadcast %c1_i32 : i32 to vector<8x128xi32>
    %65 = arith.cmpi eq, %61, %64 : vector<8x128xi32>
    %cst_26 = arith.constant 0.000000e+00 : f32
    %66 = vector.shape_cast %60 : vector<8x1xf32> to vector<8x1xf32>
    %67 = vector.broadcast %66 : vector<8x1xf32> to vector<8x128xf32>
    %68 = vector.broadcast %cst_26 : f32 to vector<8x128xf32>
    %69 = arith.select %65, %67, %68 : vector<8x128xi1>, vector<8x128xf32>
    %70 = vector.shape_cast %57 : vector<8x1xf32> to vector<8x1xf32>
    %71 = vector.broadcast %70 : vector<8x1xf32> to vector<8x128xf32>
    %72 = arith.select %63, %71, %69 : vector<8x128xi1>, vector<8x128xf32>
    %c0_27 = arith.constant 0 : index
    %c0_28 = arith.constant 0 : index
    %73 = vector.load %arg5[%c0_27, %c0_28] : memref<8x128xf32, #tpu.memory_space<vmem>>, vector<8x128xf32>
    tpu.vector_store %arg5[%c0_27, %c0_28], %72 {strides = array<i32>} : memref<8x128xf32, #tpu.memory_space<vmem>>, vector<8x128xf32>,
    return
  }
  func.func @transform_0(%arg0: i32) -> i32 {
    %c0_i32 = arith.constant 0 : i32
    %c0_i32_0 = arith.constant 0 : i32
    return %c0_i32 : i32
  }
  func.func @transform_1(%arg0: i32) -> (i32, i32) {
    %c0_i32 = arith.constant 0 : i32
    %c0_i32_0 = arith.constant 0 : i32
    return %c0_i32, %arg0 : i32, i32
  }
  func.func @transform_2(%arg0: i32) -> (i32, i32) {
    %c0_i32 = arith.constant 0 : i32
    %c0_i32_0 = arith.constant 0 : i32
    %c0_i32_1 = arith.constant 0 : i32
    return %c0_i32, %c0_i32_0 : i32, i32
  }
  func.func @transform_3(%arg0: i32) -> (i32, i32) {
    %c0_i32 = arith.constant 0 : i32
    %c0_i32_0 = arith.constant 0 : i32
    return %c0_i32, %arg0 : i32, i32
  }
  func.func @transform_4(%arg0: i32) -> (i32, i32) {
    %c0_i32 = arith.constant 0 : i32
    %c0_i32_0 = arith.constant 0 : i32
    return %c0_i32, %arg0 : i32, i32
  }
}

module attributes {stable_mosaic.version = 11 : i64} {
  func.func @_kpconv_kernel(%arg0: i32, %arg1: memref<64x1024xf32, #tpu.memory_space<vmem>>, %arg2: memref<24x1024xf32, #tpu.memory_space<vmem>>, %arg3: memref<8x1024xf32, #tpu.memory_space<vmem>>, %arg4: memref<12xf32, #tpu.memory_space<smem>>, %arg5: memref<80x8xf32, #tpu.memory_space<vmem>>, %arg6: memref<16x1024xf32, #tpu.memory_space<vmem>>) attributes {dimension_semantics = [#tpu.dimension_semantics<parallel>], iteration_bounds = array<i64: 2>, scalar_prefetch = 0 : i64, scratch_operands = 0 : i64, tpu.core_type = #tpu.core_type<tc>, window_params = [{transform_indices = @transform_0, window_bounds = array<i64: 64, 1024>}, {transform_indices = @transform_1, window_bounds = array<i64: 24, 1024>}, {transform_indices = @transform_2, window_bounds = array<i64: 8, 1024>}, {transform_indices = @transform_3, window_bounds = array<i64: 12>}, {pipeline_mode = #tpu.pipeline_mode<synchronous>, transform_indices = @transform_4, window_bounds = array<i64: 80, 8>}, {transform_indices = @transform_5, window_bounds = array<i64: 16, 1024>}]} {
    %c64 = arith.constant 64 : index
    %c0 = arith.constant 0 : index
    %0 = vector.load %arg5[%c64, %c0] : memref<80x8xf32, #tpu.memory_space<vmem>>, vector<16x8xf32>
    %c0_0 = arith.constant 0 : index
    %c0_1 = arith.constant 0 : index
    %1 = vector.load %arg3[%c0_0, %c0_1] : memref<8x1024xf32, #tpu.memory_space<vmem>>, vector<8x1024xf32>
    %cst = arith.constant dense<0.000000e+00> : vector<16x1024xf32>
    %2 = tpu.matmul %0, %1, %cst {dimension_numbers = #tpu.dot_dimension_numbers<[1], [0], [0], [1], [0, 0, 1, 1], [], []>} : vector<16x8xf32>, vector<8x1024xf32>, vector<16x1024xf32> -> vector<16x1024xf32>
    %c0_2 = arith.constant 0 : index
    %3 = memref.load %arg4[%c0_2] : memref<12xf32, #tpu.memory_space<smem>>
    %c1 = arith.constant 1 : index
    %4 = memref.load %arg4[%c1] : memref<12xf32, #tpu.memory_space<smem>>
    %c2 = arith.constant 2 : index
    %5 = memref.load %arg4[%c2] : memref<12xf32, #tpu.memory_space<smem>>
    %c0_3 = arith.constant 0 : index
    %c0_4 = arith.constant 0 : index
    %6 = vector.load %arg2[%c0_3, %c0_4] : memref<24x1024xf32, #tpu.memory_space<vmem>>, vector<8x1024xf32>
    %7 = vector.broadcast %3 : f32 to vector<8x1024xf32>
    %8 = arith.subf %6, %7 : vector<8x1024xf32>
    %9 = arith.mulf %8, %8 : vector<8x1024xf32>
    %c8 = arith.constant 8 : index
    %c0_5 = arith.constant 0 : index
    %10 = vector.load %arg2[%c8, %c0_5] : memref<24x1024xf32, #tpu.memory_space<vmem>>, vector<8x1024xf32>
    %11 = vector.broadcast %4 : f32 to vector<8x1024xf32>
    %12 = arith.subf %10, %11 : vector<8x1024xf32>
    %13 = arith.mulf %12, %12 : vector<8x1024xf32>
    %14 = arith.addf %9, %13 : vector<8x1024xf32>
    %c16 = arith.constant 16 : index
    %c0_6 = arith.constant 0 : index
    %15 = vector.load %arg2[%c16, %c0_6] : memref<24x1024xf32, #tpu.memory_space<vmem>>, vector<8x1024xf32>
    %16 = vector.broadcast %5 : f32 to vector<8x1024xf32>
    %17 = arith.subf %15, %16 : vector<8x1024xf32>
    %18 = arith.mulf %17, %17 : vector<8x1024xf32>
    %19 = arith.addf %14, %18 : vector<8x1024xf32>
    %20 = math.sqrt %19 : vector<8x1024xf32>
    %cst_7 = arith.constant 3.33333325 : f32
    %21 = vector.broadcast %cst_7 : f32 to vector<8x1024xf32>
    %22 = arith.mulf %20, %21 : vector<8x1024xf32>
    %cst_8 = arith.constant 1.000000e+00 : f32
    %23 = vector.broadcast %cst_8 : f32 to vector<8x1024xf32>
    %24 = arith.subf %23, %22 : vector<8x1024xf32>
    %cst_9 = arith.constant 0.000000e+00 : f32
    %25 = vector.broadcast %cst_9 : f32 to vector<8x1024xf32>
    %26 = arith.maximumf %24, %25 : vector<8x1024xf32>
    %27 = vector.extract_strided_slice %26 {offsets = [0, 0], sizes = [1, 1024], strides = [1, 1]} : vector<8x1024xf32> to vector<1x1024xf32>
    %c0_10 = arith.constant 0 : index
    %c0_11 = arith.constant 0 : index
    %28 = vector.load %arg1[%c0_10, %c0_11] : memref<64x1024xf32, #tpu.memory_space<vmem>>, vector<8x1024xf32>
    %29 = vector.broadcast %27 : vector<1x1024xf32> to vector<8x1024xf32>
    %30 = arith.mulf %29, %28 : vector<8x1024xf32>
    %31 = vector.extract_strided_slice %26 {offsets = [1, 0], sizes = [1, 1024], strides = [1, 1]} : vector<8x1024xf32> to vector<1x1024xf32>
    %c8_12 = arith.constant 8 : index
    %c0_13 = arith.constant 0 : index
    %32 = vector.load %arg1[%c8_12, %c0_13] : memref<64x1024xf32, #tpu.memory_space<vmem>>, vector<8x1024xf32>
    %33 = vector.broadcast %31 : vector<1x1024xf32> to vector<8x1024xf32>
    %34 = arith.mulf %33, %32 : vector<8x1024xf32>
    %35 = arith.addf %30, %34 : vector<8x1024xf32>
    %36 = vector.extract_strided_slice %26 {offsets = [2, 0], sizes = [1, 1024], strides = [1, 1]} : vector<8x1024xf32> to vector<1x1024xf32>
    %c16_14 = arith.constant 16 : index
    %c0_15 = arith.constant 0 : index
    %37 = vector.load %arg1[%c16_14, %c0_15] : memref<64x1024xf32, #tpu.memory_space<vmem>>, vector<8x1024xf32>
    %38 = vector.broadcast %36 : vector<1x1024xf32> to vector<8x1024xf32>
    %39 = arith.mulf %38, %37 : vector<8x1024xf32>
    %40 = arith.addf %35, %39 : vector<8x1024xf32>
    %41 = vector.extract_strided_slice %26 {offsets = [3, 0], sizes = [1, 1024], strides = [1, 1]} : vector<8x1024xf32> to vector<1x1024xf32>
    %c24 = arith.constant 24 : index
    %c0_16 = arith.constant 0 : index
    %42 = vector.load %arg1[%c24, %c0_16] : memref<64x1024xf32, #tpu.memory_space<vmem>>, vector<8x1024xf32>
    %43 = vector.broadcast %41 : vector<1x1024xf32> to vector<8x1024xf32>
    %44 = arith.mulf %43, %42 : vector<8x1024xf32>
    %45 = arith.addf %40, %44 : vector<8x1024xf32>
    %46 = vector.extract_strided_slice %26 {offsets = [4, 0], sizes = [1, 1024], strides = [1, 1]} : vector<8x1024xf32> to vector<1x1024xf32>
    %c32 = arith.constant 32 : index
    %c0_17 = arith.constant 0 : index
    %47 = vector.load %arg1[%c32, %c0_17] : memref<64x1024xf32, #tpu.memory_space<vmem>>, vector<8x1024xf32>
    %48 = vector.broadcast %46 : vector<1x1024xf32> to vector<8x1024xf32>
    %49 = arith.mulf %48, %47 : vector<8x1024xf32>
    %50 = arith.addf %45, %49 : vector<8x1024xf32>
    %51 = vector.extract_strided_slice %26 {offsets = [5, 0], sizes = [1, 1024], strides = [1, 1]} : vector<8x1024xf32> to vector<1x1024xf32>
    %c40 = arith.constant 40 : index
    %c0_18 = arith.constant 0 : index
    %52 = vector.load %arg1[%c40, %c0_18] : memref<64x1024xf32, #tpu.memory_space<vmem>>, vector<8x1024xf32>
    %53 = vector.broadcast %51 : vector<1x1024xf32> to vector<8x1024xf32>
    %54 = arith.mulf %53, %52 : vector<8x1024xf32>
    %55 = arith.addf %50, %54 : vector<8x1024xf32>
    %56 = vector.extract_strided_slice %26 {offsets = [6, 0], sizes = [1, 1024], strides = [1, 1]} : vector<8x1024xf32> to vector<1x1024xf32>
    %c48 = arith.constant 48 : index
    %c0_19 = arith.constant 0 : index
    %57 = vector.load %arg1[%c48, %c0_19] : memref<64x1024xf32, #tpu.memory_space<vmem>>, vector<8x1024xf32>
    %58 = vector.broadcast %56 : vector<1x1024xf32> to vector<8x1024xf32>
    %59 = arith.mulf %58, %57 : vector<8x1024xf32>
    %60 = arith.addf %55, %59 : vector<8x1024xf32>
    %61 = vector.extract_strided_slice %26 {offsets = [7, 0], sizes = [1, 1024], strides = [1, 1]} : vector<8x1024xf32> to vector<1x1024xf32>
    %c56 = arith.constant 56 : index
    %c0_20 = arith.constant 0 : index
    %62 = vector.load %arg1[%c56, %c0_20] : memref<64x1024xf32, #tpu.memory_space<vmem>>, vector<8x1024xf32>
    %63 = vector.broadcast %61 : vector<1x1024xf32> to vector<8x1024xf32>
    %64 = arith.mulf %63, %62 : vector<8x1024xf32>
    %65 = arith.addf %60, %64 : vector<8x1024xf32>
    %c0_21 = arith.constant 0 : index
    %c0_22 = arith.constant 0 : index
    %66 = vector.load %arg5[%c0_21, %c0_22] : memref<80x8xf32, #tpu.memory_space<vmem>>, vector<16x8xf32>
    %cst_23 = arith.constant dense<0.000000e+00> : vector<16x1024xf32>
    %67 = tpu.matmul %66, %65, %cst_23 {dimension_numbers = #tpu.dot_dimension_numbers<[1], [0], [0], [1], [0, 0, 1, 1], [], []>} : vector<16x8xf32>, vector<8x1024xf32>, vector<16x1024xf32> -> vector<16x1024xf32>
    %68 = arith.addf %2, %67 : vector<16x1024xf32>
    %c3 = arith.constant 3 : index
    %69 = memref.load %arg4[%c3] : memref<12xf32, #tpu.memory_space<smem>>
    %c4 = arith.constant 4 : index
    %70 = memref.load %arg4[%c4] : memref<12xf32, #tpu.memory_space<smem>>
    %c5 = arith.constant 5 : index
    %71 = memref.load %arg4[%c5] : memref<12xf32, #tpu.memory_space<smem>>
    %c0_24 = arith.constant 0 : index
    %c0_25 = arith.constant 0 : index
    %72 = vector.load %arg2[%c0_24, %c0_25] : memref<24x1024xf32, #tpu.memory_space<vmem>>, vector<8x1024xf32>
    %73 = vector.broadcast %69 : f32 to vector<8x1024xf32>
    %74 = arith.subf %72, %73 : vector<8x1024xf32>
    %75 = arith.mulf %74, %74 : vector<8x1024xf32>
    %c8_26 = arith.constant 8 : index
    %c0_27 = arith.constant 0 : index
    %76 = vector.load %arg2[%c8_26, %c0_27] : memref<24x1024xf32, #tpu.memory_space<vmem>>, vector<8x1024xf32>
    %77 = vector.broadcast %70 : f32 to vector<8x1024xf32>
    %78 = arith.subf %76, %77 : vector<8x1024xf32>
    %79 = arith.mulf %78, %78 : vector<8x1024xf32>
    %80 = arith.addf %75, %79 : vector<8x1024xf32>
    %c16_28 = arith.constant 16 : index
    %c0_29 = arith.constant 0 : index
    %81 = vector.load %arg2[%c16_28, %c0_29] : memref<24x1024xf32, #tpu.memory_space<vmem>>, vector<8x1024xf32>
    %82 = vector.broadcast %71 : f32 to vector<8x1024xf32>
    %83 = arith.subf %81, %82 : vector<8x1024xf32>
    %84 = arith.mulf %83, %83 : vector<8x1024xf32>
    %85 = arith.addf %80, %84 : vector<8x1024xf32>
    %86 = math.sqrt %85 : vector<8x1024xf32>
    %cst_30 = arith.constant 3.33333325 : f32
    %87 = vector.broadcast %cst_30 : f32 to vector<8x1024xf32>
    %88 = arith.mulf %86, %87 : vector<8x1024xf32>
    %cst_31 = arith.constant 1.000000e+00 : f32
    %89 = vector.broadcast %cst_31 : f32 to vector<8x1024xf32>
    %90 = arith.subf %89, %88 : vector<8x1024xf32>
    %cst_32 = arith.constant 0.000000e+00 : f32
    %91 = vector.broadcast %cst_32 : f32 to vector<8x1024xf32>
    %92 = arith.maximumf %90, %91 : vector<8x1024xf32>
    %93 = vector.extract_strided_slice %92 {offsets = [0, 0], sizes = [1, 1024], strides = [1, 1]} : vector<8x1024xf32> to vector<1x1024xf32>
    %c0_33 = arith.constant 0 : index
    %c0_34 = arith.constant 0 : index
    %94 = vector.load %arg1[%c0_33, %c0_34] : memref<64x1024xf32, #tpu.memory_space<vmem>>, vector<8x1024xf32>
    %95 = vector.broadcast %93 : vector<1x1024xf32> to vector<8x1024xf32>
    %96 = arith.mulf %95, %94 : vector<8x1024xf32>
    %97 = vector.extract_strided_slice %92 {offsets = [1, 0], sizes = [1, 1024], strides = [1, 1]} : vector<8x1024xf32> to vector<1x1024xf32>
    %c8_35 = arith.constant 8 : index
    %c0_36 = arith.constant 0 : index
    %98 = vector.load %arg1[%c8_35, %c0_36] : memref<64x1024xf32, #tpu.memory_space<vmem>>, vector<8x1024xf32>
    %99 = vector.broadcast %97 : vector<1x1024xf32> to vector<8x1024xf32>
    %100 = arith.mulf %99, %98 : vector<8x1024xf32>
    %101 = arith.addf %96, %100 : vector<8x1024xf32>
    %102 = vector.extract_strided_slice %92 {offsets = [2, 0], sizes = [1, 1024], strides = [1, 1]} : vector<8x1024xf32> to vector<1x1024xf32>
    %c16_37 = arith.constant 16 : index
    %c0_38 = arith.constant 0 : index
    %103 = vector.load %arg1[%c16_37, %c0_38] : memref<64x1024xf32, #tpu.memory_space<vmem>>, vector<8x1024xf32>
    %104 = vector.broadcast %102 : vector<1x1024xf32> to vector<8x1024xf32>
    %105 = arith.mulf %104, %103 : vector<8x1024xf32>
    %106 = arith.addf %101, %105 : vector<8x1024xf32>
    %107 = vector.extract_strided_slice %92 {offsets = [3, 0], sizes = [1, 1024], strides = [1, 1]} : vector<8x1024xf32> to vector<1x1024xf32>
    %c24_39 = arith.constant 24 : index
    %c0_40 = arith.constant 0 : index
    %108 = vector.load %arg1[%c24_39, %c0_40] : memref<64x1024xf32, #tpu.memory_space<vmem>>, vector<8x1024xf32>
    %109 = vector.broadcast %107 : vector<1x1024xf32> to vector<8x1024xf32>
    %110 = arith.mulf %109, %108 : vector<8x1024xf32>
    %111 = arith.addf %106, %110 : vector<8x1024xf32>
    %112 = vector.extract_strided_slice %92 {offsets = [4, 0], sizes = [1, 1024], strides = [1, 1]} : vector<8x1024xf32> to vector<1x1024xf32>
    %c32_41 = arith.constant 32 : index
    %c0_42 = arith.constant 0 : index
    %113 = vector.load %arg1[%c32_41, %c0_42] : memref<64x1024xf32, #tpu.memory_space<vmem>>, vector<8x1024xf32>
    %114 = vector.broadcast %112 : vector<1x1024xf32> to vector<8x1024xf32>
    %115 = arith.mulf %114, %113 : vector<8x1024xf32>
    %116 = arith.addf %111, %115 : vector<8x1024xf32>
    %117 = vector.extract_strided_slice %92 {offsets = [5, 0], sizes = [1, 1024], strides = [1, 1]} : vector<8x1024xf32> to vector<1x1024xf32>
    %c40_43 = arith.constant 40 : index
    %c0_44 = arith.constant 0 : index
    %118 = vector.load %arg1[%c40_43, %c0_44] : memref<64x1024xf32, #tpu.memory_space<vmem>>, vector<8x1024xf32>
    %119 = vector.broadcast %117 : vector<1x1024xf32> to vector<8x1024xf32>
    %120 = arith.mulf %119, %118 : vector<8x1024xf32>
    %121 = arith.addf %116, %120 : vector<8x1024xf32>
    %122 = vector.extract_strided_slice %92 {offsets = [6, 0], sizes = [1, 1024], strides = [1, 1]} : vector<8x1024xf32> to vector<1x1024xf32>
    %c48_45 = arith.constant 48 : index
    %c0_46 = arith.constant 0 : index
    %123 = vector.load %arg1[%c48_45, %c0_46] : memref<64x1024xf32, #tpu.memory_space<vmem>>, vector<8x1024xf32>
    %124 = vector.broadcast %122 : vector<1x1024xf32> to vector<8x1024xf32>
    %125 = arith.mulf %124, %123 : vector<8x1024xf32>
    %126 = arith.addf %121, %125 : vector<8x1024xf32>
    %127 = vector.extract_strided_slice %92 {offsets = [7, 0], sizes = [1, 1024], strides = [1, 1]} : vector<8x1024xf32> to vector<1x1024xf32>
    %c56_47 = arith.constant 56 : index
    %c0_48 = arith.constant 0 : index
    %128 = vector.load %arg1[%c56_47, %c0_48] : memref<64x1024xf32, #tpu.memory_space<vmem>>, vector<8x1024xf32>
    %129 = vector.broadcast %127 : vector<1x1024xf32> to vector<8x1024xf32>
    %130 = arith.mulf %129, %128 : vector<8x1024xf32>
    %131 = arith.addf %126, %130 : vector<8x1024xf32>
    %c16_49 = arith.constant 16 : index
    %c0_50 = arith.constant 0 : index
    %132 = vector.load %arg5[%c16_49, %c0_50] : memref<80x8xf32, #tpu.memory_space<vmem>>, vector<16x8xf32>
    %cst_51 = arith.constant dense<0.000000e+00> : vector<16x1024xf32>
    %133 = tpu.matmul %132, %131, %cst_51 {dimension_numbers = #tpu.dot_dimension_numbers<[1], [0], [0], [1], [0, 0, 1, 1], [], []>} : vector<16x8xf32>, vector<8x1024xf32>, vector<16x1024xf32> -> vector<16x1024xf32>
    %134 = arith.addf %68, %133 : vector<16x1024xf32>
    %c6 = arith.constant 6 : index
    %135 = memref.load %arg4[%c6] : memref<12xf32, #tpu.memory_space<smem>>
    %c7 = arith.constant 7 : index
    %136 = memref.load %arg4[%c7] : memref<12xf32, #tpu.memory_space<smem>>
    %c8_52 = arith.constant 8 : index
    %137 = memref.load %arg4[%c8_52] : memref<12xf32, #tpu.memory_space<smem>>
    %c0_53 = arith.constant 0 : index
    %c0_54 = arith.constant 0 : index
    %138 = vector.load %arg2[%c0_53, %c0_54] : memref<24x1024xf32, #tpu.memory_space<vmem>>, vector<8x1024xf32>
    %139 = vector.broadcast %135 : f32 to vector<8x1024xf32>
    %140 = arith.subf %138, %139 : vector<8x1024xf32>
    %141 = arith.mulf %140, %140 : vector<8x1024xf32>
    %c8_55 = arith.constant 8 : index
    %c0_56 = arith.constant 0 : index
    %142 = vector.load %arg2[%c8_55, %c0_56] : memref<24x1024xf32, #tpu.memory_space<vmem>>, vector<8x1024xf32>
    %143 = vector.broadcast %136 : f32 to vector<8x1024xf32>
    %144 = arith.subf %142, %143 : vector<8x1024xf32>
    %145 = arith.mulf %144, %144 : vector<8x1024xf32>
    %146 = arith.addf %141, %145 : vector<8x1024xf32>
    %c16_57 = arith.constant 16 : index
    %c0_58 = arith.constant 0 : index
    %147 = vector.load %arg2[%c16_57, %c0_58] : memref<24x1024xf32, #tpu.memory_space<vmem>>, vector<8x1024xf32>
    %148 = vector.broadcast %137 : f32 to vector<8x1024xf32>
    %149 = arith.subf %147, %148 : vector<8x1024xf32>
    %150 = arith.mulf %149, %149 : vector<8x1024xf32>
    %151 = arith.addf %146, %150 : vector<8x1024xf32>
    %152 = math.sqrt %151 : vector<8x1024xf32>
    %cst_59 = arith.constant 3.33333325 : f32
    %153 = vector.broadcast %cst_59 : f32 to vector<8x1024xf32>
    %154 = arith.mulf %152, %153 : vector<8x1024xf32>
    %cst_60 = arith.constant 1.000000e+00 : f32
    %155 = vector.broadcast %cst_60 : f32 to vector<8x1024xf32>
    %156 = arith.subf %155, %154 : vector<8x1024xf32>
    %cst_61 = arith.constant 0.000000e+00 : f32
    %157 = vector.broadcast %cst_61 : f32 to vector<8x1024xf32>
    %158 = arith.maximumf %156, %157 : vector<8x1024xf32>
    %159 = vector.extract_strided_slice %158 {offsets = [0, 0], sizes = [1, 1024], strides = [1, 1]} : vector<8x1024xf32> to vector<1x1024xf32>
    %c0_62 = arith.constant 0 : index
    %c0_63 = arith.constant 0 : index
    %160 = vector.load %arg1[%c0_62, %c0_63] : memref<64x1024xf32, #tpu.memory_space<vmem>>, vector<8x1024xf32>
    %161 = vector.broadcast %159 : vector<1x1024xf32> to vector<8x1024xf32>
    %162 = arith.mulf %161, %160 : vector<8x1024xf32>
    %163 = vector.extract_strided_slice %158 {offsets = [1, 0], sizes = [1, 1024], strides = [1, 1]} : vector<8x1024xf32> to vector<1x1024xf32>
    %c8_64 = arith.constant 8 : index
    %c0_65 = arith.constant 0 : index
    %164 = vector.load %arg1[%c8_64, %c0_65] : memref<64x1024xf32, #tpu.memory_space<vmem>>, vector<8x1024xf32>
    %165 = vector.broadcast %163 : vector<1x1024xf32> to vector<8x1024xf32>
    %166 = arith.mulf %165, %164 : vector<8x1024xf32>
    %167 = arith.addf %162, %166 : vector<8x1024xf32>
    %168 = vector.extract_strided_slice %158 {offsets = [2, 0], sizes = [1, 1024], strides = [1, 1]} : vector<8x1024xf32> to vector<1x1024xf32>
    %c16_66 = arith.constant 16 : index
    %c0_67 = arith.constant 0 : index
    %169 = vector.load %arg1[%c16_66, %c0_67] : memref<64x1024xf32, #tpu.memory_space<vmem>>, vector<8x1024xf32>
    %170 = vector.broadcast %168 : vector<1x1024xf32> to vector<8x1024xf32>
    %171 = arith.mulf %170, %169 : vector<8x1024xf32>
    %172 = arith.addf %167, %171 : vector<8x1024xf32>
    %173 = vector.extract_strided_slice %158 {offsets = [3, 0], sizes = [1, 1024], strides = [1, 1]} : vector<8x1024xf32> to vector<1x1024xf32>
    %c24_68 = arith.constant 24 : index
    %c0_69 = arith.constant 0 : index
    %174 = vector.load %arg1[%c24_68, %c0_69] : memref<64x1024xf32, #tpu.memory_space<vmem>>, vector<8x1024xf32>
    %175 = vector.broadcast %173 : vector<1x1024xf32> to vector<8x1024xf32>
    %176 = arith.mulf %175, %174 : vector<8x1024xf32>
    %177 = arith.addf %172, %176 : vector<8x1024xf32>
    %178 = vector.extract_strided_slice %158 {offsets = [4, 0], sizes = [1, 1024], strides = [1, 1]} : vector<8x1024xf32> to vector<1x1024xf32>
    %c32_70 = arith.constant 32 : index
    %c0_71 = arith.constant 0 : index
    %179 = vector.load %arg1[%c32_70, %c0_71] : memref<64x1024xf32, #tpu.memory_space<vmem>>, vector<8x1024xf32>
    %180 = vector.broadcast %178 : vector<1x1024xf32> to vector<8x1024xf32>
    %181 = arith.mulf %180, %179 : vector<8x1024xf32>
    %182 = arith.addf %177, %181 : vector<8x1024xf32>
    %183 = vector.extract_strided_slice %158 {offsets = [5, 0], sizes = [1, 1024], strides = [1, 1]} : vector<8x1024xf32> to vector<1x1024xf32>
    %c40_72 = arith.constant 40 : index
    %c0_73 = arith.constant 0 : index
    %184 = vector.load %arg1[%c40_72, %c0_73] : memref<64x1024xf32, #tpu.memory_space<vmem>>, vector<8x1024xf32>
    %185 = vector.broadcast %183 : vector<1x1024xf32> to vector<8x1024xf32>
    %186 = arith.mulf %185, %184 : vector<8x1024xf32>
    %187 = arith.addf %182, %186 : vector<8x1024xf32>
    %188 = vector.extract_strided_slice %158 {offsets = [6, 0], sizes = [1, 1024], strides = [1, 1]} : vector<8x1024xf32> to vector<1x1024xf32>
    %c48_74 = arith.constant 48 : index
    %c0_75 = arith.constant 0 : index
    %189 = vector.load %arg1[%c48_74, %c0_75] : memref<64x1024xf32, #tpu.memory_space<vmem>>, vector<8x1024xf32>
    %190 = vector.broadcast %188 : vector<1x1024xf32> to vector<8x1024xf32>
    %191 = arith.mulf %190, %189 : vector<8x1024xf32>
    %192 = arith.addf %187, %191 : vector<8x1024xf32>
    %193 = vector.extract_strided_slice %158 {offsets = [7, 0], sizes = [1, 1024], strides = [1, 1]} : vector<8x1024xf32> to vector<1x1024xf32>
    %c56_76 = arith.constant 56 : index
    %c0_77 = arith.constant 0 : index
    %194 = vector.load %arg1[%c56_76, %c0_77] : memref<64x1024xf32, #tpu.memory_space<vmem>>, vector<8x1024xf32>
    %195 = vector.broadcast %193 : vector<1x1024xf32> to vector<8x1024xf32>
    %196 = arith.mulf %195, %194 : vector<8x1024xf32>
    %197 = arith.addf %192, %196 : vector<8x1024xf32>
    %c32_78 = arith.constant 32 : index
    %c0_79 = arith.constant 0 : index
    %198 = vector.load %arg5[%c32_78, %c0_79] : memref<80x8xf32, #tpu.memory_space<vmem>>, vector<16x8xf32>
    %cst_80 = arith.constant dense<0.000000e+00> : vector<16x1024xf32>
    %199 = tpu.matmul %198, %197, %cst_80 {dimension_numbers = #tpu.dot_dimension_numbers<[1], [0], [0], [1], [0, 0, 1, 1], [], []>} : vector<16x8xf32>, vector<8x1024xf32>, vector<16x1024xf32> -> vector<16x1024xf32>
    %200 = arith.addf %134, %199 : vector<16x1024xf32>
    %c9 = arith.constant 9 : index
    %201 = memref.load %arg4[%c9] : memref<12xf32, #tpu.memory_space<smem>>
    %c10 = arith.constant 10 : index
    %202 = memref.load %arg4[%c10] : memref<12xf32, #tpu.memory_space<smem>>
    %c11 = arith.constant 11 : index
    %203 = memref.load %arg4[%c11] : memref<12xf32, #tpu.memory_space<smem>>
    %c0_81 = arith.constant 0 : index
    %c0_82 = arith.constant 0 : index
    %204 = vector.load %arg2[%c0_81, %c0_82] : memref<24x1024xf32, #tpu.memory_space<vmem>>, vector<8x1024xf32>
    %205 = vector.broadcast %201 : f32 to vector<8x1024xf32>
    %206 = arith.subf %204, %205 : vector<8x1024xf32>
    %207 = arith.mulf %206, %206 : vector<8x1024xf32>
    %c8_83 = arith.constant 8 : index
    %c0_84 = arith.constant 0 : index
    %208 = vector.load %arg2[%c8_83, %c0_84] : memref<24x1024xf32, #tpu.memory_space<vmem>>, vector<8x1024xf32>
    %209 = vector.broadcast %202 : f32 to vector<8x1024xf32>
    %210 = arith.subf %208, %209 : vector<8x1024xf32>
    %211 = arith.mulf %210, %210 : vector<8x1024xf32>
    %212 = arith.addf %207, %211 : vector<8x1024xf32>
    %c16_85 = arith.constant 16 : index
    %c0_86 = arith.constant 0 : index
    %213 = vector.load %arg2[%c16_85, %c0_86] : memref<24x1024xf32, #tpu.memory_space<vmem>>, vector<8x1024xf32>
    %214 = vector.broadcast %203 : f32 to vector<8x1024xf32>
    %215 = arith.subf %213, %214 : vector<8x1024xf32>
    %216 = arith.mulf %215, %215 : vector<8x1024xf32>
    %217 = arith.addf %212, %216 : vector<8x1024xf32>
    %218 = math.sqrt %217 : vector<8x1024xf32>
    %cst_87 = arith.constant 3.33333325 : f32
    %219 = vector.broadcast %cst_87 : f32 to vector<8x1024xf32>
    %220 = arith.mulf %218, %219 : vector<8x1024xf32>
    %cst_88 = arith.constant 1.000000e+00 : f32
    %221 = vector.broadcast %cst_88 : f32 to vector<8x1024xf32>
    %222 = arith.subf %221, %220 : vector<8x1024xf32>
    %cst_89 = arith.constant 0.000000e+00 : f32
    %223 = vector.broadcast %cst_89 : f32 to vector<8x1024xf32>
    %224 = arith.maximumf %222, %223 : vector<8x1024xf32>
    %225 = vector.extract_strided_slice %224 {offsets = [0, 0], sizes = [1, 1024], strides = [1, 1]} : vector<8x1024xf32> to vector<1x1024xf32>
    %c0_90 = arith.constant 0 : index
    %c0_91 = arith.constant 0 : index
    %226 = vector.load %arg1[%c0_90, %c0_91] : memref<64x1024xf32, #tpu.memory_space<vmem>>, vector<8x1024xf32>
    %227 = vector.broadcast %225 : vector<1x1024xf32> to vector<8x1024xf32>
    %228 = arith.mulf %227, %226 : vector<8x1024xf32>
    %229 = vector.extract_strided_slice %224 {offsets = [1, 0], sizes = [1, 1024], strides = [1, 1]} : vector<8x1024xf32> to vector<1x1024xf32>
    %c8_92 = arith.constant 8 : index
    %c0_93 = arith.constant 0 : index
    %230 = vector.load %arg1[%c8_92, %c0_93] : memref<64x1024xf32, #tpu.memory_space<vmem>>, vector<8x1024xf32>
    %231 = vector.broadcast %229 : vector<1x1024xf32> to vector<8x1024xf32>
    %232 = arith.mulf %231, %230 : vector<8x1024xf32>
    %233 = arith.addf %228, %232 : vector<8x1024xf32>
    %234 = vector.extract_strided_slice %224 {offsets = [2, 0], sizes = [1, 1024], strides = [1, 1]} : vector<8x1024xf32> to vector<1x1024xf32>
    %c16_94 = arith.constant 16 : index
    %c0_95 = arith.constant 0 : index
    %235 = vector.load %arg1[%c16_94, %c0_95] : memref<64x1024xf32, #tpu.memory_space<vmem>>, vector<8x1024xf32>
    %236 = vector.broadcast %234 : vector<1x1024xf32> to vector<8x1024xf32>
    %237 = arith.mulf %236, %235 : vector<8x1024xf32>
    %238 = arith.addf %233, %237 : vector<8x1024xf32>
    %239 = vector.extract_strided_slice %224 {offsets = [3, 0], sizes = [1, 1024], strides = [1, 1]} : vector<8x1024xf32> to vector<1x1024xf32>
    %c24_96 = arith.constant 24 : index
    %c0_97 = arith.constant 0 : index
    %240 = vector.load %arg1[%c24_96, %c0_97] : memref<64x1024xf32, #tpu.memory_space<vmem>>, vector<8x1024xf32>
    %241 = vector.broadcast %239 : vector<1x1024xf32> to vector<8x1024xf32>
    %242 = arith.mulf %241, %240 : vector<8x1024xf32>
    %243 = arith.addf %238, %242 : vector<8x1024xf32>
    %244 = vector.extract_strided_slice %224 {offsets = [4, 0], sizes = [1, 1024], strides = [1, 1]} : vector<8x1024xf32> to vector<1x1024xf32>
    %c32_98 = arith.constant 32 : index
    %c0_99 = arith.constant 0 : index
    %245 = vector.load %arg1[%c32_98, %c0_99] : memref<64x1024xf32, #tpu.memory_space<vmem>>, vector<8x1024xf32>
    %246 = vector.broadcast %244 : vector<1x1024xf32> to vector<8x1024xf32>
    %247 = arith.mulf %246, %245 : vector<8x1024xf32>
    %248 = arith.addf %243, %247 : vector<8x1024xf32>
    %249 = vector.extract_strided_slice %224 {offsets = [5, 0], sizes = [1, 1024], strides = [1, 1]} : vector<8x1024xf32> to vector<1x1024xf32>
    %c40_100 = arith.constant 40 : index
    %c0_101 = arith.constant 0 : index
    %250 = vector.load %arg1[%c40_100, %c0_101] : memref<64x1024xf32, #tpu.memory_space<vmem>>, vector<8x1024xf32>
    %251 = vector.broadcast %249 : vector<1x1024xf32> to vector<8x1024xf32>
    %252 = arith.mulf %251, %250 : vector<8x1024xf32>
    %253 = arith.addf %248, %252 : vector<8x1024xf32>
    %254 = vector.extract_strided_slice %224 {offsets = [6, 0], sizes = [1, 1024], strides = [1, 1]} : vector<8x1024xf32> to vector<1x1024xf32>
    %c48_102 = arith.constant 48 : index
    %c0_103 = arith.constant 0 : index
    %255 = vector.load %arg1[%c48_102, %c0_103] : memref<64x1024xf32, #tpu.memory_space<vmem>>, vector<8x1024xf32>
    %256 = vector.broadcast %254 : vector<1x1024xf32> to vector<8x1024xf32>
    %257 = arith.mulf %256, %255 : vector<8x1024xf32>
    %258 = arith.addf %253, %257 : vector<8x1024xf32>
    %259 = vector.extract_strided_slice %224 {offsets = [7, 0], sizes = [1, 1024], strides = [1, 1]} : vector<8x1024xf32> to vector<1x1024xf32>
    %c56_104 = arith.constant 56 : index
    %c0_105 = arith.constant 0 : index
    %260 = vector.load %arg1[%c56_104, %c0_105] : memref<64x1024xf32, #tpu.memory_space<vmem>>, vector<8x1024xf32>
    %261 = vector.broadcast %259 : vector<1x1024xf32> to vector<8x1024xf32>
    %262 = arith.mulf %261, %260 : vector<8x1024xf32>
    %263 = arith.addf %258, %262 : vector<8x1024xf32>
    %c48_106 = arith.constant 48 : index
    %c0_107 = arith.constant 0 : index
    %264 = vector.load %arg5[%c48_106, %c0_107] : memref<80x8xf32, #tpu.memory_space<vmem>>, vector<16x8xf32>
    %cst_108 = arith.constant dense<0.000000e+00> : vector<16x1024xf32>
    %265 = tpu.matmul %264, %263, %cst_108 {dimension_numbers = #tpu.dot_dimension_numbers<[1], [0], [0], [1], [0, 0, 1, 1], [], []>} : vector<16x8xf32>, vector<8x1024xf32>, vector<16x1024xf32> -> vector<16x1024xf32>
    %266 = arith.addf %200, %265 : vector<16x1024xf32>
    %cst_109 = arith.constant 0.000000e+00 : f32
    %267 = vector.broadcast %cst_109 : f32 to vector<16x1024xf32>
    %268 = arith.cmpf oge, %266, %267 : vector<16x1024xf32>
    %cst_110 = arith.constant 1.000000e-01 : f32
    %269 = vector.broadcast %cst_110 : f32 to vector<16x1024xf32>
    %270 = arith.mulf %269, %266 : vector<16x1024xf32>
    %271 = arith.select %268, %266, %270 : vector<16x1024xi1>, vector<16x1024xf32>
    %c0_111 = arith.constant 0 : index
    %c0_112 = arith.constant 0 : index
    %272 = vector.load %arg6[%c0_111, %c0_112] : memref<16x1024xf32, #tpu.memory_space<vmem>>, vector<16x1024xf32>
    tpu.vector_store %arg6[%c0_111, %c0_112], %271 {strides = array<i32>} : memref<16x1024xf32, #tpu.memory_space<vmem>>, vector<16x1024xf32>,
    return
  }
  func.func @transform_0(%arg0: i32) -> (i32, i32) {
    %c0_i32 = arith.constant 0 : i32
    %c0_i32_0 = arith.constant 0 : i32
    return %c0_i32, %arg0 : i32, i32
  }
  func.func @transform_1(%arg0: i32) -> (i32, i32) {
    %c0_i32 = arith.constant 0 : i32
    %c0_i32_0 = arith.constant 0 : i32
    return %c0_i32, %arg0 : i32, i32
  }
  func.func @transform_2(%arg0: i32) -> (i32, i32) {
    %c0_i32 = arith.constant 0 : i32
    %c0_i32_0 = arith.constant 0 : i32
    return %c0_i32, %arg0 : i32, i32
  }
  func.func @transform_3(%arg0: i32) -> i32 {
    %c0_i32 = arith.constant 0 : i32
    %c0_i32_0 = arith.constant 0 : i32
    return %c0_i32 : i32
  }
  func.func @transform_4(%arg0: i32) -> (i32, i32) {
    %c0_i32 = arith.constant 0 : i32
    %c0_i32_0 = arith.constant 0 : i32
    %c0_i32_1 = arith.constant 0 : i32
    return %c0_i32, %c0_i32_0 : i32, i32
  }
  func.func @transform_5(%arg0: i32) -> (i32, i32) {
    %c0_i32 = arith.constant 0 : i32
    %c0_i32_0 = arith.constant 0 : i32
    return %c0_i32, %arg0 : i32, i32
  }
}

</mosaic_0001>

<bundles_post_ra>
// kernel: custom-call.1
= control target key start
LH: loop header
LB: loop body
LE: loop exit
PB: predicated region body
PF: predicated region fallthrough
CT: control target
= control target key end

     0   :  { %s6_s0 = inlined_call_operand.vmem [shape: u32[2000], index: 0, kind: output, shape index: {}]  }

// kernel: forward.2
= control target key start
LH: loop header
LB: loop body
LE: loop exit
PB: predicated region body
PF: predicated region fallthrough
CT: control target
= control target key end

     0   :  { %s3062_s0 = inlined_call_operand.<no memory space> [shape: s32[1], index: 0, kind: input, shape index: {}]   ;;  %s3063_s1 = inlined_call_operand.vmem [shape: f32[11,2048], index: 1, kind: input, shape index: {}]   ;;  %s3064_s2 = inlined_call_operand.vmem [shape: f32[64,32], index: 2, kind: input, shape index: {}]   ;;  %s3065_s3 = inlined_call_operand.vmem [shape: f32[8,2048], index: 3, kind: output, shape index: {0}]   ;;  %s3066_s4 = inlined_call_operand.vmem [shape: f32[8,256], index: 4, kind: output, shape index: {1}]  }
   0x1   :  { %10 = sst [smem:[#allocation2]] %s3062_s0 }
   0x2   :  { %s2254_s17 = smov 0   ;;  %s2256_s18 = smov 0  }
   0x3   :  { %s2258_s19 = smov 0  }
   0x4 LB: > { %s2270_s0 = sadd.s32 4294967295, %s2219_s19   ;;  %s2273_s20 = sadd.s32 1, %s2219_s19   ;;  %s2219_s19 = sphi %s2258_s19, %s3071_s19   ;;  %s2215_s18 = sphi %s2256_s18, %s3070_s18   ;;  %s2211_s17 = sphi %s2254_s17, %s3069_s17  }
   0x5   : > { %s41_s21 = ssub.s32 %s2219_s19, %s2273_s20  ;;  %s44_s22 = sadd.s32 1, %s2215_s18 }
   0x6   : > { %p42_p0 = scmp.eq.s32.totalorder %s41_s21, 0  ;;  %p51_p1 = scmp.ne.s32.totalorder %s2215_s18, %s2211_s17 }
   0x7   : > { %p52_p2 = scmp.eq.s32.totalorder %s2219_s19, 0  ;;  %p1953_p4 = scmp.ge.s32.totalorder %s2219_s19, 2 }
   0x8   : > { %s2282_s23 = scalar_select %p42_p0, %s2215_s18, %s44_s22  }
   0x9   : > { %p53_p3 = por %p52_p2, %p51_p1  ;;  %156 = sbr.rel (%p1953_p4) target bundleno = 28 (0x1c), region = 24 }
  0x10   : > { %159 = sbr.rel (!%p53_p3) target bundleno = 28 (0x1c), region = 28  ;;  %s161_s24 = sand.u32 (%p53_p3), 1, %s2215_s18  }
  0x11   : > { %s2009_s25 = sshll.u32 (%p53_p3), %s2219_s19, 6  ;;  %s1954_s26 = sshll.u32 (%p53_p3), %s161_s24, 7 }
  0x12   : > { %s2290_s29 = scalar_lea.vmem (%p53_p3), %s3063_s1, %s2009_s25  ;;  %s163_s30 = scalar_lea.vmem (%p53_p3), [#allocation3], %s1954_s26 }
  0x13   : > { %v179_v0 = vld [vmem:[%s2290_s29] sm:$0xff] (%p53_p3)  ;;  %v181_v1 = vld [vmem:[%s2290_s29 + $0x8] sm:$0xff] (%p53_p3)  ;;  %v183_v2 = vld [vmem:[%s2290_s29 + $0x10] sm:$0xff] (%p53_p3) }
  0x14   : > { %180 = vst [vmem:[%s163_s30] sm:$0xff] (%p53_p3), %v179_v0  ;;  %182 = vst [vmem:[%s163_s30 + $0x8] sm:$0xff] (%p53_p3), %v181_v1  ;;  %v185_v3 = vld [vmem:[%s2290_s29 + $0x18] sm:$0xff] (%p53_p3)  ;;  %v187_v4 = vld [vmem:[%s2290_s29 + $0x20] sm:$0xff] (%p53_p3) }
  0x15   : > { %184 = vst [vmem:[%s163_s30 + $0x10] sm:$0xff] (%p53_p3), %v183_v2  ;;  %v189_v5 = vld [vmem:[%s2290_s29 + $0x28] sm:$0xff] (%p53_p3)  ;;  %186 = vst [vmem:[%s163_s30 + $0x18] sm:$0xff] (%p53_p3), %v185_v3  ;;  %v191_v6 = vld [vmem:[%s2290_s29 + $0x30] sm:$0xff] (%p53_p3) }
  0x16   : > { %188 = vst [vmem:[%s163_s30 + $0x20] sm:$0xff] (%p53_p3), %v187_v4  ;;  %190 = vst [vmem:[%s163_s30 + $0x28] sm:$0xff] (%p53_p3), %v189_v5  ;;  %v193_v7 = vld [vmem:[%s2290_s29 + $0x38] sm:$0xff] (%p53_p3)  ;;  %v195_v8 = vld [vmem:[%s2290_s29 + $0x80] sm:$0xff] (%p53_p3) }
  0x17   : > { %192 = vst [vmem:[%s163_s30 + $0x30] sm:$0xff] %v191_v6  ;;  %194 = vst [vmem:[%s163_s30 + $0x38] sm:$0xff] %v193_v7  ;;  %v197_v9 = vld [vmem:[%s2290_s29 + $0x88] sm:$0xff]  ;;  %v199_v10 = vld [vmem:[%s2290_s29 + $0x90] sm:$0xff] }
  0x18   : > { %196 = vst [vmem:[%s163_s30 + $0x40] sm:$0xff] %v195_v8  ;;  %v201_v11 = vld [vmem:[%s2290_s29 + $0x98] sm:$0xff]  ;;  %198 = vst [vmem:[%s163_s30 + $0x48] sm:$0xff] %v197_v9  ;;  %v203_v12 = vld [vmem:[%s2290_s29 + $0xa0] sm:$0xff] }
  0x19   : > { %200 = vst [vmem:[%s163_s30 + $0x50] sm:$0xff] %v199_v10  ;;  %202 = vst [vmem:[%s163_s30 + $0x58] sm:$0xff] %v201_v11  ;;  %v205_v13 = vld [vmem:[%s2290_s29 + $0xa8] sm:$0xff]  ;;  %v207_v14 = vld [vmem:[%s2290_s29 + $0xb0] sm:$0xff] }
  0x1a   : > { %204 = vst [vmem:[%s163_s30 + $0x60] sm:$0xff] %v203_v12  ;;  %206 = vst [vmem:[%s163_s30 + $0x68] sm:$0xff] %v205_v13  ;;  %v209_v15 = vld [vmem:[%s2290_s29 + $0xb8] sm:$0xff] }
  0x1b   : > { %208 = vst [vmem:[%s163_s30 + $0x70] sm:$0xff] %v207_v14  ;;  %210 = vst [vmem:[%s163_s30 + $0x78] sm:$0xff] %v209_v15 }
  0x1c PF: > { %p1957_p5 = scmp.ge.s32.totalorder %s2219_s19, 1  ;;  %p215_p6 = scmp.lt.s32.totalorder %s2219_s19, 3 }
  0x1e   : > { %p216_p7 = pnand %p1957_p5, %p215_p6 }
  0x1f   : > { %s222_s5 = sand.u32 (!%p216_p7), 1, %s2211_s17   ;;  %vm307_vm0 = vcmask (!%p216_p7), 1042432   ;;  %v2221_v16 = vmov (!%p216_p7), 0.0   ;;  %vm2222_vm1 = vmmov (!%p216_p7), 1   ;;  %v2320_v18 = vld [vmem:[%s3064_s2] sm:$0xff] (!%p216_p7)  ;;  %v2325_v19 = vld [vmem:[%s3064_s2 + $0x10] sm:$0xff] (!%p216_p7) }
  0x20   : > { %219 = sbr.rel (%p216_p7) target bundleno = 973 (0x3cd), region = 51  ;;  %s1958_s6 = sshll.u32 (!%p216_p7), %s222_s5, 7  ;;  %396 = vmatprep.mubr.f32.mxu0 (!%p216_p7), %v2221_v16  ;;  %479 = vmatprep.mubr.f32.mxu1 (!%p216_p7), %v2221_v16  ;;  %vm2313_vm2 = vmpackc.low (!%p216_p7), %vm307_vm0, %vm2222_vm1  ;;  %v2223_v20 = vmov (!%p216_p7), 24   ;;  %v263_v32 = vld [vmem:[%s3064_s2 + $0x8] sm:$0xff] (!%p216_p7)  ;;  %vm300_vm3 = vcmask (!%p216_p7), 89088   ;;  %v2224_v46 = vmov (!%p216_p7), 25  }
  0x21   : > { %2095 = vset.pattern.permute.xlu0 (!%p216_p7), %v2223_v20  ;;  %2096 = vset.pattern.permute.xlu1 (!%p216_p7), %v2223_v20  ;;  %s2327_s11 = scalar_lea.vmem (!%p216_p7), [#allocation3], %s1958_s6  ;;  %vm892_vm4 = vcmask (!%p216_p7), 195584   ;;  %s1959_s25 = sshll.u32 (!%p216_p7), %s2270_s0, 3 }
  0x22   : > { %v270_v21 = vld [vmem:[%s2327_s11 + $0x8] sm:$0xff] (!%p216_p7)  ;;  %v272_v23 = vld [vmem:[%s2327_s11 + $0x18] sm:$0xff] (!%p216_p7)  ;;  %287 = vperm.xlu0 (!%p216_p7), %2095, %v2320_v18   ;;  %297 = vperm.xlu1 (!%p216_p7), %2096, %v2325_v19   ;;  %v269_v26 = vld [vmem:[%s2327_s11] sm:$0xff] (!%p216_p7)  ;;  %s1792_s26 = sld [smem:[#allocation2]] (!%p216_p7)  ;;  %s1998_s27 = sshll.u32 (!%p216_p7), %s2270_s0, 10 }
  0x23   : > { %v278_v22 = vld [vmem:[%s2327_s11 + $0x48] sm:$0x7] (!%p216_p7)  ;;  %v280_v25 = vld [vmem:[%s2327_s11 + $0x58] sm:$0x7] (!%p216_p7)  ;;  %v277_v27 = vld [vmem:[%s2327_s11 + $0x40] sm:$0x7] (!%p216_p7) }
  0x24   : > { %v2010_v24 = vpack.c.bf16 (!%p216_p7), %v278_v22, %v270_v21  ;;  %v2016_v28 = vpack.c.bf16 (!%p216_p7), %v280_v25, %v272_v23  ;;  %v2013_v29 = vpack.c.bf16 (!%p216_p7), %v277_v27, %v269_v26  ;;  %v271_v30 = vld [vmem:[%s2327_s11 + $0x10] sm:$0xff] (!%p216_p7)  ;;  %v274_v33 = vld [vmem:[%s2327_s11 + $0x28] sm:$0xff] (!%p216_p7)  ;;  %v273_v36 = vld [vmem:[%s2327_s11 + $0x20] sm:$0xff] (!%p216_p7)  ;;  %p253_p8 = scmp.lt.s32.totalorder (!%p216_p7), %s1959_s25, 15  ;;  %p258_p9 = scmp.lt.s32.totalorder (!%p216_p7), %s2270_s0, 1 }
  0x25   : > { %v279_v31 = vld [vmem:[%s2327_s11 + $0x50] sm:$0x7] (!%p216_p7)  ;;  %v282_v35 = vld [vmem:[%s2327_s11 + $0x68] sm:$0x7] (!%p216_p7)  ;;  %v281_v37 = vld [vmem:[%s2327_s11 + $0x60] sm:$0x7] (!%p216_p7) }
  0x26   : > { %2012 = vmatprep.subr.msk.bf16.mxu0 (!%p216_p7), %vm2313_vm2, %v2010_v24  ;;  %v2019_v34 = vpack.c.bf16 (!%p216_p7), %v279_v31, %v271_v30  ;;  %2018 = vmatprep.subr.msk.bf16.mxu1 (!%p216_p7), %vm2313_vm2, %v2016_v28  ;;  %v2022_v38 = vpack.c.bf16 (!%p216_p7), %v282_v35, %v274_v33  ;;  %v276_v39 = vld [vmem:[%s2327_s11 + $0x38] sm:$0xff] (!%p216_p7)  ;;  %v275_v41 = vld [vmem:[%s2327_s11 + $0x30] sm:$0xff] (!%p216_p7)  ;;  %v2025_v42 = vpack.c.bf16 (!%p216_p7), %v281_v37, %v273_v36 }
  0x27   : > { %2015 = vmatpush1.bf16.msk.msra.mxu0 %vm2313_vm2, %v2013_v29  ;;  %v284_v40 = vld [vmem:[%s2327_s11 + $0x78] sm:$0x7]  ;;  %v283_v44 = vld [vmem:[%s2327_s11 + $0x70] sm:$0x7]  ;;  %292 = vperm.xlu0 %2095, %v263_v32   ;;  %s3073_s25 = smov (!%p253_p8, %s1959_s25), 15  ;;  %s3075_s0 = smov (!%p258_p9, %s2270_s0), 1 }
  0x28   : > { %2021 = vmatpush1.bf16.msk.msra.mxu1 %vm2313_vm2, %v2019_v34  ;;  %v2028_v43 = vpack.c.bf16 %v284_v40, %v276_v39  ;;  %2024 = vmatprep.subr.msk.bf16.mxu0 %vm2313_vm2, %v2022_v38  ;;  %v2031_v45 = vpack.c.bf16 %v283_v44, %v275_v41  ;;  %s1960_s28 = sshll.u32 %s3073_s25, 3  ;;  %s1961_s6 = sshll.u32 %s3075_s0, 3 }
  0x29   : > { %2097 = vset.pattern.permute.xlu1 %v2224_v46  ;;  %s3007_s5 = scalar_lea.vmem %s3065_s3, %s1960_s28  ;;  %s261_s9 = scalar_lea.vmem %s3066_s4, %s1961_s6 }
  0x2a   : > { %1964 = vmatmul.mubr.msk.f32.vlgmr.msra.gmra.mrb[0].mxu0 %vm300_vm3, %v2320_v18  ;;  %2030 = vmatprep.subr.msk.bf16.mxu1 %vm2313_vm2, %v2028_v43 }
  0x2b   : > { %1969 = vmatmul.mubr.msk.f32.vlgmr.msra.gmra.mrb[0].mxu1 %vm300_vm3, %v2320_v18  ;;  %402 = vmatprep.mubr.f32.mxu0 %v2221_v16 }
  0x2c   : > { %485 = vmatprep.mubr.f32.mxu1 %v2221_v16  ;;  %2027 = vmatpush1.bf16.msk.msra.mxu0 %vm2313_vm2, %v2025_v42 }
  0x2d   : > { %2033 = vmatpush1.bf16.msk.msra.mxu1 %vm2313_vm2, %v2031_v45  ;;  %2098 = vset.pattern.permute.xlu0 %v2224_v46 }
  0x2e   : > { %1965 = vmatmul.mubr.msk.f32.gmra.mrb[2].mxu0 %vm300_vm3, %v263_v32  ;;  %881 = vperm.xlu1 %2097, %v2320_v18  }
  0x2f   : > { %1970 = vmatmul.mubr.msk.f32.gmra.mrb[2].mxu1 %vm300_vm3, %v263_v32  ;;  %408 = vmatprep.mubr.f32.mxu0 %v2221_v16 }
  0x30   : > { %491 = vmatprep.mubr.f32.mxu1 %v2221_v16  ;;  %885 = vperm.xlu0 %2098, %v263_v32  }
  0x32   : > { %1966 = vmatmul.mubr.msk.f32.gmra.mrb[4].mxu0 %vm300_vm3, %v2325_v19  ;;  %889 = vperm.xlu1 %2097, %v2325_v19  }
  0x33   : > { %1971 = vmatmul.mubr.msk.f32.gmra.mrb[4].mxu1 %vm300_vm3, %v2325_v19  ;;  %562 = vmatprep.mubr.f32.mxu0 %v2221_v16 }
  0x34   : > { %645 = vmatprep.mubr.f32.mxu1 %v2221_v16 }
  0x36   : > { %1974 = vmatmul.mubr.msk.f32.vlgmr.msra.gmra.mrb[6].mxu0 %vm300_vm3, %v2320_v18 }
  0x37   : > { %1979 = vmatmul.mubr.msk.f32.vlgmr.msra.gmra.mrb[6].mxu1 %vm300_vm3, %v2320_v18  ;;  %568 = vmatprep.mubr.f32.mxu0 %v2221_v16 }
  0x38   : > { %651 = vmatprep.mubr.f32.mxu1 %v2221_v16 }
  0x3a   : > { %1975 = vmatmul.mubr.msk.f32.gmra.mrb[8].mxu0 %vm300_vm3, %v263_v32 }
  0x3b   : > { %1980 = vmatmul.mubr.msk.f32.gmra.mrb[8].mxu1 %vm300_vm3, %v263_v32  ;;  %574 = vmatprep.mubr.f32.mxu0 %v2221_v16 }
  0x3c   : > { %657 = vmatprep.mubr.f32.mxu1 %v2221_v16 }
  0x3e   : > { %1976 = vmatmul.mubr.msk.f32.gmra.mrb[10].mxu0 %vm300_vm3, %v2325_v19 }
  0x3f   : > { %1981 = vmatmul.mubr.msk.f32.gmra.mrb[10].mxu1 %vm300_vm3, %v2325_v19  ;;  %966 = vmatprep.mubr.f32.mxu0 %v2221_v16 }
  0x40   : > { %1049 = vmatprep.mubr.f32.mxu1 %v2221_v16 }
  0xa1   : > { %v2400_v47 = vpop.permute.xlu0 %287  ;;  %v2431_v9 = vpop.permute.xlu1 %297 }
  0xa6   : > { %v2413_v58 = vpop.permute.xlu0 %292 }
  0xfd   : > { %v398_v48 = vpop.f32.mrb[0].mxu0 }
  0xfe   : > { %v399_v49 = vadd.f32 %v398_v48, %v2400_v47  ;;  %v481_v50 = vpop.f32.mrb[0].mxu1  ;;  %v400_v51 = vpop.f32.mrb[1].mxu0 }
  0xff   : > { %v2404_v52 = vadd.f32 %v481_v50, %v2400_v47  ;;  %v2407_v53 = vadd.f32 %v400_v51, %v2400_v47  ;;  %v483_v54 = vpop.f32.mrb[1].mxu1 }
 0x100   : > { %v688_v55 = vmul.f32 0.044715, %v399_v49  ;;  %v2410_v56 = vadd.f32 %v483_v54, %v2400_v47  ;;  %v2443_v25 = vmul.f32 0.5, %v399_v49 }
 0x101   : > { %v690_v57 = vmul.f32 0.044715, %v2404_v52  ;;  %v404_v59 = vpop.f32.mrb[2].mxu0  ;;  %v689_v1 = vmul.f32 0.044715, %v2407_v53  ;;  %v2460_v44 = vmul.f32 0.5, %v2407_v53 }
 0x102   : > { %v712_v60 = vmul.f32 %v688_v55, %v399_v49  ;;  %v2416_v61 = vadd.f32 %v404_v59, %v2413_v58  ;;  %v487_v62 = vpop.f32.mrb[2].mxu1  ;;  %v406_v63 = vpop.f32.mrb[3].mxu0  ;;  %v691_v6 = vmul.f32 0.044715, %v2410_v56  ;;  %v2463_v45 = vmul.f32 0.5, %v2410_v56 }
 0x103   : > { %v714_v0 = vmul.f32 %v690_v57, %v2404_v52  ;;  %v2421_v2 = vadd.f32 %v487_v62, %v2413_v58  ;;  %v2424_v3 = vadd.f32 %v406_v63, %v2413_v58  ;;  %v489_v4 = vpop.f32.mrb[3].mxu1  ;;  %v713_v26 = vmul.f32 %v689_v1, %v2407_v53 }
 0x104   : > { %v736_v5 = vmul.f32 %v712_v60, %v399_v49  ;;  %v696_v7 = vmul.f32 0.044715, %v2416_v61  ;;  %v2429_v8 = vadd.f32 %v489_v4, %v2413_v58  ;;  %v715_v27 = vmul.f32 %v691_v6, %v2410_v56 }
 0x105   : > { %v738_v10 = vmul.f32 %v714_v0, %v2404_v52  ;;  %v698_v11 = vmul.f32 0.044715, %v2421_v2  ;;  %v697_v12 = vmul.f32 0.044715, %v2424_v3  ;;  %v410_v13 = vpop.f32.mrb[4].mxu0  ;;  %v2466_v46 = vmul.f32 %v713_v26, %v2407_v53 }
 0x106   : > { %v760_v14 = vadd.f32 %v736_v5, %v399_v49  ;;  %v720_v15 = vmul.f32 %v696_v7, %v2416_v61  ;;  %v699_v17 = vmul.f32 0.044715, %v2429_v8  ;;  %v493_v19 = vpop.f32.mrb[4].mxu1  ;;  %v412_v20 = vpop.f32.mrb[5].mxu0  ;;  %v2441_v23 = vadd.f32 %v410_v13, %v2431_v9 }
 0x107   : > { %v762_v21 = vadd.f32 %v738_v10, %v2404_v52  ;;  %v722_v22 = vmul.f32 %v698_v11, %v2421_v2  ;;  %v495_v24 = vpop.f32.mrb[5].mxu1  ;;  %v2449_v29 = vadd.f32 %v493_v19, %v2431_v9  ;;  %v721_v32 = vmul.f32 %v697_v12, %v2424_v3 }
 0x108   : > { %v744_v28 = vmul.f32 %v720_v15, %v2416_v61  ;;  %v784_v30 = vmul.f32 0.7978846, %v760_v14  ;;  %v704_v33 = vmul.f32 0.044715, %v2441_v23  ;;  %v723_v37 = vmul.f32 %v699_v17, %v2429_v8 }
 0x109   : > { %v746_v31 = vmul.f32 %v722_v22, %v2421_v2  ;;  %v564_v34 = vpop.f32.mrb[6].mxu0  ;;  %v786_v35 = vmul.f32 0.7978846, %v762_v21  ;;  %v706_v38 = vmul.f32 0.044715, %v2449_v29  ;;  %v2470_v49 = vadd.f32 %v412_v20, %v2431_v9 }
 0x10a   : > { %v768_v36 = vadd.f32 %v744_v28, %v2416_v61  ;;  %v647_v39 = vpop.f32.mrb[6].mxu1  ;;  %v566_v40 = vpop.f32.mrb[7].mxu0  ;;  %v728_v42 = vmul.f32 %v704_v33, %v2441_v23  ;;  %v2473_v50 = vadd.f32 %v564_v34, %v2400_v47  ;;  %2101 = vtanh.f32 %v784_v30 }
 0x10b   : > { %v770_v41 = vadd.f32 %v746_v31, %v2421_v2  ;;  %v649_v43 = vpop.f32.mrb[7].mxu1  ;;  %v730_v48 = vmul.f32 %v706_v38, %v2449_v29  ;;  %v2476_v51 = vmul.f32 %v715_v27, %v2410_v56  ;;  %v2479_v54 = vmul.f32 %v721_v32, %v2424_v3 }
 0x10c   : > { %v2482_v55 = vadd.f32 %v647_v39, %v2400_v47  ;;  %2103 = vtanh.f32 %v786_v35  ;;  %v792_v59 = vmul.f32 0.7978846, %v768_v36  ;;  %v2485_v60 = vmul.f32 %v723_v37, %v2429_v8 }
 0x10d   : > { %v570_v57 = vpop.f32.mrb[8].mxu0  ;;  %v692_v62 = vmul.f32 0.044715, %v2473_v50  ;;  %v794_v1 = vmul.f32 0.7978846, %v770_v41  ;;  %v752_v4 = vmul.f32 %v728_v42, %v2441_v23  ;;  %v2490_v5 = vadd.f32 %v495_v24, %v2431_v9 }
 0x10e   : > { %v653_v63 = vpop.f32.mrb[8].mxu1  ;;  %v572_v0 = vpop.f32.mrb[9].mxu0  ;;  %v694_v6 = vmul.f32 0.044715, %v2482_v55  ;;  %v754_v10 = vmul.f32 %v730_v48, %v2449_v29  ;;  %v705_v11 = vmul.f32 0.044715, %v2470_v49  ;;  %v2497_v13 = vadd.f32 %v566_v40, %v2400_v47 }
 0x10f   : > { %v655_v7 = vpop.f32.mrb[9].mxu1  ;;  %v716_v12 = vmul.f32 %v692_v62, %v2473_v50  ;;  %v2501_v15 = vadd.f32 %v649_v43, %v2400_v47  ;;  %v2504_v17 = vadd.f32 %v570_v57, %v2413_v58  ;;  %v2507_v19 = vadd.f32 %v653_v63, %v2413_v58 }
 0x110   : > { %v718_v14 = vmul.f32 %v694_v6, %v2482_v55  ;;  %v693_v22 = vmul.f32 0.044715, %v2497_v13  ;;  %v2512_v24 = vadd.f32 %v572_v0, %v2413_v58  ;;  %v2515_v26 = vadd.f32 %v655_v7, %v2413_v58 }
 0x111   : > { %v576_v20 = vpop.f32.mrb[10].mxu0  ;;  %v740_v21 = vmul.f32 %v716_v12, %v2473_v50  ;;  %v695_v30 = vmul.f32 0.044715, %v2501_v15  ;;  %v700_v31 = vmul.f32 0.044715, %v2504_v17  ;;  %2105 = vtanh.f32 %v792_v59 }
 0x112   : > { %v659_v27 = vpop.f32.mrb[10].mxu1  ;;  %v578_v47 = vpop.f32.mrb[11].mxu0  ;;  %v742_v28 = vmul.f32 %v718_v14, %v2482_v55  ;;  %v702_v32 = vmul.f32 0.044715, %v2507_v19  ;;  %v701_v34 = vmul.f32 0.044715, %v2512_v24  ;;  %2107 = vtanh.f32 %v794_v1 }
 0x113   : > { %v764_v33 = vadd.f32 %v740_v21, %v2473_v50  ;;  %v703_v35 = vmul.f32 0.044715, %v2515_v26  ;;  %v661_v36 = vpop.f32.mrb[11].mxu1  ;;  %v707_v58 = vmul.f32 0.044715, %v2490_v5  ;;  %v724_v38 = vmul.f32 %v700_v31, %v2504_v17 }
 0x114   : > { %v766_v37 = vadd.f32 %v742_v28, %v2482_v55  ;;  %v726_v39 = vmul.f32 %v702_v32, %v2507_v19  ;;  %v2529_v40 = vadd.f32 %v752_v4, %v2441_v23  ;;  %v729_v41 = vmul.f32 %v705_v11, %v2470_v49  ;;  %v2102_v43 = vpop.eup %2101 }
 0x115   : > { %v717_v42 = vmul.f32 %v693_v22, %v2497_v13  ;;  %v2534_v48 = vadd.f32 %v754_v10, %v2449_v29  ;;  %v719_v57 = vmul.f32 %v695_v30, %v2501_v15  ;;  %v748_v59 = vmul.f32 %v724_v38, %v2504_v17 }
 0x116   : > { %v750_v62 = vmul.f32 %v726_v39, %v2507_v19  ;;  %v2104_v63 = vpop.eup %2103  ;;  %v788_v0 = vmul.f32 0.7978846, %v764_v33  ;;  %v725_v1 = vmul.f32 %v701_v34, %v2512_v24  ;;  %v727_v4 = vmul.f32 %v703_v35, %v2515_v26 }
 0x117   : > { %v2542_v6 = vadd.f32 %v576_v20, %v2431_v9  ;;  %v790_v7 = vmul.f32 0.7978846, %v766_v37  ;;  %v772_v11 = vadd.f32 %v748_v59, %v2504_v17  ;;  %v2547_v12 = vadd.f32 %v659_v27, %v2431_v9 }
 0x118   : > { %v774_v10 = vadd.f32 %v750_v62, %v2507_v19  ;;  %v731_v14 = vmul.f32 %v707_v58, %v2490_v5  ;;  %v2551_v21 = vmul.f32 %v717_v42, %v2497_v13  ;;  %v2555_v28 = vadd.f32 %v578_v47, %v2431_v9 }
 0x119   : > { %v708_v22 = vmul.f32 0.044715, %v2542_v6  ;;  %v2558_v20 = vmul.f32 %v719_v57, %v2501_v15  ;;  %v796_v30 = vmul.f32 0.7978846, %v772_v11  ;;  %v2561_v31 = vadd.f32 %v661_v36, %v2431_v9 }
 0x11a   : > { %v761_v27 = vadd.f32 %v2466_v46, %v2407_v53  ;;  %2109 = vtanh.f32 %v788_v0  ;;  %v798_v32 = vmul.f32 0.7978846, %v774_v10  ;;  %v710_v33 = vmul.f32 0.044715, %v2547_v12 }
 0x11b   : > { %v769_v34 = vadd.f32 %v2479_v54, %v2424_v3  ;;  %2111 = vtanh.f32 %v790_v7  ;;  %v749_v47 = vmul.f32 %v725_v1, %v2512_v24  ;;  %v2570_v35 = vmul.f32 %v727_v4, %v2515_v26  ;;  %v2106_v37 = vpop.eup %2105 }
 0x11c   : > { %v785_v58 = vmul.f32 0.7978846, %v761_v27  ;;  %2113 = vtanh.f32 %v796_v30  ;;  %v732_v9 = vmul.f32 %v708_v22, %v2542_v6  ;;  %v709_v53 = vmul.f32 0.044715, %v2555_v28  ;;  %v2108_v39 = vpop.eup %2107 }
 0x11d   : > { %v2575_v46 = vmul.f32 0.5, %v2424_v3  ;;  %v711_v36 = vmul.f32 0.044715, %v2561_v31  ;;  %v793_v38 = vmul.f32 0.7978846, %v769_v34  ;;  %v763_v54 = vadd.f32 %v2476_v51, %v2410_v56 }
 0x11e   : > { %2115 = vtanh.f32 %v785_v58  ;;  %v734_v42 = vmul.f32 %v710_v33, %v2547_v12  ;;  %v771_v57 = vadd.f32 %v2485_v60, %v2429_v8  ;;  %v832_v59 = vadd.f32 1.0, %v2102_v43 }
 0x11f   : > { %2117 = vtanh.f32 %v798_v32  ;;  %v787_v62 = vmul.f32 0.7978846, %v763_v54  ;;  %v672_v3 = vmul.f32 0.5, %v2416_v61  ;;  %v840_v0 = vadd.f32 1.0, %v2106_v37 }
 0x120   : > { %2119 = vtanh.f32 %v793_v38  ;;  %v795_v1 = vmul.f32 0.7978846, %v771_v57  ;;  %v2585_v4 = vmul.f32 %v832_v59, %v2443_v25  ;;  %v666_v7 = vmul.f32 0.5, %v2404_v52 }
 0x121   : > { %v674_v56 = vmul.f32 0.5, %v2421_v2  ;;  %2121 = vtanh.f32 %v787_v62  ;;  %v2589_v51 = vmul.f32 %v840_v0, %v672_v3  ;;  %v834_v11 = vadd.f32 1.0, %v2104_v63 }
 0x122   : > { %v842_v10 = vadd.f32 1.0, %v2108_v39  ;;  %v756_v60 = vmul.f32 %v732_v9, %v2542_v6  ;;  %v758_v43 = vmul.f32 %v734_v42, %v2547_v12  ;;  %2123 = vtanh.f32 %v795_v1 }
 0x123   : > { %v753_v61 = vmul.f32 %v729_v41, %v2470_v49  ;;  %v2036_v25 = vpack.c.bf16 %v2589_v51, %v2585_v4  ;;  %v2596_v22 = vmul.f32 %v834_v11, %v666_v7  ;;  %v755_v2 = vmul.f32 %v731_v14, %v2490_v5 }
 0x124   : > { %v2598_v52 = vmul.f32 %v842_v10, %v674_v56  ;;  %v2110_v30 = vpop.eup %2109  ;;  %v733_v63 = vmul.f32 %v709_v53, %v2555_v28  ;;  %v675_v27 = vmul.f32 0.5, %v2429_v8  ;;  %v800_v33 = vmul.f32 0.7978846, %v2529_v40 }
 0x125   : > { %v777_v32 = vadd.f32 %v753_v61, %v2470_v49  ;;  %v2112_v34 = vpop.eup %2111  ;;  %v735_v41 = vmul.f32 %v711_v36, %v2561_v31  ;;  %v779_v37 = vadd.f32 %v755_v2, %v2490_v5  ;;  %v802_v9 = vmul.f32 0.7978846, %v2534_v48 }
 0x126   : > { %v2040_v58 = vpack.c.bf16 %v2598_v52, %v2596_v22  ;;  %v2114_v14 = vpop.eup %2113  ;;  %v2611_v38 = vadd.f32 %v756_v60, %v2542_v6  ;;  %2125 = vtanh.f32 %v800_v33  ;;  %v765_v8 = vadd.f32 %v2551_v21, %v2497_v13 }
 0x127   : > { %v801_v53 = vmul.f32 0.7978846, %v777_v32  ;;  %v2616_v54 = vadd.f32 %v758_v43, %v2547_v12  ;;  %v803_v36 = vmul.f32 0.7978846, %v779_v37  ;;  %2127 = vtanh.f32 %v802_v9 }
 0x128   : > { %v2116_v40 = vpop.eup %2115  ;;  %v773_v39 = vadd.f32 %v749_v47, %v2512_v24  ;;  %v2620_v48 = vmul.f32 0.5, %v2470_v49  ;;  %v789_v59 = vmul.f32 0.7978846, %v765_v8  ;;  %v767_v21 = vadd.f32 %v2558_v20, %v2501_v15 }
 0x129   : > { %v2118_v42 = vpop.eup %2117  ;;  %v833_v57 = vadd.f32 1.0, %v2116_v40  ;;  %2129 = vtanh.f32 %v801_v53  ;;  %v775_v0 = vadd.f32 %v2570_v35, %v2515_v26  ;;  %v683_v47 = vmul.f32 0.5, %v2490_v5 }
 0x12a   : > { %v2120_v62 = vpop.eup %2119  ;;  %2131 = vtanh.f32 %v803_v36  ;;  %v797_v3 = vmul.f32 0.7978846, %v773_v39  ;;  %v791_v49 = vmul.f32 0.7978846, %v767_v21  ;;  %v668_v10 = vmul.f32 0.5, %v2473_v50 }
 0x12b   : > { %v841_v1 = vadd.f32 1.0, %v2120_v62  ;;  %v857_v7 = vmul.f32 %v833_v57, %v2460_v44  ;;  %2133 = vtanh.f32 %v789_v59  ;;  %v2122_v56 = vpop.eup %2121  ;;  %v799_v11 = vmul.f32 0.7978846, %v775_v0 }
 0x12c   : > { %2135 = vtanh.f32 %v797_v3  ;;  %v2124_v60 = vpop.eup %2123  ;;  %v835_v61 = vadd.f32 1.0, %v2122_v56  ;;  %v836_v20 = vadd.f32 1.0, %v2110_v30  ;;  %v844_v2 = vadd.f32 1.0, %v2114_v14 }
 0x12d   : > { %v865_v43 = vmul.f32 %v841_v1, %v2575_v46  ;;  %v843_v32 = vadd.f32 1.0, %v2124_v60  ;;  %v680_v35 = vmul.f32 0.5, %v2441_v23  ;;  %2137 = vtanh.f32 %v791_v49 }
 0x12e   : > { %v676_v44 = vmul.f32 0.5, %v2504_v17  ;;  %v859_v33 = vmul.f32 %v835_v61, %v2463_v45  ;;  %2139 = vtanh.f32 %v799_v11  ;;  %v2633_v37 = vmul.f32 %v836_v20, %v668_v10 }
 0x12f   : > { %v2034_v5 = vpack.c.bf16 %v865_v43, %v857_v7  ;;  %v867_v50 = vmul.f32 %v843_v32, %v675_v27  ;;  %v838_v46 = vadd.f32 1.0, %v2112_v34  ;;  %v846_v53 = vadd.f32 1.0, %v2118_v42 }
 0x130   : > { %v2635_v9 = vmul.f32 %v844_v2, %v676_v44  ;;  %v2126_v30 = vpop.eup %2125  ;;  %v670_v14 = vmul.f32 0.5, %v2482_v55  ;;  %v678_v23 = vmul.f32 0.5, %v2507_v19  ;;  %v757_v17 = vmul.f32 %v733_v63, %v2555_v28 }
 0x131   : > { %2035 = vmatprep.subr.bf16.mxu0 %v2034_v5  ;;  %v759_v8 = vmul.f32 %v735_v41, %v2561_v31  ;;  %v2128_v45 = vpop.eup %2127  ;;  %v2038_v40 = vpack.c.bf16 %v867_v50, %v859_v33  ;;  %v848_v27 = vadd.f32 1.0, %v2126_v30  ;;  %v682_v34 = vmul.f32 0.5, %v2449_v29 }
 0x132   : > { %2037 = vmatpush1.bf16.msra.mxu0 %v2036_v25  ;;  %v2044_v36 = vpack.c.bf16 %v2635_v9, %v2633_v37  ;;  %v862_v55 = vmul.f32 %v838_v46, %v670_v14  ;;  %v870_v42 = vmul.f32 %v846_v53, %v678_v23  ;;  %v781_v19 = vadd.f32 %v757_v17, %v2555_v28 }
 0x133   : > { %v2130_v39 = vpop.eup %2129  ;;  %v783_v63 = vadd.f32 %v759_v8, %v2561_v31  ;;  %2039 = vmatprep.subr.bf16.mxu1 %v2038_v40  ;;  %v850_v59 = vadd.f32 1.0, %v2128_v45  ;;  %v669_v4 = vmul.f32 0.5, %v2497_v13  ;;  %v804_v51 = vmul.f32 0.7978846, %v2611_v38  ;;  %v2659_v38 = vld [vmem:[%s3064_s2 + $0x18] sm:$0xff] }
 0x134   : > { %v2132_v41 = vpop.eup %2131  ;;  %v849_v57 = vadd.f32 1.0, %v2130_v39  ;;  %2041 = vmatpush1.bf16.msra.mxu1 %v2040_v58  ;;  %v677_v62 = vmul.f32 0.5, %v2512_v24  ;;  %v2048_v3 = vpack.c.bf16 %v870_v42, %v862_v55  ;;  %v805_v21 = vmul.f32 0.7978846, %v781_v19  ;;  %v2712_v42 = vpop.permute.xlu0 %885 }
 0x135   : > { %v2134_v25 = vpop.eup %2133  ;;  %v851_v29 = vadd.f32 1.0, %v2132_v41  ;;  %v807_v56 = vmul.f32 0.7978846, %v783_v63  ;;  %2141 = vtanh.f32 %v804_v51  ;;  %v872_v13 = vmul.f32 %v848_v27, %v680_v35 }
 0x136   : > { %v2136_v0 = vpop.eup %2135  ;;  %v873_v1 = vmul.f32 %v849_v57, %v2620_v48  ;;  %v837_v7 = vadd.f32 1.0, %v2134_v25  ;;  %2143 = vtanh.f32 %v805_v21  ;;  %v874_v24 = vmul.f32 %v850_v59, %v682_v34 }
 0x137   : > { %v875_v49 = vmul.f32 %v851_v29, %v683_v47  ;;  %v845_v22 = vadd.f32 1.0, %v2136_v0  ;;  %v2138_v52 = vpop.eup %2137  ;;  %2145 = vtanh.f32 %v807_v56  ;;  %v806_v58 = vmul.f32 0.7978846, %v2616_v54  ;;  %v266_v54 = vld [vmem:[%s3064_s2 + $0x20] sm:$0xff] }
 0x138   : > { %906 = vmatprep.subr.mxu0 %v873_v1  ;;  %v2140_v11 = vpop.eup %2139  ;;  %v861_v48 = vmul.f32 %v837_v7, %v669_v4  ;;  %v839_v47 = vadd.f32 1.0, %v2138_v52  ;;  %v671_v60 = vmul.f32 0.5, %v2501_v15  ;;  %v679_v43 = vmul.f32 0.5, %v2515_v26  ;;  %v267_v26 = vld [vmem:[%s3064_s2 + $0x28] sm:$0xff] }
 0x139   : > { %989 = vmatprep.subr.mxu1 %v875_v49  ;;  %907 = vmatpush1.msra.mxu0 %v872_v13  ;;  %v869_v10 = vmul.f32 %v845_v22, %v677_v62  ;;  %v847_v61 = vadd.f32 1.0, %v2140_v11  ;;  %2147 = vtanh.f32 %v806_v58  ;;  %v685_v37 = vmul.f32 0.5, %v2555_v28 }
 0x13a   : > { %990 = vmatpush1.msra.mxu1 %v874_v24  ;;  %1982 = vmatmul.mubr.msk.f32.vlgmr.msra.gmra.mrb[12].mxu0 %vm892_vm4, %v2659_v38  ;;  %v863_v2 = vmul.f32 %v839_v47, %v671_v60  ;;  %v687_v9 = vmul.f32 0.5, %v2561_v31  ;;  %v684_v53 = vmul.f32 0.5, %v2542_v6  ;;  %v686_v8 = vmul.f32 0.5, %v2547_v12  ;;  %v2703_v12 = vpop.permute.xlu1 %881 }
 0x13b   : > { %1985 = vmatmul.mubr.msk.f32.vlgmr.msra.gmra.mrb[12].mxu1 %vm892_vm4, %v2659_v38  ;;  %972 = vmatprep.mubr.f32.mxu0 %v2221_v16  ;;  %v2042_v20 = vpack.c.bf16 %v869_v10, %v861_v48  ;;  %v871_v32 = vmul.f32 %v847_v61, %v679_v43  ;;  %v2225_v6 = vmov 26  }
 0x13c   : > { %1055 = vmatprep.mubr.f32.mxu1 %v2221_v16  ;;  %2099 = vset.pattern.permute.xlu1 %v2225_v6 }
 0x13d   : > { %2043 = vmatprep.subr.bf16.mxu0 %v2042_v20  ;;  %v2046_v15 = vpack.c.bf16 %v871_v32, %v863_v2  ;;  %2100 = vset.pattern.permute.xlu0 %v2225_v6 }
 0x13e   : > { %1983 = vmatmul.mubr.msk.f32.gmra.mrb[14].mxu0 %vm892_vm4, %v266_v54  ;;  %1754 = vperm.xlu1 %2099, %v2320_v18   ;;  %v2734_v49 = vpop.permute.xlu1 %889 }
 0x13f   : > { %1986 = vmatmul.mubr.msk.f32.gmra.mrb[14].mxu1 %vm892_vm4, %v266_v54  ;;  %978 = vmatprep.mubr.f32.mxu0 %v2221_v16  ;;  %v2142_v35 = vpop.eup %2141 }
 0x140   : > { %2047 = vmatprep.subr.bf16.mxu1 %v2046_v15  ;;  %1061 = vmatprep.mubr.f32.mxu1 %v2221_v16  ;;  %v2144_v44 = vpop.eup %2143  ;;  %v852_v5 = vadd.f32 1.0, %v2142_v35 }
 0x141   : > { %2045 = vmatpush1.bf16.msra.mxu0 %v2044_v36  ;;  %2049 = vmatpush1.bf16.msra.mxu1 %v2048_v3  ;;  %v2146_v33 = vpop.eup %2145  ;;  %v853_v50 = vadd.f32 1.0, %v2144_v44 }
 0x142   : > { %1984 = vmatmul.mubr.msk.f32.gmra.mrb[16].mxu0 %vm892_vm4, %v267_v26  ;;  %v855_v46 = vadd.f32 1.0, %v2146_v33  ;;  %v876_v17 = vmul.f32 %v852_v5, %v684_v53 }
 0x143   : > { %1987 = vmatmul.mubr.msk.f32.gmra.mrb[16].mxu1 %vm892_vm4, %v267_v26  ;;  %1132 = vmatprep.mubr.f32.mxu0 %v2221_v16  ;;  %v2148_v30 = vpop.eup %2147  ;;  %v877_v14 = vmul.f32 %v853_v50, %v685_v37 }
 0x144   : > { %1215 = vmatprep.mubr.f32.mxu1 %v2221_v16  ;;  %v879_v23 = vmul.f32 %v855_v46, %v687_v9  ;;  %v854_v45 = vadd.f32 1.0, %v2148_v30 }
 0x145   : > { %1072 = vmatprep.subr.mxu0 %v877_v14 }
 0x146   : > { %1155 = vmatprep.subr.mxu1 %v879_v23  ;;  %1073 = vmatpush1.msra.mxu0 %v876_v17  ;;  %v878_v28 = vmul.f32 %v854_v45, %v686_v8 }
 0x147   : > { %1988 = vmatmul.mubr.msk.f32.vlgmr.msra.gmra.mrb[18].mxu0 %vm892_vm4, %v2659_v38 }
 0x148   : > { %1156 = vmatpush1.msra.mxu1 %v878_v28  ;;  %1138 = vmatprep.mubr.f32.mxu0 %v2221_v16 }
 0x149   : > { %1991 = vmatmul.mubr.msk.f32.vlgmr.msra.gmra.mrb[18].mxu1 %vm892_vm4, %v2659_v38 }
 0x14a   : > { %1221 = vmatprep.mubr.f32.mxu1 %v2221_v16 }
 0x14b   : > { %1989 = vmatmul.mubr.msk.f32.gmra.mrb[20].mxu0 %vm892_vm4, %v266_v54 }
 0x14c   : > { %1144 = vmatprep.mubr.f32.mxu0 %v2221_v16 }
 0x14d   : > { %1992 = vmatmul.mubr.msk.f32.gmra.mrb[20].mxu1 %vm892_vm4, %v266_v54 }
 0x14e   : > { %1227 = vmatprep.mubr.f32.mxu1 %v2221_v16 }
 0x14f   : > { %1990 = vmatmul.mubr.msk.f32.gmra.mrb[22].mxu0 %vm892_vm4, %v267_v26 }
 0x150   : > { %1525 = vmatprep.mubr.f32.mxu0 %v2221_v16 }
 0x151   : > { %1993 = vmatmul.mubr.msk.f32.gmra.mrb[22].mxu1 %vm892_vm4, %v267_v26 }
 0x152   : > { %1596 = vmatprep.mubr.f32.mxu1 %v2221_v16 }
 0x20d   : > { %v968_v31 = vpop.f32.mrb[12].mxu0 }
 0x20e   : > { %v969_v40 = vadd.f32 %v968_v31, %v2703_v12  ;;  %v1051_v27 = vpop.f32.mrb[12].mxu1  ;;  %v970_v34 = vpop.f32.mrb[13].mxu0 }
 0x20f   : > { %v2707_v36 = vadd.f32 %v1051_v27, %v2703_v12  ;;  %v2710_v39 = vadd.f32 %v970_v34, %v2703_v12  ;;  %v1053_v55 = vpop.f32.mrb[13].mxu1 }
 0x210   : > { %v1258_v19 = vmul.f32 0.044715, %v969_v40  ;;  %v2715_v63 = vadd.f32 %v1053_v55, %v2703_v12  ;;  %v2741_v47 = vmul.f32 0.5, %v969_v40 }
 0x211   : > { %v1260_v18 = vmul.f32 0.044715, %v2707_v36  ;;  %v974_v41 = vpop.f32.mrb[14].mxu0  ;;  %v1259_v29 = vmul.f32 0.044715, %v2710_v39  ;;  %v2749_v20 = vmul.f32 0.5, %v2710_v39 }
 0x212   : > { %v1282_v57 = vmul.f32 %v1258_v19, %v969_v40  ;;  %v2719_v59 = vadd.f32 %v974_v41, %v2712_v42  ;;  %v1057_v4 = vpop.f32.mrb[14].mxu1  ;;  %v976_v51 = vpop.f32.mrb[15].mxu0  ;;  %v1261_v1 = vmul.f32 0.044715, %v2715_v63  ;;  %v2764_v46 = vmul.f32 0.5, %v2715_v63 }
 0x213   : > { %v1284_v25 = vmul.f32 %v1260_v18, %v2707_v36  ;;  %v2724_v62 = vadd.f32 %v1057_v4, %v2712_v42  ;;  %v2727_v3 = vadd.f32 %v976_v51, %v2712_v42  ;;  %v1059_v21 = vpop.f32.mrb[15].mxu1  ;;  %v1283_v2 = vmul.f32 %v1259_v29, %v2710_v39 }
 0x214   : > { %v1306_v0 = vmul.f32 %v1282_v57, %v969_v40  ;;  %v1266_v7 = vmul.f32 0.044715, %v2719_v59  ;;  %v2732_v56 = vadd.f32 %v1059_v21, %v2712_v42  ;;  %v1285_v32 = vmul.f32 %v1261_v1, %v2715_v63 }
 0x215   : > { %v1308_v13 = vmul.f32 %v1284_v25, %v2707_v36  ;;  %v1268_v38 = vmul.f32 0.044715, %v2724_v62  ;;  %v1267_v22 = vmul.f32 0.044715, %v2727_v3  ;;  %v980_v52 = vpop.f32.mrb[16].mxu0 }
 0x216   : > { %v1330_v24 = vadd.f32 %v1306_v0, %v969_v40  ;;  %v1290_v58 = vmul.f32 %v1266_v7, %v2719_v59  ;;  %v1269_v11 = vmul.f32 0.044715, %v2732_v56  ;;  %v1063_v48 = vpop.f32.mrb[16].mxu1  ;;  %v982_v10 = vpop.f32.mrb[17].mxu0  ;;  %v2746_v61 = vadd.f32 %v980_v52, %v2734_v49 }
 0x217   : > { %v1332_v60 = vadd.f32 %v1308_v13, %v2707_v36  ;;  %v1292_v43 = vmul.f32 %v1268_v38, %v2724_v62  ;;  %v1065_v54 = vpop.f32.mrb[17].mxu1  ;;  %v2755_v26 = vadd.f32 %v1063_v48, %v2734_v49  ;;  %v1291_v5 = vmul.f32 %v1267_v22, %v2727_v3 }
 0x218   : > { %v1314_v15 = vmul.f32 %v1290_v58, %v2719_v59  ;;  %v1354_v35 = vmul.f32 0.7978846, %v1330_v24  ;;  %v1274_v33 = vmul.f32 0.044715, %v2746_v61  ;;  %v1293_v50 = vmul.f32 %v1269_v11, %v2732_v56 }
 0x219   : > { %v1316_v44 = vmul.f32 %v1292_v43, %v2724_v62  ;;  %v1276_v9 = vmul.f32 0.044715, %v2755_v26  ;;  %v1356_v53 = vmul.f32 0.7978846, %v1332_v60  ;;  %v2769_v23 = vadd.f32 %v982_v10, %v2734_v49 }
 0x21a   : > { %v1338_v37 = vadd.f32 %v1314_v15, %v2719_v59  ;;  %v1298_v14 = vmul.f32 %v1274_v33, %v2746_v61  ;;  %v1134_v17 = vpop.f32.mrb[18].mxu0  ;;  %v2773_v28 = vadd.f32 %v1065_v54, %v2734_v49  ;;  %2149 = vtanh.f32 %v1354_v35 }
 0x21b   : > { %v1340_v30 = vadd.f32 %v1316_v44, %v2724_v62  ;;  %v1300_v45 = vmul.f32 %v1276_v9, %v2755_v26  ;;  %v2776_v6 = vadd.f32 %v1134_v17, %v2703_v12  ;;  %v1136_v31 = vpop.f32.mrb[19].mxu0  ;;  %v2779_v40 = vmul.f32 %v1283_v2, %v2710_v39 }
 0x21c   : > { %v1362_v8 = vmul.f32 0.7978846, %v1338_v37  ;;  %v2782_v27 = vmul.f32 %v1285_v32, %v2715_v63  ;;  %v2785_v34 = vmul.f32 %v1291_v5, %v2727_v3  ;;  %v1217_v55 = vpop.f32.mrb[18].mxu1  ;;  %v2788_v18 = vmul.f32 %v1293_v50, %v2732_v56 }
 0x21d   : > { %v1364_v19 = vmul.f32 0.7978846, %v1340_v30  ;;  %v1322_v41 = vmul.f32 %v1298_v14, %v2746_v61  ;;  %v1262_v57 = vmul.f32 0.044715, %v2776_v6  ;;  %v1219_v4 = vpop.f32.mrb[19].mxu1  ;;  %2151 = vtanh.f32 %v1356_v53 }
 0x21e   : > { %v1275_v51 = vmul.f32 0.044715, %v2769_v23  ;;  %v2794_v25 = vadd.f32 %v1217_v55, %v2703_v12  ;;  %v2797_v29 = vadd.f32 %v1136_v31, %v2703_v12  ;;  %v1140_v21 = vpop.f32.mrb[20].mxu0  ;;  %2153 = vtanh.f32 %v1362_v8 }
 0x21f   : > { %v1324_v0 = vmul.f32 %v1300_v45, %v2755_v26  ;;  %v1277_v1 = vmul.f32 0.044715, %v2773_v28  ;;  %v1286_v7 = vmul.f32 %v1262_v57, %v2776_v6  ;;  %v1142_v13 = vpop.f32.mrb[21].mxu0  ;;  %v2804_v22 = vadd.f32 %v1219_v4, %v2703_v12 }
 0x220   : > { %v1264_v38 = vmul.f32 0.044715, %v2794_v25  ;;  %v2807_v52 = vadd.f32 %v1140_v21, %v2712_v42  ;;  %v1223_v24 = vpop.f32.mrb[20].mxu1  ;;  %v2810_v58 = vadd.f32 %v1142_v13, %v2712_v42  ;;  %2155 = vtanh.f32 %v1364_v19 }
 0x221   : > { %v2813_v11 = vadd.f32 %v1322_v41, %v2746_v61  ;;  %v1310_v48 = vmul.f32 %v1286_v7, %v2776_v6  ;;  %v2817_v10 = vadd.f32 %v1223_v24, %v2712_v42  ;;  %v1225_v60 = vpop.f32.mrb[21].mxu1  ;;  %v1263_v43 = vmul.f32 0.044715, %v2797_v29 }
 0x222   : > { %v1288_v12 = vmul.f32 %v1264_v38, %v2794_v25  ;;  %v1265_v54 = vmul.f32 0.044715, %v2804_v22  ;;  %v1270_v2 = vmul.f32 0.044715, %v2807_v52  ;;  %v1271_v35 = vmul.f32 0.044715, %v2810_v58 }
 0x223   : > { %v1334_v32 = vadd.f32 %v1310_v48, %v2776_v6  ;;  %v1272_v15 = vmul.f32 0.044715, %v2817_v10  ;;  %v2827_v44 = vadd.f32 %v1225_v60, %v2712_v42  ;;  %v1146_v5 = vpop.f32.mrb[22].mxu0  ;;  %v2830_v33 = vadd.f32 %v1324_v0, %v2755_v26 }
 0x224   : > { %v2833_v37 = vmul.f32 %v1275_v51, %v2769_v23  ;;  %v1312_v50 = vmul.f32 %v1288_v12, %v2794_v25  ;;  %v1294_v9 = vmul.f32 %v1270_v2, %v2807_v52  ;;  %v1229_v53 = vpop.f32.mrb[22].mxu1  ;;  %v1148_v30 = vpop.f32.mrb[23].mxu0  ;;  %v2838_v14 = vmul.f32 %v1277_v1, %v2773_v28 }
 0x225   : > { %v1296_v17 = vmul.f32 %v1272_v15, %v2817_v10  ;;  %v1273_v42 = vmul.f32 0.044715, %v2827_v44  ;;  %v2843_v8 = vadd.f32 %v1146_v5, %v2734_v49  ;;  %v1231_v45 = vpop.f32.mrb[23].mxu1  ;;  %v2150_v31 = vpop.eup %2149  ;;  %v1287_v19 = vmul.f32 %v1263_v43, %v2797_v29 }
 0x226   : > { %v1336_v55 = vadd.f32 %v1312_v50, %v2794_v25  ;;  %v1289_v41 = vmul.f32 %v1265_v54, %v2804_v22  ;;  %v1318_v57 = vmul.f32 %v1294_v9, %v2807_v52  ;;  %v1358_v4 = vmul.f32 0.7978846, %v1334_v32 }
 0x227   : > { %v1320_v51 = vmul.f32 %v1296_v17, %v2817_v10  ;;  %v1295_v21 = vmul.f32 %v1271_v35, %v2810_v58  ;;  %v1278_v0 = vmul.f32 0.044715, %v2843_v8  ;;  %v2152_v1 = vpop.eup %2151  ;;  %v1297_v38 = vmul.f32 %v1273_v42, %v2827_v44 }
 0x228   : > { %v1360_v7 = vmul.f32 0.7978846, %v1336_v55  ;;  %v1342_v13 = vadd.f32 %v1318_v57, %v2807_v52  ;;  %v2855_v24 = vadd.f32 %v1229_v53, %v2734_v49  ;;  %v2154_v48 = vpop.eup %2153  ;;  %v2860_v43 = vadd.f32 %v1148_v30, %v2734_v49 }
 0x229   : > { %v1344_v60 = vadd.f32 %v1320_v51, %v2817_v10  ;;  %v1302_v12 = vmul.f32 %v1278_v0, %v2843_v8  ;;  %v2863_v54 = vmul.f32 0.5, %v2727_v3  ;;  %v1311_v2 = vmul.f32 %v1287_v19, %v2797_v29 }
 0x22a   : > { %v2867_v32 = vmul.f32 %v1289_v41, %v2804_v22  ;;  %v1366_v15 = vmul.f32 0.7978846, %v1342_v13  ;;  %v2870_v35 = vadd.f32 %v1231_v45, %v2734_v49  ;;  %v2156_v5 = vpop.eup %2155  ;;  %2157 = vtanh.f32 %v1358_v4 }
 0x22b   : > { %v1368_v50 = vmul.f32 0.7978846, %v1344_v60  ;;  %v1280_v9 = vmul.f32 0.044715, %v2855_v24  ;;  %v1331_v53 = vadd.f32 %v2779_v40, %v2710_v39  ;;  %2159 = vtanh.f32 %v1360_v7 }
 0x22c   : > { %v1319_v30 = vmul.f32 %v1295_v21, %v2810_v58  ;;  %v2877_v17 = vmul.f32 %v1297_v38, %v2827_v44  ;;  %v1339_v42 = vadd.f32 %v2785_v34, %v2727_v3  ;;  %2161 = vtanh.f32 %v1366_v15 }
 0x22d   : > { %v1326_v49 = vmul.f32 %v1302_v12, %v2843_v8  ;;  %v1279_v45 = vmul.f32 0.044715, %v2860_v43  ;;  %v1355_v55 = vmul.f32 0.7978846, %v1331_v53  ;;  %2163 = vtanh.f32 %v1368_v50 }
 0x22e   : > { %v1281_v19 = vmul.f32 0.044715, %v2870_v35  ;;  %v1363_v41 = vmul.f32 0.7978846, %v1339_v42  ;;  %v1333_v39 = vadd.f32 %v2782_v27, %v2715_v63  ;;  %v1304_v40 = vmul.f32 %v1280_v9, %v2855_v24 }
 0x22f   : > { %2165 = vtanh.f32 %v1355_v55  ;;  %v1341_v57 = vadd.f32 %v2788_v18, %v2732_v56  ;;  %v1402_v3 = vadd.f32 1.0, %v2150_v31  ;;  %v1242_v4 = vmul.f32 0.5, %v2719_v59 }
 0x230   : > { %2167 = vtanh.f32 %v1363_v41  ;;  %v1357_v34 = vmul.f32 0.7978846, %v1333_v39  ;;  %v1410_v51 = vadd.f32 1.0, %v2154_v48  ;;  %v1236_v7 = vmul.f32 0.5, %v2707_v36 }
 0x231   : > { %v1365_v21 = vmul.f32 0.7978846, %v1341_v57  ;;  %v2891_v0 = vmul.f32 %v1402_v3, %v2741_v47  ;;  %v1244_v63 = vmul.f32 0.5, %v2724_v62  ;;  %v1404_v13 = vadd.f32 1.0, %v2152_v1 }
 0x232   : > { %2169 = vtanh.f32 %v1357_v34  ;;  %v2895_v27 = vmul.f32 %v1410_v51, %v1242_v4  ;;  %v1412_v38 = vadd.f32 1.0, %v2156_v5  ;;  %v1328_v18 = vmul.f32 %v1304_v40, %v2855_v24 }
 0x233   : > { %v2899_v31 = vmul.f32 %v1279_v45, %v2860_v43  ;;  %2171 = vtanh.f32 %v1365_v21  ;;  %v1323_v59 = vmul.f32 %v2833_v37, %v2769_v23  ;;  %v2905_v36 = vmul.f32 %v1404_v13, %v1236_v7 }
 0x234   : > { %v2052_v47 = vpack.c.bf16 %v2895_v27, %v2891_v0  ;;  %v2907_v62 = vmul.f32 %v1412_v38, %v1244_v63  ;;  %v1325_v1 = vmul.f32 %v2838_v14, %v2773_v28  ;;  %v2158_v48 = vpop.eup %2157  ;;  %v2912_v60 = vadd.f32 %v1326_v49, %v2843_v8 }
 0x235   : > { %v1305_v12 = vmul.f32 %v1281_v19, %v2870_v35  ;;  %v1347_v15 = vadd.f32 %v1323_v59, %v2769_v23  ;;  %v1370_v37 = vmul.f32 0.7978846, %v2813_v11  ;;  %v2160_v5 = vpop.eup %2159  ;;  %v1245_v50 = vmul.f32 0.5, %v2732_v56 }
 0x236   : > { %v2056_v9 = vpack.c.bf16 %v2907_v62, %v2905_v36  ;;  %v1349_v53 = vadd.f32 %v1325_v1, %v2773_v28  ;;  %v1372_v14 = vmul.f32 0.7978846, %v2830_v33  ;;  %v2162_v42 = vpop.eup %2161  ;;  %v2923_v49 = vadd.f32 %v1328_v18, %v2855_v24  ;;  %v268_v36 = vld [vmem:[%s3064_s2 + $0x30] sm:$0xff] }
 0x237   : > { %v1371_v45 = vmul.f32 0.7978846, %v1347_v15  ;;  %2173 = vtanh.f32 %v1370_v37  ;;  %v1335_v55 = vadd.f32 %v1311_v2, %v2797_v29  ;;  %v2164_v19 = vpop.eup %2163  ;;  %v2927_v11 = vmul.f32 0.5, %v2769_v23 }
 0x238   : > { %v1373_v56 = vmul.f32 0.7978846, %v1349_v53  ;;  %2175 = vtanh.f32 %v1372_v14  ;;  %v1343_v41 = vadd.f32 %v1319_v30, %v2810_v58  ;;  %v2931_v33 = vmul.f32 0.5, %v2773_v28 }
 0x239   : > { %v2166_v39 = vpop.eup %2165  ;;  %2177 = vtanh.f32 %v1371_v45  ;;  %v1359_v40 = vmul.f32 0.7978846, %v1335_v55  ;;  %v1337_v57 = vadd.f32 %v2867_v32, %v2804_v22  ;;  %v1345_v23 = vadd.f32 %v2877_v17, %v2827_v44 }
 0x23a   : > { %v2168_v3 = vpop.eup %2167  ;;  %v1403_v34 = vadd.f32 1.0, %v2166_v39  ;;  %2179 = vtanh.f32 %v1373_v56  ;;  %v1367_v2 = vmul.f32 0.7978846, %v1343_v41  ;;  %v1250_v51 = vmul.f32 0.5, %v2746_v61 }
 0x23b   : > { %v1411_v4 = vadd.f32 1.0, %v2168_v3  ;;  %2181 = vtanh.f32 %v1359_v40  ;;  %v1361_v30 = vmul.f32 0.7978846, %v1337_v57  ;;  %v1369_v7 = vmul.f32 0.7978846, %v1345_v23 }
 0x23c   : > { %v2170_v21 = vpop.eup %2169  ;;  %v1427_v28 = vmul.f32 %v1403_v34, %v2749_v20  ;;  %2183 = vtanh.f32 %v1367_v2  ;;  %v1238_v63 = vmul.f32 0.5, %v2776_v6  ;;  %v1406_v18 = vadd.f32 1.0, %v2158_v48 }
 0x23d   : > { %v2172_v32 = vpop.eup %2171  ;;  %v1435_v13 = vmul.f32 %v1411_v4, %v2863_v54  ;;  %v1405_v38 = vadd.f32 1.0, %v2170_v21  ;;  %2185 = vtanh.f32 %v1361_v30  ;;  %v1246_v17 = vmul.f32 0.5, %v2807_v52 }
 0x23e   : > { %v1413_v59 = vadd.f32 1.0, %v2172_v32  ;;  %2187 = vtanh.f32 %v1369_v7  ;;  %v1414_v61 = vadd.f32 1.0, %v2162_v42  ;;  %v1252_v20 = vmul.f32 0.5, %v2755_v26 }
 0x23f   : > { %v2050_v1 = vpack.c.bf16 %v1435_v13, %v1427_v28  ;;  %v1429_v15 = vmul.f32 %v1405_v38, %v2764_v46  ;;  %v2944_v37 = vmul.f32 %v1406_v18, %v1238_v63  ;;  %v1408_v14 = vadd.f32 1.0, %v2160_v5 }
 0x240   : > { %v1437_v53 = vmul.f32 %v1413_v59, %v1245_v50  ;;  %v2946_v6 = vmul.f32 %v1414_v61, %v1246_v17  ;;  %v1416_v54 = vadd.f32 1.0, %v2164_v19  ;;  %v1240_v48 = vmul.f32 0.5, %v2794_v25 }
 0x241   : > { %v2174_v45 = vpop.eup %2173  ;;  %2051 = vmatprep.subr.bf16.mxu0 %v2050_v1  ;;  %v1248_v55 = vmul.f32 0.5, %v2817_v10  ;;  %v1327_v52 = vmul.f32 %v2899_v31, %v2860_v43  ;;  %v1329_v46 = vmul.f32 %v1305_v12, %v2870_v35  ;;  %v1239_v5 = vmul.f32 0.5, %v2797_v29 }
 0x242   : > { %v2176_v42 = vpop.eup %2175  ;;  %v2054_v26 = vpack.c.bf16 %v1437_v53, %v1429_v15  ;;  %2053 = vmatpush1.bf16.msra.mxu0 %v2052_v47  ;;  %v1418_v50 = vadd.f32 1.0, %v2174_v45  ;;  %v2060_v19 = vpack.c.bf16 %v2946_v6, %v2944_v37  ;;  %v1432_v56 = vmul.f32 %v1408_v14, %v1240_v48 }
 0x243   : > { %v2178_v25 = vpop.eup %2177  ;;  %v1440_v10 = vmul.f32 %v1416_v54, %v1248_v55  ;;  %v1351_v41 = vadd.f32 %v1327_v52, %v2860_v43  ;;  %v1353_v31 = vadd.f32 %v1329_v46, %v2870_v35  ;;  %v1420_v40 = vadd.f32 1.0, %v2176_v42 }
 0x244   : > { %v2180_v12 = vpop.eup %2179  ;;  %2055 = vmatprep.subr.bf16.mxu1 %v2054_v26  ;;  %v1419_v39 = vadd.f32 1.0, %v2178_v25  ;;  %v1247_v0 = vmul.f32 0.5, %v2810_v58  ;;  %v1374_v27 = vmul.f32 0.7978846, %v2912_v60  ;;  %v1241_v57 = vmul.f32 0.5, %v2804_v22  ;;  %v1450_v25 = vld [vmem:[%s2327_s11] sm:$0xff] }
 0x245   : > { %v2182_v47 = vpop.eup %2181  ;;  %2057 = vmatpush1.bf16.msra.mxu1 %v2056_v9  ;;  %v1421_v29 = vadd.f32 1.0, %v2180_v12  ;;  %v2064_v3 = vpack.c.bf16 %v1440_v10, %v1432_v56  ;;  %v1375_v34 = vmul.f32 0.7978846, %v1351_v41  ;;  %v1377_v30 = vmul.f32 0.7978846, %v1353_v31  ;;  %v1451_v56 = vld [vmem:[%s2327_s11 + $0x8] sm:$0xff]  ;;  %v2998_v31 = vpop.permute.xlu1 %1754 }
 0x246   : > { %v2184_v2 = vpop.eup %2183  ;;  %v1443_v23 = vmul.f32 %v1419_v39, %v2927_v11  ;;  %v1407_v4 = vadd.f32 1.0, %v2182_v47  ;;  %2189 = vtanh.f32 %v1374_v27  ;;  %v1442_v60 = vmul.f32 %v1418_v50, %v1250_v51  ;;  %v1452_v10 = vld [vmem:[%s2327_s11 + $0x10] sm:$0xff]  ;;  %v1453_v12 = vld [vmem:[%s2327_s11 + $0x18] sm:$0xff] }
 0x247   : > { %v2186_v21 = vpop.eup %2185  ;;  %v1445_v58 = vmul.f32 %v1421_v29, %v2931_v33  ;;  %v1415_v62 = vadd.f32 1.0, %v2184_v2  ;;  %2191 = vtanh.f32 %v1375_v34  ;;  %v1444_v22 = vmul.f32 %v1420_v40, %v1252_v20 }
 0x248   : > { %v2188_v9 = vpop.eup %2187  ;;  %1465 = vmatprep.subr.mxu0 %v1443_v23  ;;  %v1409_v28 = vadd.f32 1.0, %v2186_v21  ;;  %2193 = vtanh.f32 %v1377_v30  ;;  %v1376_v11 = vmul.f32 0.7978846, %v2923_v49  ;;  %v1431_v7 = vmul.f32 %v1407_v4, %v1239_v5 }
 0x249   : > { %1536 = vmatprep.subr.mxu1 %v1445_v58  ;;  %1466 = vmatpush1.msra.mxu0 %v1442_v60  ;;  %v1439_v63 = vmul.f32 %v1415_v62, %v1247_v0  ;;  %v1249_v33 = vmul.f32 0.5, %v2827_v44  ;;  %v1417_v51 = vadd.f32 1.0, %v2188_v9  ;;  %v1255_v61 = vmul.f32 0.5, %v2860_v43 }
 0x24a   : > { %1537 = vmatpush1.msra.mxu1 %v1444_v22  ;;  %1994 = vmatmul.mubr.msk.f32.vlgmr.msra.gmra.mrb[24].mxu0 %vm892_vm4, %v268_v36  ;;  %2195 = vtanh.f32 %v1376_v11  ;;  %v1433_v13 = vmul.f32 %v1409_v28, %v1241_v57  ;;  %v1257_v15 = vmul.f32 0.5, %v2870_v35  ;;  %v1254_v37 = vmul.f32 0.5, %v2843_v8 }
 0x24b   : > { %v2058_v32 = vpack.c.bf16 %v1439_v63, %v1431_v7  ;;  %v1441_v38 = vmul.f32 %v1417_v51, %v1249_v33  ;;  %1995 = vmatmul.mubr.msk.f32.vlgmr.msra.gmra.mrb[24].mxu1 %vm892_vm4, %v268_v36  ;;  %1667 = vmatprep.mubr.f32.mxu0 %v2221_v16  ;;  %v1256_v45 = vmul.f32 0.5, %v2855_v24  ;;  %v1774_v43 = vlaneseq }
 0x24c   : > { %1738 = vmatprep.mubr.f32.mxu1 %v2221_v16  ;;  %v1783_v52 = vstv %s1998_s27  ;;  %v2992_v5 = vstv %s1792_s26 }
 0x24d   : > { %2059 = vmatprep.subr.bf16.mxu0 %v2058_v32  ;;  %v2062_v49 = vpack.c.bf16 %v1441_v38, %v1433_v13  ;;  %v2985_v8 = vand.u32 127, %v1774_v43 }
 0x24e   : > { %2061 = vmatpush1.bf16.msra.mxu0 %v2060_v19 }
 0x24f   : > { %2063 = vmatprep.subr.bf16.mxu1 %v2062_v49  ;;  %v1776_v24 = vadd.s32 128, %v2985_v8  ;;  %v1777_v35 = vadd.s32 256, %v2985_v8  ;;  %v1778_v46 = vadd.s32 384, %v2985_v8  ;;  %v1784_v42 = vadd.s32 %v1783_v52, %v2985_v8 }
 0x250   : > { %v2190_v18 = vpop.eup %2189  ;;  %2065 = vmatpush1.bf16.msra.mxu1 %v2064_v3  ;;  %v1780_v22 = vadd.s32 640, %v2985_v8  ;;  %v1781_v7 = vadd.s32 768, %v2985_v8  ;;  %v1782_v13 = vadd.s32 896, %v2985_v8  ;;  %vm1853_vm13 = vcmp.eq.s32.totalorder %v2985_v8, 1 }
 0x251   : > { %v2192_v44 = vpop.eup %2191  ;;  %v1422_v59 = vadd.f32 1.0, %v2190_v18  ;;  %v1785_v26 = vadd.s32 %v1783_v52, %v1776_v24  ;;  %v1786_v50 = vadd.s32 %v1783_v52, %v1777_v35  ;;  %v1787_v19 = vadd.s32 %v1783_v52, %v1778_v46 }
 0x252   : > { %v2194_v17 = vpop.eup %2193  ;;  %v1423_v1 = vadd.f32 1.0, %v2192_v44  ;;  %vm1794_vm5 = vcmp.lt.s32.totalorder %v1784_v42, %v2992_v5  ;;  %v1789_v44 = vadd.s32 %v1783_v52, %v1780_v22  ;;  %vm1852_vm14 = vcmp.eq.s32.totalorder %v2985_v8, 0 }
 0x253   : > { %v1425_v20 = vadd.f32 1.0, %v2194_v17  ;;  %v1446_v54 = vmul.f32 %v1422_v59, %v1254_v37  ;;  %vm1795_vm6 = vcmp.lt.s32.totalorder %v1785_v26, %v2992_v5  ;;  %vm1796_vm7 = vcmp.lt.s32.totalorder %v1786_v50, %v2992_v5 }
 0x254   : > { %v2196_v53 = vpop.eup %2195  ;;  %v1447_v6 = vmul.f32 %v1423_v1, %v1255_v61  ;;  %vm1797_vm8 = vcmp.lt.s32.totalorder %v1787_v19, %v2992_v5  ;;  %v1999_v29 = vsel %vm1794_vm5, 1.0, %v2221_v16  ;;  %v2000_v34 = vsel %vm1795_vm6, 1.0, %v2221_v16  ;;  %v1454_v1 = vld [vmem:[%s2327_s11 + $0x20] sm:$0xff] }
 0x255   : > { %v1449_v14 = vmul.f32 %v1425_v20, %v1257_v15  ;;  %v1424_v48 = vadd.f32 1.0, %v2196_v53  ;;  %v2001_v2 = vsel %vm1796_vm7, 1.0, %v2221_v16  ;;  %v2002_v21 = vsel %vm1797_vm8, 1.0, %v2221_v16  ;;  %v1455_v15 = vld [vmem:[%s2327_s11 + $0x28] sm:$0xff] }
 0x256   : > { %1607 = vmatprep.subr.mxu0 %v1447_v6  ;;  %v1790_v59 = vadd.s32 %v1783_v52, %v1781_v7  ;;  %v1791_v20 = vadd.s32 %v1783_v52, %v1782_v13  ;;  %v1456_v6 = vld [vmem:[%s2327_s11 + $0x30] sm:$0xff]  ;;  %vm1799_vm10 = vcmp.lt.s32.totalorder %v1789_v44, %v2992_v5 }
 0x257   : > { %1678 = vmatprep.subr.mxu1 %v1449_v14  ;;  %1608 = vmatpush1.msra.mxu0 %v1446_v54  ;;  %v1448_v55 = vmul.f32 %v1424_v48, %v1256_v45  ;;  %v1457_v45 = vld [vmem:[%s2327_s11 + $0x38] sm:$0xff] }
 0x258   : > { %1996 = vmatmul.mubr.msk.f32.vlgmr.msra.gmra.mrb[26].mxu0 %vm892_vm4, %v268_v36  ;;  %vm1800_vm11 = vcmp.lt.s32.totalorder %v1790_v59, %v2992_v5  ;;  %vm1801_vm12 = vcmp.lt.s32.totalorder %v1791_v20, %v2992_v5 }
 0x259   : > { %1679 = vmatpush1.msra.mxu1 %v1448_v55  ;;  %v2005_v42 = vsel %vm1800_vm11, 1.0, %v2221_v16 }
 0x25a   : > { %1997 = vmatmul.mubr.msk.f32.vlgmr.msra.gmra.mrb[26].mxu1 %vm892_vm4, %v268_v36  ;;  %v1779_v36 = vadd.s32 512, %v2985_v8 }
 0x25c   : > { %v1788_v32 = vadd.s32 %v1783_v52, %v1779_v36  ;;  %v2004_v52 = vsel %vm1799_vm10, 1.0, %v2221_v16 }
 0x25e   : > { %vm1798_vm9 = vcmp.lt.s32.totalorder %v1788_v32, %v2992_v5 }
 0x25f   : > { %v2003_v48 = vsel %vm1798_vm9, 1.0, %v2221_v16 }
 0x31d   : > { %v1527_v41 = vpop.f32.mrb[24].mxu0 }
 0x31e   : > { %v1745_v39 = vadd.f32 %v1527_v41, %v1450_v25  ;;  %v1529_v40 = vpop.f32.mrb[25].mxu0  ;;  %v1598_v0 = vpop.f32.mrb[24].mxu1  ;;  %v2006_v41 = vsel %vm1801_vm12, 1.0, %v2221_v16 }
 0x31f   : > { %v1746_v27 = vadd.f32 %v1529_v40, %v1451_v56  ;;  %v1747_v47 = vadd.f32 %v1598_v0, %v1452_v10  ;;  %v1600_v57 = vpop.f32.mrb[25].mxu1 }
 0x320   : > { %v1757_v3 = vadd.f32 %v2998_v31, %v1745_v39  ;;  %v1748_v23 = vadd.f32 %v1600_v57, %v1453_v12 }
 0x321   : > { %v1758_v4 = vadd.f32 %v2998_v31, %v1746_v27  ;;  %v1759_v30 = vadd.f32 %v2998_v31, %v1747_v47 }
 0x322   : > { %1765 = vst [vmem:[%s3007_s5] sm:$0xff] %v1757_v3  ;;  %v1818_v58 = vmul.f32 %v1999_v29, %v1757_v3  ;;  %v1760_v60 = vadd.f32 %v2998_v31, %v1748_v23 }
 0x323   : > { %1766 = vst [vmem:[%s3007_s5 + $0x8] sm:$0xff] %v1758_v4  ;;  %1767 = vst [vmem:[%s3007_s5 + $0x10] sm:$0xff] %v1759_v30  ;;  %v1819_v62 = vmul.f32 %v2000_v34, %v1758_v4  ;;  %v1820_v9 = vmul.f32 %v2001_v2, %v1759_v30 }
 0x324   : > { %v1835_v28 = vmul.f32 %v1818_v58, %v1818_v58  ;;  %1768 = vst [vmem:[%s3007_s5 + $0x18] sm:$0xff] %v1760_v60  ;;  %v1821_v11 = vmul.f32 %v2002_v21, %v1760_v60 }
 0x325   : > { %v1826_v63 = vadd.f32 %v1819_v62, %v1818_v58  ;;  %v1836_v33 = vmul.f32 %v1819_v62, %v1819_v62  ;;  %v1837_v51 = vmul.f32 %v1820_v9, %v1820_v9 }
 0x326   : > { %v1838_v18 = vmul.f32 %v1821_v11, %v1821_v11 }
 0x327   : > { %v1827_v38 = vadd.f32 %v1826_v63, %v1820_v9  ;;  %v1843_v49 = vadd.f32 %v1836_v33, %v1835_v28 }
 0x329   : > { %v1844_v17 = vadd.f32 %v1843_v49, %v1837_v51  ;;  %v1828_v61 = vadd.f32 %v1827_v38, %v1821_v11 }
 0x32b   : > { %v1845_v37 = vadd.f32 %v1844_v17, %v1838_v18  ;;  %v1669_v53 = vpop.f32.mrb[26].mxu0 }
 0x32c   : > { %v1749_v14 = vadd.f32 %v1669_v53, %v1454_v1  ;;  %v1671_v54 = vpop.f32.mrb[27].mxu0 }
 0x32d   : > { %v1740_v55 = vpop.f32.mrb[26].mxu1  ;;  %v1750_v43 = vadd.f32 %v1671_v54, %v1455_v15 }
 0x32e   : > { %v1761_v24 = vadd.f32 %v2998_v31, %v1749_v14  ;;  %v1751_v35 = vadd.f32 %v1740_v55, %v1456_v6  ;;  %v1742_v46 = vpop.f32.mrb[27].mxu1 }
 0x32f   : > { %v1762_v26 = vadd.f32 %v2998_v31, %v1750_v43  ;;  %v1752_v50 = vadd.f32 %v1742_v46, %v1457_v45 }
 0x330   : > { %1769 = vst [vmem:[%s3007_s5 + $0x20] sm:$0xff] %v1761_v24  ;;  %v1822_v19 = vmul.f32 %v2003_v48, %v1761_v24  ;;  %v1763_v25 = vadd.f32 %v2998_v31, %v1751_v35 }
 0x331   : > { %1770 = vst [vmem:[%s3007_s5 + $0x28] sm:$0xff] %v1762_v26  ;;  %v1823_v56 = vmul.f32 %v2004_v52, %v1762_v26  ;;  %v1764_v10 = vadd.f32 %v2998_v31, %v1752_v50 }
 0x332   : > { %v1829_v12 = vadd.f32 %v1828_v61, %v1822_v19  ;;  %v1839_v39 = vmul.f32 %v1822_v19, %v1822_v19  ;;  %1771 = vst [vmem:[%s3007_s5 + $0x30] sm:$0xff] %v1763_v25  ;;  %v1824_v5 = vmul.f32 %v2005_v42, %v1763_v25 }
 0x333   : > { %v1840_v40 = vmul.f32 %v1823_v56, %v1823_v56  ;;  %1772 = vst [vmem:[%s3007_s5 + $0x38] sm:$0xff] %v1764_v10  ;;  %v1825_v0 = vmul.f32 %v2006_v41, %v1764_v10 }
 0x334   : > { %v1830_v27 = vadd.f32 %v1829_v12, %v1823_v56  ;;  %v1846_v47 = vadd.f32 %v1845_v37, %v1839_v39  ;;  %v1841_v57 = vmul.f32 %v1824_v5, %v1824_v5 }
 0x335   : > { %v1842_v2 = vmul.f32 %v1825_v0, %v1825_v0 }
 0x336   : > { %v1831_v29 = vadd.f32 %v1830_v27, %v1824_v5  ;;  %v1847_v3 = vadd.f32 %v1846_v47, %v1840_v40 }
 0x338   : > { %v1832_v34 = vadd.f32 %v1831_v29, %v1825_v0  ;;  %v1848_v23 = vadd.f32 %v1847_v3, %v1841_v57 }
 0x33a   : > { %1833 = vadd.xlane.f32.xlu1 %v1832_v34  ;;  %v1849_v31 = vadd.f32 %v1848_v23, %v1842_v2 }
 0x33c   : > { %1850 = vadd.xlane.f32.xlu0 %v1849_v31 }
 0x3c7   : > { %v1834_v4 = vpop.xlane.xlu1 %1833 }
 0x3c9   : > { %v1851_v16 = vpop.xlane.xlu0 %1850 }
 0x3ca   : > { %v1854_v30 = vsel %vm1853_vm13, %v1851_v16, 0.0 }
 0x3cb   : > { %v1855_v21 = vsel %vm1852_vm14, %v1834_v4, %v1854_v30 }
 0x3cc   : > { %1856 = vst [vmem:[%s261_s9] sm:$0xff] %v1855_v21 }
 0x3cd PF: > { %p13_p10 = scmp.ge.s32.totalorder %s2273_s20, 4   ;;  %s3069_s17 = smov %s2215_s18 }
 0x3ce   : > { %s3070_s18 = smov %s2282_s23  ;;  %s3071_s19 = smov %s2273_s20 }
 0x3cf   :  { %15 = sbr.rel (!%p13_p10) target bundleno = 4 (0x4), region = 102 }

// kernel: forward.3
= control target key start
LH: loop header
LB: loop body
LE: loop exit
PB: predicated region body
PF: predicated region fallthrough
CT: control target
= control target key end

     0   :  { %10 = vsyncpa [#allocation5], 0  ;;  %s4949_s18 = smov 0   ;;  %s4951_s19 = smov 0   ;;  %s7314_s0 = inlined_call_operand.vmem [shape: f32[64,2048], index: 0, kind: input, shape index: {}]   ;;  %s7315_s1 = inlined_call_operand.vmem [shape: f32[24,2048], index: 1, kind: input, shape index: {}]   ;;  %s7316_s2 = inlined_call_operand.vmem [shape: f32[8,2048], index: 2, kind: input, shape index: {}]   ;;  %s7317_s3 = inlined_call_operand.vmem [shape: f32[12], index: 3, kind: input, shape index: {}]   ;;  %s7318_s4 = inlined_call_operand.vmem [shape: f32[80,8], index: 4, kind: input, shape index: {}]   ;;  %s7319_s5 = inlined_call_operand.vmem [shape: f32[16,2048], index: 5, kind: output, shape index: {}]  }
   0x1   :  { %s4953_s20 = smov 0  }
   0x2 LB: > { %s4965_s21 = sadd.s32 4294967295, %s4915_s20   ;;  %s4968_s22 = sadd.s32 1, %s4915_s20   ;;  %s4915_s20 = sphi %s4953_s20, %s7659_s20   ;;  %s4911_s19 = sphi %s4951_s19, %s7658_s19   ;;  %s4907_s18 = sphi %s4949_s18, %s7657_s18  }
   0x3   : > { %s20_s23 = ssub.s32 %s4915_s20, %s4968_s22  ;;  %s23_s24 = sadd.s32 1, %s4911_s19 }
   0x4   : > { %p21_p0 = scmp.eq.s32.totalorder %s20_s23, 0  ;;  %p30_p1 = scmp.ne.s32.totalorder %s4911_s19, %s4907_s18 }
   0x5   : > { %p31_p2 = scmp.eq.s32.totalorder %s4915_s20, 0  ;;  %p154_p3 = scmp.eq.s32.totalorder %s4965_s21, 1 }
   0x6   : > { %s4978_s25 = scalar_select %p21_p0, %s4911_s19, %s23_s24  }
   0x7   : > { %p4980_p4 = por %p31_p2, %p30_p1  ;;  %p4984_p5 = por %p154_p3, %p30_p1 }
   0x8   : > { %p4540_p6 = scmp.ge.s32.totalorder %s4915_s20, 1  ;;  %p167_p7 = scmp.lt.s32.totalorder %s4915_s20, 3 }
   0x9   : > { %s7431_s27 = scalar_select %p4984_p5, 1, 0 }
   0xa   : > { %p4687_p8 = scmp.eq.s32.totalorder %s4965_s21, 0  ;;  %p4991_p9 = pnand %p4540_p6, %p167_p7 }
   0xb   : > { %s180_s6 = sshll.u32 %s7317_s3, 4  ;;  %s181_s6 = int_to_ptr.vmem [resolvable:$true] %s180_s6 }
   0xc   : > { %p4683_p10 = pneg %p4991_p9  ;;  %s4874_s7 = scalar_lea.vmem %s181_s6, 16 }
   0xd   : > { %p4875_p12 = scmp.ne.s32.totalorder %s181_s6, %s4874_s7  ;;  %p4882_p2 = scmp.lt.s32.totalorder %s181_s6, %s181_s6 }
   0xe   : > { %p4684_p11 = pnand %p4687_p8, %p4683_p10  ;;  %p4883_p3 = scmp.lt.s32.totalorder %s4874_s7, %s4874_s7 }
  0x10   : > { %p4876_p13 = pneg %p4684_p11  ;;  %p4884_p6 = por %p4883_p3, %p4882_p2 }
  0x12   : > { %p4877_p0 = pnand %p4876_p13, %p4875_p12 }
  0x14   : > { %p4878_p1 = pneg %p4877_p0 }
  0x16   : > { %p4885_p7 = pnand %p4884_p6, %p4878_p1 }
  0x18   : > { %4888 = shalt.err (!%p4885_p7)
}
  0x19   : > { %s4917_s8 = smov [#allocation4]   ;;  %p4542_p5 = scmp.ge.s32.totalorder %s4915_s20, 2 }
  0x1a   : > { %4686 = dma.vmem_to_smem (!%p4684_p11), %s181_s6, 16, %s4917_s8, [#allocation5]  }
  0x1b   : > { %190 = sbr.rel (%p4542_p5) target bundleno = 87 (0x57), region = 24 }
  0x22   : > { %193 = sbr.rel (!%p4980_p4) target bundleno = 70 (0x46), region = 28  ;;  %s195_s9 = sand.u32 (%p4980_p4), 1, %s4911_s19  }
  0x23   : > { %s4610_s10 = sshll.u32 (%p4980_p4), %s4915_s20, 6  ;;  %s4543_s11 = sshll.u32 (%p4980_p4), %s195_s9, 9 }
  0x24   : > { %s5010_s14 = scalar_lea.vmem (%p4980_p4), %s7314_s0, %s4610_s10  ;;  %s5015_s15 = scalar_lea.vmem (%p4980_p4), [#allocation2], %s4543_s11 }
  0x25   : > { %v213_v0 = vld [vmem:[%s5010_s14] sm:$0xff] (%p4980_p4)  ;;  %v215_v1 = vld [vmem:[%s5010_s14 + $0x8] sm:$0xff] (%p4980_p4)  ;;  %v217_v2 = vld [vmem:[%s5010_s14 + $0x10] sm:$0xff] (%p4980_p4) }
  0x26   : > { %214 = vst [vmem:[%s5015_s15] sm:$0xff] (%p4980_p4), %v213_v0  ;;  %216 = vst [vmem:[%s5015_s15 + $0x8] sm:$0xff] (%p4980_p4), %v215_v1  ;;  %v219_v3 = vld [vmem:[%s5010_s14 + $0x18] sm:$0xff] (%p4980_p4)  ;;  %v221_v4 = vld [vmem:[%s5010_s14 + $0x20] sm:$0xff] (%p4980_p4) }
  0x27   : > { %218 = vst [vmem:[%s5015_s15 + $0x10] sm:$0xff] (%p4980_p4), %v217_v2  ;;  %v223_v5 = vld [vmem:[%s5010_s14 + $0x28] sm:$0xff] (%p4980_p4)  ;;  %220 = vst [vmem:[%s5015_s15 + $0x18] sm:$0xff] (%p4980_p4), %v219_v3  ;;  %v225_v6 = vld [vmem:[%s5010_s14 + $0x30] sm:$0xff] (%p4980_p4) }
  0x28   : > { %222 = vst [vmem:[%s5015_s15 + $0x20] sm:$0xff] (%p4980_p4), %v221_v4  ;;  %224 = vst [vmem:[%s5015_s15 + $0x28] sm:$0xff] (%p4980_p4), %v223_v5  ;;  %v227_v7 = vld [vmem:[%s5010_s14 + $0x38] sm:$0xff] (%p4980_p4)  ;;  %v229_v8 = vld [vmem:[%s5010_s14 + $0x80] sm:$0xff] (%p4980_p4) }
  0x29   : > { %226 = vst [vmem:[%s5015_s15 + $0x30] sm:$0xff] %v225_v6  ;;  %228 = vst [vmem:[%s5015_s15 + $0x38] sm:$0xff] %v227_v7  ;;  %v231_v9 = vld [vmem:[%s5010_s14 + $0x88] sm:$0xff]  ;;  %v233_v10 = vld [vmem:[%s5010_s14 + $0x90] sm:$0xff] }
  0x2a   : > { %230 = vst [vmem:[%s5015_s15 + $0x40] sm:$0xff] %v229_v8  ;;  %v235_v11 = vld [vmem:[%s5010_s14 + $0x98] sm:$0xff]  ;;  %232 = vst [vmem:[%s5015_s15 + $0x48] sm:$0xff] %v231_v9  ;;  %v237_v12 = vld [vmem:[%s5010_s14 + $0xa0] sm:$0xff] }
  0x2b   : > { %234 = vst [vmem:[%s5015_s15 + $0x50] sm:$0xff] %v233_v10  ;;  %236 = vst [vmem:[%s5015_s15 + $0x58] sm:$0xff] %v235_v11  ;;  %v239_v13 = vld [vmem:[%s5010_s14 + $0xa8] sm:$0xff]  ;;  %v241_v14 = vld [vmem:[%s5010_s14 + $0xb0] sm:$0xff] }
  0x2c   : > { %238 = vst [vmem:[%s5015_s15 + $0x60] sm:$0xff] %v237_v12  ;;  %240 = vst [vmem:[%s5015_s15 + $0x68] sm:$0xff] %v239_v13  ;;  %v243_v15 = vld [vmem:[%s5010_s14 + $0xb8] sm:$0xff]  ;;  %v245_v16 = vld [vmem:[%s5010_s14 + $0x100] sm:$0xff] }
  0x2d   : > { %242 = vst [vmem:[%s5015_s15 + $0x70] sm:$0xff] %v241_v14  ;;  %v247_v17 = vld [vmem:[%s5010_s14 + $0x108] sm:$0xff]  ;;  %244 = vst [vmem:[%s5015_s15 + $0x78] sm:$0xff] %v243_v15  ;;  %v249_v18 = vld [vmem:[%s5010_s14 + $0x110] sm:$0xff] }
  0x2e   : > { %246 = vst [vmem:[%s5015_s15 + $0x80] sm:$0xff] %v245_v16  ;;  %248 = vst [vmem:[%s5015_s15 + $0x88] sm:$0xff] %v247_v17  ;;  %v251_v19 = vld [vmem:[%s5010_s14 + $0x118] sm:$0xff]  ;;  %v253_v20 = vld [vmem:[%s5010_s14 + $0x120] sm:$0xff] }
  0x2f   : > { %250 = vst [vmem:[%s5015_s15 + $0x90] sm:$0xff] %v249_v18  ;;  %252 = vst [vmem:[%s5015_s15 + $0x98] sm:$0xff] %v251_v19  ;;  %v255_v21 = vld [vmem:[%s5010_s14 + $0x128] sm:$0xff]  ;;  %v257_v22 = vld [vmem:[%s5010_s14 + $0x130] sm:$0xff] }
  0x30   : > { %254 = vst [vmem:[%s5015_s15 + $0xa0] sm:$0xff] %v253_v20  ;;  %v259_v23 = vld [vmem:[%s5010_s14 + $0x138] sm:$0xff]  ;;  %256 = vst [vmem:[%s5015_s15 + $0xa8] sm:$0xff] %v255_v21  ;;  %v261_v24 = vld [vmem:[%s5010_s14 + $0x180] sm:$0xff] }
  0x31   : > { %258 = vst [vmem:[%s5015_s15 + $0xb0] sm:$0xff] %v257_v22  ;;  %260 = vst [vmem:[%s5015_s15 + $0xb8] sm:$0xff] %v259_v23  ;;  %v263_v25 = vld [vmem:[%s5010_s14 + $0x188] sm:$0xff]  ;;  %v265_v26 = vld [vmem:[%s5010_s14 + $0x190] sm:$0xff] }
  0x32   : > { %262 = vst [vmem:[%s5015_s15 + $0xc0] sm:$0xff] %v261_v24  ;;  %264 = vst [vmem:[%s5015_s15 + $0xc8] sm:$0xff] %v263_v25  ;;  %v267_v27 = vld [vmem:[%s5010_s14 + $0x198] sm:$0xff]  ;;  %v269_v28 = vld [vmem:[%s5010_s14 + $0x1a0] sm:$0xff] }
  0x33   : > { %266 = vst [vmem:[%s5015_s15 + $0xd0] sm:$0xff] %v265_v26  ;;  %v271_v29 = vld [vmem:[%s5010_s14 + $0x1a8] sm:$0xff]  ;;  %268 = vst [vmem:[%s5015_s15 + $0xd8] sm:$0xff] %v267_v27  ;;  %v273_v30 = vld [vmem:[%s5010_s14 + $0x1b0] sm:$0xff] }
  0x34   : > { %270 = vst [vmem:[%s5015_s15 + $0xe0] sm:$0xff] %v269_v28  ;;  %272 = vst [vmem:[%s5015_s15 + $0xe8] sm:$0xff] %v271_v29  ;;  %v275_v31 = vld [vmem:[%s5010_s14 + $0x1b8] sm:$0xff]  ;;  %v277_v32 = vld [vmem:[%s5010_s14 + $0x200] sm:$0xff] }
  0x35   : > { %274 = vst [vmem:[%s5015_s15 + $0xf0] sm:$0xff] %v273_v30  ;;  %276 = vst [vmem:[%s5015_s15 + $0xf8] sm:$0xff] %v275_v31  ;;  %v279_v33 = vld [vmem:[%s5010_s14 + $0x208] sm:$0xff]  ;;  %v281_v34 = vld [vmem:[%s5010_s14 + $0x210] sm:$0xff] }
  0x36   : > { %278 = vst [vmem:[%s5015_s15 + $0x100] sm:$0xff] %v277_v32  ;;  %v283_v35 = vld [vmem:[%s5010_s14 + $0x218] sm:$0xff]  ;;  %280 = vst [vmem:[%s5015_s15 + $0x108] sm:$0xff] %v279_v33  ;;  %v285_v36 = vld [vmem:[%s5010_s14 + $0x220] sm:$0xff] }
  0x37   : > { %282 = vst [vmem:[%s5015_s15 + $0x110] sm:$0xff] %v281_v34  ;;  %284 = vst [vmem:[%s5015_s15 + $0x118] sm:$0xff] %v283_v35  ;;  %v287_v37 = vld [vmem:[%s5010_s14 + $0x228] sm:$0xff]  ;;  %v289_v38 = vld [vmem:[%s5010_s14 + $0x230] sm:$0xff] }
  0x38   : > { %286 = vst [vmem:[%s5015_s15 + $0x120] sm:$0xff] %v285_v36  ;;  %288 = vst [vmem:[%s5015_s15 + $0x128] sm:$0xff] %v287_v37  ;;  %v291_v39 = vld [vmem:[%s5010_s14 + $0x238] sm:$0xff]  ;;  %v293_v40 = vld [vmem:[%s5010_s14 + $0x280] sm:$0xff] }
  0x39   : > { %290 = vst [vmem:[%s5015_s15 + $0x130] sm:$0xff] %v289_v38  ;;  %v295_v41 = vld [vmem:[%s5010_s14 + $0x288] sm:$0xff]  ;;  %292 = vst [vmem:[%s5015_s15 + $0x138] sm:$0xff] %v291_v39  ;;  %v297_v42 = vld [vmem:[%s5010_s14 + $0x290] sm:$0xff] }
  0x3a   : > { %294 = vst [vmem:[%s5015_s15 + $0x140] sm:$0xff] %v293_v40  ;;  %296 = vst [vmem:[%s5015_s15 + $0x148] sm:$0xff] %v295_v41  ;;  %v299_v43 = vld [vmem:[%s5010_s14 + $0x298] sm:$0xff]  ;;  %v301_v44 = vld [vmem:[%s5010_s14 + $0x2a0] sm:$0xff] }
  0x3b   : > { %298 = vst [vmem:[%s5015_s15 + $0x150] sm:$0xff] %v297_v42  ;;  %300 = vst [vmem:[%s5015_s15 + $0x158] sm:$0xff] %v299_v43  ;;  %v303_v45 = vld [vmem:[%s5010_s14 + $0x2a8] sm:$0xff]  ;;  %v305_v46 = vld [vmem:[%s5010_s14 + $0x2b0] sm:$0xff] }
  0x3c   : > { %302 = vst [vmem:[%s5015_s15 + $0x160] sm:$0xff] %v301_v44  ;;  %v307_v47 = vld [vmem:[%s5010_s14 + $0x2b8] sm:$0xff]  ;;  %304 = vst [vmem:[%s5015_s15 + $0x168] sm:$0xff] %v303_v45  ;;  %v309_v48 = vld [vmem:[%s5010_s14 + $0x300] sm:$0xff] }
  0x3d   : > { %306 = vst [vmem:[%s5015_s15 + $0x170] sm:$0xff] %v305_v46  ;;  %308 = vst [vmem:[%s5015_s15 + $0x178] sm:$0xff] %v307_v47  ;;  %v311_v49 = vld [vmem:[%s5010_s14 + $0x308] sm:$0xff]  ;;  %v313_v50 = vld [vmem:[%s5010_s14 + $0x310] sm:$0xff] }
  0x3e   : > { %310 = vst [vmem:[%s5015_s15 + $0x180] sm:$0xff] %v309_v48  ;;  %312 = vst [vmem:[%s5015_s15 + $0x188] sm:$0xff] %v311_v49  ;;  %v315_v51 = vld [vmem:[%s5010_s14 + $0x318] sm:$0xff]  ;;  %v317_v52 = vld [vmem:[%s5010_s14 + $0x320] sm:$0xff] }
  0x3f   : > { %314 = vst [vmem:[%s5015_s15 + $0x190] sm:$0xff] %v313_v50  ;;  %v319_v53 = vld [vmem:[%s5010_s14 + $0x328] sm:$0xff]  ;;  %316 = vst [vmem:[%s5015_s15 + $0x198] sm:$0xff] %v315_v51  ;;  %v321_v54 = vld [vmem:[%s5010_s14 + $0x330] sm:$0xff] }
  0x40   : > { %318 = vst [vmem:[%s5015_s15 + $0x1a0] sm:$0xff] %v317_v52  ;;  %320 = vst [vmem:[%s5015_s15 + $0x1a8] sm:$0xff] %v319_v53  ;;  %v323_v55 = vld [vmem:[%s5010_s14 + $0x338] sm:$0xff]  ;;  %v325_v56 = vld [vmem:[%s5010_s14 + $0x380] sm:$0xff] }
  0x41   : > { %322 = vst [vmem:[%s5015_s15 + $0x1b0] sm:$0xff] %v321_v54  ;;  %324 = vst [vmem:[%s5015_s15 + $0x1b8] sm:$0xff] %v323_v55  ;;  %v327_v57 = vld [vmem:[%s5010_s14 + $0x388] sm:$0xff]  ;;  %v329_v58 = vld [vmem:[%s5010_s14 + $0x390] sm:$0xff] }
  0x42   : > { %326 = vst [vmem:[%s5015_s15 + $0x1c0] sm:$0xff] %v325_v56  ;;  %v331_v59 = vld [vmem:[%s5010_s14 + $0x398] sm:$0xff]  ;;  %328 = vst [vmem:[%s5015_s15 + $0x1c8] sm:$0xff] %v327_v57  ;;  %v333_v60 = vld [vmem:[%s5010_s14 + $0x3a0] sm:$0xff] }
  0x43   : > { %330 = vst [vmem:[%s5015_s15 + $0x1d0] sm:$0xff] %v329_v58  ;;  %332 = vst [vmem:[%s5015_s15 + $0x1d8] sm:$0xff] %v331_v59  ;;  %v335_v61 = vld [vmem:[%s5010_s14 + $0x3a8] sm:$0xff]  ;;  %v337_v62 = vld [vmem:[%s5010_s14 + $0x3b0] sm:$0xff] }
  0x44   : > { %334 = vst [vmem:[%s5015_s15 + $0x1e0] sm:$0xff] %v333_v60  ;;  %336 = vst [vmem:[%s5015_s15 + $0x1e8] sm:$0xff] %v335_v61  ;;  %v339_v63 = vld [vmem:[%s5010_s14 + $0x3b8] sm:$0xff] }
  0x45   : > { %338 = vst [vmem:[%s5015_s15 + $0x1f0] sm:$0xff] %v337_v62  ;;  %340 = vst [vmem:[%s5015_s15 + $0x1f8] sm:$0xff] %v339_v63 }
  0x46 PF: > { %346 = sbr.rel (!%p4980_p4) target bundleno = 87 (0x57), region = 51  ;;  %s348_s16 = sand.u32 (%p4980_p4), 1, %s4911_s19  }
  0x47   : > { %s4611_s17 = sshll.u32 (%p4980_p4), %s4915_s20, 6  ;;  %s4677_s23 = smul.u32 (%p4980_p4), 192, %s348_s16 }
  0x48   : > { %s5149_s30 = scalar_lea.vmem (%p4980_p4), %s7315_s1, %s4611_s17 }
  0x49   : > { %v366_v0 = vld [vmem:[%s5149_s30] sm:$0xff] (%p4980_p4)  ;;  %v368_v1 = vld [vmem:[%s5149_s30 + $0x8] sm:$0xff] (%p4980_p4)  ;;  %v370_v2 = vld [vmem:[%s5149_s30 + $0x10] sm:$0xff] (%p4980_p4)  ;;  %s5157_s20 = scalar_lea.vmem (%p4980_p4), [#allocation3], %s4677_s23 }
  0x4a   : > { %v372_v3 = vld [vmem:[%s5149_s30 + $0x18] sm:$0xff] (%p4980_p4)  ;;  %v374_v4 = vld [vmem:[%s5149_s30 + $0x20] sm:$0xff] (%p4980_p4)  ;;  %v376_v5 = vld [vmem:[%s5149_s30 + $0x28] sm:$0xff] (%p4980_p4)  ;;  %367 = vst [vmem:[%s5157_s20] sm:$0xff] (%p4980_p4), %v366_v0 }
  0x4b   : > { %369 = vst [vmem:[%s5157_s20 + $0x8] sm:$0xff] (%p4980_p4), %v368_v1  ;;  %371 = vst [vmem:[%s5157_s20 + $0x10] sm:$0xff] (%p4980_p4), %v370_v2  ;;  %v378_v6 = vld [vmem:[%s5149_s30 + $0x30] sm:$0xff] (%p4980_p4)  ;;  %v380_v7 = vld [vmem:[%s5149_s30 + $0x38] sm:$0xff] (%p4980_p4) }
  0x4c   : > { %373 = vst [vmem:[%s5157_s20 + $0x18] sm:$0xff] (%p4980_p4), %v372_v3  ;;  %375 = vst [vmem:[%s5157_s20 + $0x20] sm:$0xff] (%p4980_p4), %v374_v4  ;;  %v382_v8 = vld [vmem:[%s5149_s30 + $0x80] sm:$0xff] (%p4980_p4)  ;;  %v384_v9 = vld [vmem:[%s5149_s30 + $0x88] sm:$0xff] (%p4980_p4) }
  0x4d   : > { %377 = vst [vmem:[%s5157_s20 + $0x28] sm:$0xff] %v376_v5  ;;  %379 = vst [vmem:[%s5157_s20 + $0x30] sm:$0xff] %v378_v6  ;;  %v386_v10 = vld [vmem:[%s5149_s30 + $0x90] sm:$0xff]  ;;  %v388_v11 = vld [vmem:[%s5149_s30 + $0x98] sm:$0xff] }
  0x4e   : > { %381 = vst [vmem:[%s5157_s20 + $0x38] sm:$0xff] %v380_v7  ;;  %383 = vst [vmem:[%s5157_s20 + $0x40] sm:$0xff] %v382_v8  ;;  %v390_v12 = vld [vmem:[%s5149_s30 + $0xa0] sm:$0xff]  ;;  %v392_v13 = vld [vmem:[%s5149_s30 + $0xa8] sm:$0xff] }
  0x4f   : > { %385 = vst [vmem:[%s5157_s20 + $0x48] sm:$0xff] %v384_v9  ;;  %387 = vst [vmem:[%s5157_s20 + $0x50] sm:$0xff] %v386_v10  ;;  %v394_v14 = vld [vmem:[%s5149_s30 + $0xb0] sm:$0xff]  ;;  %v396_v15 = vld [vmem:[%s5149_s30 + $0xb8] sm:$0xff] }
  0x50   : > { %389 = vst [vmem:[%s5157_s20 + $0x58] sm:$0xff] %v388_v11  ;;  %391 = vst [vmem:[%s5157_s20 + $0x60] sm:$0xff] %v390_v12  ;;  %v398_v16 = vld [vmem:[%s5149_s30 + $0x100] sm:$0xff]  ;;  %v400_v17 = vld [vmem:[%s5149_s30 + $0x108] sm:$0xff] }
  0x51   : > { %393 = vst [vmem:[%s5157_s20 + $0x68] sm:$0xff] %v392_v13  ;;  %395 = vst [vmem:[%s5157_s20 + $0x70] sm:$0xff] %v394_v14  ;;  %v402_v18 = vld [vmem:[%s5149_s30 + $0x110] sm:$0xff]  ;;  %v404_v19 = vld [vmem:[%s5149_s30 + $0x118] sm:$0xff] }
  0x52   : > { %397 = vst [vmem:[%s5157_s20 + $0x78] sm:$0xff] %v396_v15  ;;  %399 = vst [vmem:[%s5157_s20 + $0x80] sm:$0xff] %v398_v16  ;;  %v406_v20 = vld [vmem:[%s5149_s30 + $0x120] sm:$0xff]  ;;  %v408_v21 = vld [vmem:[%s5149_s30 + $0x128] sm:$0xff] }
  0x53   : > { %401 = vst [vmem:[%s5157_s20 + $0x88] sm:$0xff] %v400_v17  ;;  %403 = vst [vmem:[%s5157_s20 + $0x90] sm:$0xff] %v402_v18  ;;  %v410_v22 = vld [vmem:[%s5149_s30 + $0x130] sm:$0xff]  ;;  %v412_v23 = vld [vmem:[%s5149_s30 + $0x138] sm:$0xff] }
  0x54   : > { %405 = vst [vmem:[%s5157_s20 + $0x98] sm:$0xff] %v404_v19  ;;  %407 = vst [vmem:[%s5157_s20 + $0xa0] sm:$0xff] %v406_v20 }
  0x55   : > { %409 = vst [vmem:[%s5157_s20 + $0xa8] sm:$0xff] %v408_v21  ;;  %411 = vst [vmem:[%s5157_s20 + $0xb0] sm:$0xff] %v410_v22 }
  0x56   : > { %413 = vst [vmem:[%s5157_s20 + $0xb8] sm:$0xff] %v412_v23 }
  0x57 PF: > { %431 = sbr.rel (%p4991_p9) target bundleno = 687 (0x2af), region = 78 }
  0x5e   : > { %s5204_s26 = sand.u32 1, %s4907_s18  }
  0x5f   : > { %s4549_s6 = sshll.u32 %s5204_s26, 9  ;;  %s4678_s7 = smul.u32 192, %s5204_s26 }
  0x60   : > { %s5208_s8 = scalar_lea.vmem [#allocation2], %s4549_s6 }
  0x61   : > { %s5210_s9 = scalar_lea.vmem [#allocation3], %s4678_s7 }
  0x62   : > { %4902 = dma.done.wait (%p4687_p8), [#allocation5], 16  }
  0x63   : > { %4904 = vsyncadd (%p4687_p8), [#allocation5], 4294967280 }
  0x64   : > { %451 = sfence }
  0x65   : > { %s500_s28 = sld [smem:[#allocation4]]  ;;  %s4554_s18 = sld [smem:[#allocation4 + $0x1]]  ;;  %v7320_v24 = vmov 0.0   ;;  %v504_v25 = vld [vmem:[%s5210_s9 + $0x8] sm:$0xff]  ;;  %v682_v27 = vlaneseq  ;;  %v5223_v28 = vld [vmem:[%s5210_s9 + $0x18] sm:$0xff]  ;;  %v5254_v42 = vld [vmem:[%s5210_s9] sm:$0xff] }
  0x66   : > { %s4555_s10 = sld [smem:[#allocation4 + $0x2]]  ;;  %1187 = vmatprep.mubr.f32.mxu0 %v7320_v24  ;;  %1264 = vmatprep.mubr.f32.mxu1 %v7320_v24  ;;  %v5220_v26 = vld [vmem:[%s5210_s9 + $0x48] sm:$0xff]  ;;  %s5225_s11 = sld [smem:[#allocation4 + $0x3]]  ;;  %v5231_v30 = vld [vmem:[%s5210_s9 + $0x58] sm:$0xff]  ;;  %v5259_v47 = vld [vmem:[%s5210_s9 + $0x40] sm:$0xff]  ;;  %vm1116_vm12 = vcmask 64512  }
  0x67   : > { %v5228_v29 = vld [vmem:[%s5210_s9 + $0x88] sm:$0xff]  ;;  %v5234_v31 = vld [vmem:[%s5210_s9 + $0x98] sm:$0xff]  ;;  %v683_v39 = vshrl.u32 %v682_v27, 7  ;;  %v5262_v48 = vld [vmem:[%s5210_s9 + $0x80] sm:$0xff]  ;;  %s5274_s12 = sld [smem:[#allocation4 + $0x4]]  ;;  %s5338_s13 = sld [smem:[#allocation4 + $0x5]] }
  0x68   : > { %v5269_v58 = vld [vmem:[%s5210_s9 + $0x10] sm:$0xff]  ;;  %v5308_v12 = vld [vmem:[%s5210_s9 + $0x28] sm:$0xff]  ;;  %v5482_v24 = vld [vmem:[%s5208_s8 + $0xd8] sm:$0xff]  ;;  %s4552_s23 = sshll.u32 %s4965_s21, 3  ;;  %s6187_s14 = sld [smem:[#allocation4 + $0x7]] }
  0x69   : > { %v5272_v59 = vld [vmem:[%s5210_s9 + $0x50] sm:$0xff]  ;;  %v5288_v2 = vsub.s32 0, %v683_v39  ;;  %v5295_v6 = vsub.s32 1, %v683_v39  ;;  %v5297_v7 = vsub.s32 2, %v683_v39  ;;  %v5300_v9 = vsub.s32 3, %v683_v39  ;;  %v5311_v13 = vld [vmem:[%s5210_s9 + $0x68] sm:$0xff] }
  0x6a   : > { %v5286_v1 = vld [vmem:[%s5210_s9 + $0x90] sm:$0xff]  ;;  %v5302_v10 = vsub.s32 4, %v683_v39  ;;  %v5304_v11 = vsub.s32 5, %v683_v39  ;;  %v5313_v14 = vsub.s32 6, %v683_v39  ;;  %v5318_v18 = vld [vmem:[%s5210_s9 + $0xa8] sm:$0xff]  ;;  %v5326_v23 = vsub.s32 7, %v683_v39 }
  0x6b   : > { %v5236_v32 = vstv %s500_s28  ;;  %v5238_v33 = vstv %s4554_s18  ;;  %7433 = vst [vmem:[#allocation8_spill] sm:$0xff] %v5318_v18  ;;  %7446 = vst [vmem:[#allocation21_spill] sm:$0xff] %v5482_v24  ;;  %p5824_p4 = scmp.lt.s32.totalorder %s4552_s23, 15  ;;  %s6218_s17 = sld [smem:[#allocation4 + $0x8]] }
  0x6c   : > { %v513_v34 = vsub.f32 %v504_v25, %v5236_v32  ;;  %v538_v35 = vsub.f32 %v5220_v26, %v5238_v33  ;;  %v5243_v36 = vstv %s4555_s10  ;;  %v515_v37 = vsub.f32 %v5223_v28, %v5236_v32  ;;  %s6668_s24 = sld [smem:[#allocation4 + $0xa]]  ;;  %s4551_s10 = sshll.u32 %s5204_s26, 7 }
  0x6d   : > { %v571_v38 = vsub.f32 %v5228_v29, %v5243_v36  ;;  %v540_v40 = vsub.f32 %v5231_v30, %v5238_v33  ;;  %v573_v41 = vsub.f32 %v5234_v31, %v5243_v36  ;;  %v512_v46 = vsub.f32 %v5254_v42, %v5236_v32  ;;  %s7661_s23 = smov (!%p5824_p4, %s4552_s23), 15  ;;  %p7656_p5 = scmp.ne.s32.totalorder %s7431_s27, 0 }
  0x6e   : > { %v521_v43 = vmul.f32 %v513_v34, %v513_v34  ;;  %v546_v44 = vmul.f32 %v538_v35, %v538_v35  ;;  %v523_v45 = vmul.f32 %v515_v37, %v515_v37  ;;  %v537_v52 = vsub.f32 %v5259_v47, %v5238_v33  ;;  %s4553_s29 = sshll.u32 %s7661_s23, 3  ;;  %s6634_s23 = sld [smem:[#allocation4 + $0x9]] }
  0x6f   : > { %v579_v49 = vmul.f32 %v571_v38, %v571_v38  ;;  %v548_v50 = vmul.f32 %v540_v40, %v540_v40  ;;  %v581_v51 = vmul.f32 %v573_v41, %v573_v41  ;;  %v520_v54 = vmul.f32 %v512_v46, %v512_v46  ;;  %v5332_v38 = vld [vmem:[%s5210_s9 + $0x38] sm:$0xff]  ;;  %s5877_s6 = scalar_lea.vmem %s7316_s2, %s4553_s29  ;;  %s6670_s29 = sld [smem:[#allocation4 + $0xb]] }
  0x70   : > { %v554_v53 = vadd.f32 %v546_v44, %v521_v43  ;;  %v570_v55 = vsub.f32 %v5262_v48, %v5243_v36  ;;  %v545_v57 = vmul.f32 %v537_v52, %v537_v52  ;;  %v5277_v60 = vstv %s5225_s11  ;;  %7434 = vst [vmem:[#allocation9_spill] sm:$0xff] %v5332_v38  ;;  %v5335_v40 = vld [vmem:[%s5210_s9 + $0x78] sm:$0xff]  ;;  %s6094_s11 = sld [smem:[#allocation4 + $0x6]]  ;;  %s4612_s26 = sshll.u32 (%p7656_p5), %s4965_s21, 6 }
  0x71   : > { %v556_v56 = vadd.f32 %v548_v50, %v523_v45  ;;  %v514_v63 = vsub.f32 %v5269_v58, %v5236_v32  ;;  %v539_v0 = vsub.f32 %v5272_v59, %v5238_v33  ;;  %v572_v5 = vsub.f32 %v5286_v1, %v5243_v36  ;;  %7435 = vst [vmem:[#allocation10_spill] sm:$0xff] %v5335_v40  ;;  %v568_v41 = vld [vmem:[%s5210_s9 + $0xb8] sm:$0xff] }
  0x72   : > { %v5279_v61 = vadd.f32 %v579_v49, %v554_v53  ;;  %v578_v62 = vmul.f32 %v570_v55, %v570_v55  ;;  %v553_v4 = vadd.f32 %v545_v57, %v520_v54  ;;  %v1750_v8 = vsub.f32 %v504_v25, %v5277_v60  ;;  %v507_v53 = vld [vmem:[%s5210_s9 + $0x20] sm:$0xff] }
  0x73   : > { %v5290_v3 = vadd.f32 %v581_v51, %v556_v56  ;;  %v522_v16 = vmul.f32 %v514_v63, %v514_v63  ;;  %v547_v17 = vmul.f32 %v539_v0, %v539_v0  ;;  %v580_v19 = vmul.f32 %v572_v5, %v572_v5  ;;  %v532_v56 = vld [vmem:[%s5210_s9 + $0x60] sm:$0xff] }
  0x74   : > { %4715 = vrsqrt.f32 %v5279_v61  ;;  %v5315_v15 = vadd.f32 %v578_v62, %v553_v4  ;;  %v517_v20 = vsub.f32 %v5308_v12, %v5236_v32  ;;  %v542_v21 = vsub.f32 %v5311_v13, %v5238_v33  ;;  %v565_v57 = vld [vmem:[%s5210_s9 + $0xa0] sm:$0xff] }
  0x75   : > { %4717 = vrsqrt.f32 %v5290_v3  ;;  %v575_v22 = vsub.f32 %v5318_v18, %v5243_v36  ;;  %v1758_v25 = vmul.f32 %v1750_v8, %v1750_v8  ;;  %v1752_v27 = vsub.f32 %v5223_v28, %v5277_v60  ;;  %v5503_v18 = vld [vmem:[%s5208_s8 + $0x158] sm:$0xff] }
  0x76   : > { %4719 = vrsqrt.f32 %v5315_v15  ;;  %v555_v34 = vadd.f32 %v547_v17, %v522_v16  ;;  %v525_v35 = vmul.f32 %v517_v20, %v517_v20  ;;  %v550_v37 = vmul.f32 %v542_v21, %v542_v21  ;;  %7448 = vst [vmem:[#allocation23_spill] sm:$0xff] %v5503_v18 }
  0x77   : > { %v5341_v43 = vstv %s5274_s12  ;;  %vm603_vm0 = vcmp.eq.f32.partialorder %v5279_v61, inf  ;;  %v519_v39 = vsub.f32 %v5332_v38, %v5236_v32  ;;  %v544_v28 = vsub.f32 %v5335_v40, %v5238_v33 }
  0x78   : > { %v577_v44 = vsub.f32 %v568_v41, %v5243_v36  ;;  %vm605_vm1 = vcmp.eq.f32.partialorder %v5279_v61, 0.0  ;;  %v606_v45 = vand.u32 2147483648, %v5279_v61  ;;  %v5351_v46 = vadd.f32 %v580_v19, %v555_v34 }
  0x79   : > { %v583_v49 = vmul.f32 %v575_v22, %v575_v22  ;;  %v558_v50 = vadd.f32 %v550_v37, %v525_v35  ;;  %v527_v51 = vmul.f32 %v519_v39, %v519_v39  ;;  %v552_v52 = vmul.f32 %v544_v28, %v544_v28 }
  0x7a   : > { %v1767_v54 = vsub.f32 %v5220_v26, %v5341_v43  ;;  %vm617_vm2 = vcmp.eq.f32.partialorder %v5290_v3, inf  ;;  %vm619_vm3 = vcmp.eq.f32.partialorder %v5290_v3, 0.0  ;;  %4721 = vrsqrt.f32 %v5351_v46 }
  0x7b   : > { %v585_v55 = vmul.f32 %v577_v44, %v577_v44  ;;  %v620_v63 = vand.u32 2147483648, %v5290_v3  ;;  %v560_v0 = vadd.f32 %v552_v52, %v527_v51  ;;  %v516_v4 = vsub.f32 %v507_v53, %v5236_v32 }
  0x7c   : > { %v541_v5 = vsub.f32 %v532_v56, %v5238_v33  ;;  %vm596_vm4 = vcmp.eq.f32.partialorder %v5315_v15, inf  ;;  %vm598_vm5 = vcmp.eq.f32.partialorder %v5315_v15, 0.0  ;;  %v599_v16 = vand.u32 2147483648, %v5315_v15 }
  0x7d   : > { %v5369_v19 = vadd.f32 %v583_v49, %v558_v50  ;;  %v574_v20 = vsub.f32 %v565_v57, %v5243_v36  ;;  %v1775_v21 = vmul.f32 %v1767_v54, %v1767_v54  ;;  %v5375_v34 = vadd.f32 %v585_v55, %v560_v0  ;;  %v509_v54 = vld [vmem:[%s5210_s9 + $0x30] sm:$0xff] }
  0x7e   : > { %v4716_v62 = vpop.eup %4715  ;;  %v524_v35 = vmul.f32 %v516_v4, %v516_v4  ;;  %v5378_v37 = vstv %s5338_s13  ;;  %v549_v44 = vmul.f32 %v541_v5, %v541_v5  ;;  %v5385_v49 = vmul.f32 %v1752_v27, %v1752_v27 }
  0x7f   : > { %v4718_v8 = vpop.eup %4717  ;;  %v602_v26 = vmul.f32 %v4716_v62, %v5279_v61  ;;  %4723 = vrsqrt.f32 %v5369_v19  ;;  %v5394_v56 = vadd.f32 %v1775_v21, %v1758_v25  ;;  %v567_v62 = vld [vmem:[%s5210_s9 + $0xb0] sm:$0xff]  ;;  %v518_v4 = vsub.f32 %v509_v54, %v5236_v32  ;;  %v5419_v32 = vld [vmem:[%s5208_s8 + $0x88] sm:$0xff] }
  0x80   : > { %v616_v17 = vmul.f32 %v4718_v8, %v5290_v3  ;;  %v4720_v41 = vpop.eup %4719  ;;  %4725 = vrsqrt.f32 %v5375_v34  ;;  %v557_v27 = vadd.f32 %v549_v44, %v524_v35  ;;  %v5406_v25 = vsub.f32 %v5228_v29, %v5378_v37  ;;  %7438 = vst [vmem:[#allocation13_spill] sm:$0xff] %v5419_v32 }
  0x81   : > { %v604_v22 = vsel %vm603_vm0, %v5279_v61, %v602_v26  ;;  %v595_v52 = vmul.f32 %v4720_v41, %v5315_v15  ;;  %v582_v61 = vmul.f32 %v574_v20, %v574_v20  ;;  %vm610_vm6 = vcmp.eq.f32.partialorder %v5351_v46, inf }
  0x82   : > { %v607_v39 = vsel %vm605_vm1, %v606_v45, %v604_v22  ;;  %v618_v28 = vsel %vm617_vm2, %v5290_v3, %v616_v17  ;;  %v534_v45 = vld [vmem:[%s5210_s9 + $0x70] sm:$0xff]  ;;  %v5428_v35 = vsub.f32 %v567_v62, %v5243_v36  ;;  %vm612_vm7 = vcmp.eq.f32.partialorder %v5351_v46, 0.0 }
  0x83   : > { %v651_v50 = vmul.f32 3.3333333, %v607_v39  ;;  %v621_v51 = vsel %vm619_vm3, %v620_v63, %v618_v28  ;;  %v597_v3 = vsel %vm596_vm4, %v5315_v15, %v595_v52  ;;  %v543_v20 = vsub.f32 %v534_v45, %v5238_v33  ;;  %v5413_v15 = vld [vmem:[%s5208_s8 + $0x8] sm:$0xff] }
  0x84   : > { %v653_v55 = vmul.f32 3.3333333, %v621_v51  ;;  %v600_v0 = vsel %vm598_vm5, %v599_v16, %v597_v3  ;;  %v4722_v5 = vpop.eup %4721  ;;  %7436 = vst [vmem:[#allocation11_spill] sm:$0xff] %v5413_v15  ;;  %v5416_v16 = vld [vmem:[%s5208_s8 + $0x48] sm:$0xff]  ;;  %v5425_v22 = vadd.f32 %v582_v61, %v557_v27  ;;  %vm631_vm8 = vcmp.eq.f32.partialorder %v5369_v19, inf }
  0x85   : > { %v659_v57 = vsub.f32 1.0, %v651_v50  ;;  %7437 = vst [vmem:[#allocation12_spill] sm:$0xff] %v5416_v16  ;;  %v5423_v21 = vmul.f32 3.3333333, %v600_v0  ;;  %v5434_v28 = vld [vmem:[%s5208_s8 + $0xc8] sm:$0xff]  ;;  %v609_v52 = vmul.f32 %v4722_v5, %v5351_v46  ;;  %v5445_v54 = vmul.f32 %v518_v4, %v518_v4  ;;  %v5461_v4 = vld [vmem:[%s5208_s8 + $0x18] sm:$0xff] }
  0x86   : > { %v661_v63 = vsub.f32 1.0, %v653_v55  ;;  %7439 = vst [vmem:[#allocation14_spill] sm:$0xff] %v5434_v28  ;;  %v5438_v50 = vld [vmem:[%s5208_s8 + $0x108] sm:$0xff]  ;;  %vm645_vm9 = vcmp.eq.f32.partialorder %v5375_v34, inf  ;;  %v5454_v3 = vmul.f32 %v543_v20, %v543_v20  ;;  %7442 = vst [vmem:[#allocation17_spill] sm:$0xff] %v5461_v4  ;;  %v5464_v5 = vld [vmem:[%s5208_s8 + $0x58] sm:$0xff]  ;;  %4727 = vrsqrt.f32 %v5425_v22 }
  0x87   : > { %v667_v8 = vmax.f32 %v659_v57, 0.0  ;;  %7440 = vst [vmem:[#allocation15_spill] sm:$0xff] %v5438_v50  ;;  %v5451_v57 = vld [vmem:[%s5208_s8 + $0x148] sm:$0xff]  ;;  %7443 = vst [vmem:[#allocation18_spill] sm:$0xff] %v5464_v5  ;;  %vm633_vm10 = vcmp.eq.f32.partialorder %v5369_v19, 0.0  ;;  %vm647_vm11 = vcmp.eq.f32.partialorder %v5375_v34, 0.0 }
  0x88   : > { %v5421_v29 = vmax.f32 %v661_v63, 0.0  ;;  %7441 = vst [vmem:[#allocation16_spill] sm:$0xff] %v5451_v57  ;;  %v5473_v20 = vld [vmem:[%s5208_s8 + $0x1c8] sm:$0xff]  ;;  %vm624_vm13 = vcmp.eq.f32.partialorder %v5425_v22, inf  ;;  %vm626_vm14 = vcmp.eq.f32.partialorder %v5425_v22, 0.0 }
  0x89   : > { %v689_v41 = vrot.slane %v667_v8, %v5288_v2  ;;  %v737_v33 = vrot.slane %v667_v8, %v5295_v6  ;;  %v793_v39 = vrot.slane %v667_v8, %v5297_v7  ;;  %v849_v44 = vrot.slane %v667_v8, %v5300_v9  ;;  %7445 = vst [vmem:[#allocation20_spill] sm:$0xff] %v5473_v20  ;;  %v4724_v17 = vpop.eup %4723 }
  0x8a   : > { %v905_v36 = vrot.slane %v667_v8, %v5302_v10  ;;  %v961_v51 = vrot.slane %v667_v8, %v5304_v11  ;;  %v1017_v63 = vrot.slane %v667_v8, %v5313_v14  ;;  %v1073_v0 = vrot.slane %v667_v8, %v5326_v23 }
  0x8b   : > { %v715_v55 = vmul.f32 %v689_v41, %v5413_v15  ;;  %v763_v61 = vmul.f32 %v737_v33, %v5416_v16  ;;  %v819_v45 = vmul.f32 %v793_v39, %v5419_v32  ;;  %v875_v27 = vmul.f32 %v849_v44, %v5434_v28  ;;  %v5467_v41 = vld [vmem:[%s5208_s8 + $0x98] sm:$0xff]  ;;  %v5470_v39 = vld [vmem:[%s5208_s8 + $0x188] sm:$0xff]  ;;  %v4726_v28 = vpop.eup %4725 }
  0x8c   : > { %v931_v62 = vmul.f32 %v905_v36, %v5438_v50  ;;  %7444 = vst [vmem:[#allocation19_spill] sm:$0xff] %v5467_v41  ;;  %v697_v44 = vrot.slane %v5421_v29, %v5288_v2  ;;  %v745_v36 = vrot.slane %v5421_v29, %v5295_v6  ;;  %v801_v8 = vrot.slane %v5421_v29, %v5297_v7 }
  0x8d   : > { %v771_v33 = vadd.f32 %v763_v61, %v715_v55  ;;  %v987_v26 = vmul.f32 %v961_v51, %v5451_v57  ;;  %v857_v55 = vrot.slane %v5421_v29, %v5300_v9  ;;  %v5488_v61 = vld [vmem:[%s5208_s8 + $0x118] sm:$0xff]  ;;  %v913_v53 = vrot.slane %v5421_v29, %v5302_v10 }
  0x8e   : > { %7447 = vst [vmem:[#allocation22_spill] sm:$0xff] %v5488_v61  ;;  %v969_v50 = vrot.slane %v5421_v29, %v5304_v11  ;;  %v717_v32 = vmul.f32 %v697_v44, %v5461_v4  ;;  %v765_v16 = vmul.f32 %v745_v36, %v5464_v5  ;;  %v821_v51 = vmul.f32 %v801_v8, %v5467_v41  ;;  %v5509_v8 = vld [vmem:[%s5208_s8 + $0x198] sm:$0xff]  ;;  %v5558_v5 = vld [vmem:[%s5208_s8 + $0x100] sm:$0xff] }
  0x8f   : > { %v827_v40 = vadd.f32 %v819_v45, %v771_v33  ;;  %v1043_v57 = vmul.f32 %v1017_v63, %v5470_v39  ;;  %v1099_v15 = vmul.f32 %v1073_v0, %v5473_v20  ;;  %v877_v38 = vmul.f32 %v857_v55, %v5482_v24  ;;  %7449 = vst [vmem:[#allocation24_spill] sm:$0xff] %v5509_v8 }
  0x90   : > { %v1025_v45 = vrot.slane %v5421_v29, %v5313_v14  ;;  %v773_v44 = vadd.f32 %v765_v16, %v717_v32  ;;  %v933_v36 = vmul.f32 %v913_v53, %v5488_v61  ;;  %v658_v41 = vsub.f32 1.0, %v5423_v21  ;;  %v5526_v61 = vld [vmem:[%s5208_s8 + $0x40] sm:$0xff]  ;;  %7454 = vst [vmem:[#allocation28_spill] sm:$0xff] %v5558_v5 }
  0x91   : > { %v883_v33 = vadd.f32 %v875_v27, %v827_v40  ;;  %v611_v63 = vsel %vm610_vm6, %v5351_v46, %v609_v52  ;;  %v630_v0 = vmul.f32 %v4724_v17, %v5369_v19  ;;  %v644_v55 = vmul.f32 %v4726_v28, %v5375_v34  ;;  %v5523_v52 = vld [vmem:[%s5208_s8] sm:$0xff] }
  0x92   : > { %v829_v16 = vadd.f32 %v821_v51, %v773_v44  ;;  %v989_v53 = vmul.f32 %v969_v50, %v5503_v18  ;;  %v666_v32 = vmax.f32 %v658_v41, 0.0  ;;  %v1045_v21 = vmul.f32 %v1025_v45, %v5509_v8  ;;  %v5536_v51 = vld [vmem:[%s5208_s8 + $0x1d8] sm:$0xff]  ;;  %v5544_v44 = vld [vmem:[%s5208_s8 + $0xc0] sm:$0xff] }
  0x93   : > { %v939_v40 = vadd.f32 %v931_v62, %v883_v33  ;;  %v1081_v27 = vrot.slane %v5421_v29, %v5326_v23  ;;  %v7450_v17 = vand.u32 2147483648, %v5351_v46  ;;  %v632_v62 = vsel %vm631_vm8, %v5369_v19, %v630_v0  ;;  %7451 = vst [vmem:[#allocation25_spill] sm:$0xff] %v5536_v51  ;;  %v5541_v33 = vld [vmem:[%s5208_s8 + $0x80] sm:$0xff]  ;;  %7453 = vst [vmem:[#allocation27_spill] sm:$0xff] %v5544_v44 }
  0x94   : > { %v885_v41 = vadd.f32 %v877_v38, %v829_v16  ;;  %v685_v29 = vrot.slane %v666_v32, %v5288_v2  ;;  %v733_v45 = vrot.slane %v666_v32, %v5295_v6  ;;  %7452 = vst [vmem:[#allocation26_spill] sm:$0xff] %v5541_v33  ;;  %v789_v46 = vrot.slane %v666_v32, %v5297_v7 }
  0x95   : > { %v614_v28 = vsel %vm612_vm7, %v7450_v17, %v611_v63  ;;  %v995_v50 = vadd.f32 %v987_v26, %v939_v40  ;;  %v845_v63 = vrot.slane %v666_v32, %v5300_v9  ;;  %v901_v0 = vrot.slane %v666_v32, %v5302_v10 }
  0x96   : > { %v646_v38 = vsel %vm645_vm9, %v5375_v34, %v644_v55  ;;  %v941_v40 = vadd.f32 %v933_v36, %v885_v41  ;;  %v714_v16 = vmul.f32 %v685_v29, %v5523_v52  ;;  %v762_v17 = vmul.f32 %v733_v45, %v5526_v61  ;;  %v5562_v36 = vld [vmem:[%s5208_s8 + $0x140] sm:$0xff] }
  0x97   : > { %v1051_v26 = vadd.f32 %v1043_v57, %v995_v50  ;;  %v1101_v8 = vmul.f32 %v1081_v27, %v5536_v51  ;;  %v818_v18 = vmul.f32 %v789_v46, %v5541_v33  ;;  %v874_v24 = vmul.f32 %v845_v63, %v5544_v44  ;;  %7455 = vst [vmem:[#allocation29_spill] sm:$0xff] %v5562_v36  ;;  %v5681_v33 = vld [vmem:[%s5208_s8 + $0x168] sm:$0xff] }
  0x98   : > { %v957_v4 = vrot.slane %v666_v32, %v5304_v11  ;;  %v997_v55 = vadd.f32 %v989_v53, %v941_v40  ;;  %v770_v57 = vadd.f32 %v762_v17, %v714_v16  ;;  %v1013_v50 = vrot.slane %v666_v32, %v5313_v14  ;;  %v5576_v40 = vld [vmem:[%s5208_s8 + $0x180] sm:$0xff]  ;;  %7472 = vst [vmem:[#allocation44_spill] sm:$0xff] %v5681_v33 }
  0x99   : > { %v1107_v20 = vadd.f32 %v1099_v15, %v1051_v26  ;;  %v1069_v41 = vrot.slane %v666_v32, %v5326_v23  ;;  %v652_v27 = vmul.f32 3.3333333, %v614_v28  ;;  %v7456_v29 = vand.u32 2147483648, %v5369_v19  ;;  %7458 = vst [vmem:[#allocation30_spill] sm:$0xff] %v5576_v40  ;;  %v5579_v16 = vld [vmem:[%s5208_s8 + $0x1c0] sm:$0xff]  ;;  %v4728_v28 = vpop.eup %4727 }
  0x9a   : > { %v7457_v46 = vand.u32 2147483648, %v5375_v34  ;;  %v1053_v15 = vadd.f32 %v1045_v21, %v997_v55  ;;  %v826_v53 = vadd.f32 %v818_v18, %v770_v57  ;;  %v930_v26 = vmul.f32 %v901_v0, %v5558_v5  ;;  %7459 = vst [vmem:[#allocation31_spill] sm:$0xff] %v5579_v16 }
  0x9b   : > { %v635_v45 = vsel %vm633_vm10, %v7456_v29, %v632_v62  ;;  %1123 = vmatprep.subr.mxu0 %v1107_v20  ;;  %v986_v19 = vmul.f32 %v957_v4, %v5562_v36  ;;  %v660_v62 = vsub.f32 1.0, %v652_v27  ;;  %v5586_v34 = vmul.f32 %v5428_v35, %v5428_v35  ;;  %v5593_v27 = vld [vmem:[%s5208_s8 + $0x10] sm:$0xff]  ;;  %v5675_v36 = vld [vmem:[%s5208_s8 + $0x128] sm:$0xff] }
  0x9c   : > { %v649_v63 = vsel %vm647_vm11, %v7457_v46, %v646_v38  ;;  %v655_v32 = vmul.f32 3.3333333, %v635_v45  ;;  %v1109_v18 = vadd.f32 %v1101_v8, %v1053_v15  ;;  %v882_v20 = vadd.f32 %v874_v24, %v826_v53  ;;  %7460 = vst [vmem:[#allocation32_spill] sm:$0xff] %v5593_v27  ;;  %v5596_v35 = vld [vmem:[%s5208_s8 + $0x50] sm:$0xff]  ;;  %7471 = vst [vmem:[#allocation43_spill] sm:$0xff] %v5675_v36 }
  0x9d   : > { %v5582_v17 = vmul.f32 3.3333333, %v649_v63  ;;  %v623_v0 = vmul.f32 %v4728_v28, %v5425_v22  ;;  %v1042_v38 = vmul.f32 %v1013_v50, %v5576_v40  ;;  %v1098_v4 = vmul.f32 %v1069_v41, %v5579_v16  ;;  %7461 = vst [vmem:[#allocation33_spill] sm:$0xff] %v5596_v35  ;;  %v5599_v8 = vld [vmem:[%s5208_s8 + $0x90] sm:$0xff]  ;;  %v5652_v50 = vld [vmem:[%s5208_s8 + $0xa8] sm:$0xff] }
  0x9e   : > { %v663_v21 = vsub.f32 1.0, %v655_v32  ;;  %v668_v55 = vmax.f32 %v660_v62, 0.0  ;;  %1200 = vmatprep.subr.mxu1 %v1109_v18  ;;  %v938_v57 = vadd.f32 %v930_v26, %v882_v20  ;;  %7462 = vst [vmem:[#allocation34_spill] sm:$0xff] %v5599_v8  ;;  %v5610_v63 = vld [vmem:[%s5208_s8 + $0xd0] sm:$0xff]  ;;  %v5618_v32 = vadd.f32 %v5454_v3, %v5445_v54  ;;  %v5635_v3 = vld [vmem:[%s5208_s8 + $0x28] sm:$0xff]  ;;  %7468 = vst [vmem:[#allocation40_spill] sm:$0xff] %v5652_v50 }
  0x9f   : > { %v665_v29 = vsub.f32 1.0, %v5582_v17  ;;  %7463 = vst [vmem:[#allocation35_spill] sm:$0xff] %v5610_v63  ;;  %v625_v26 = vsel %vm624_vm13, %v5425_v22, %v623_v0  ;;  %v5622_v28 = vmul.f32 %v5406_v25, %v5406_v25  ;;  %v5630_v0 = vld [vmem:[%s5208_s8 + $0x110] sm:$0xff]  ;;  %7464 = vst [vmem:[#allocation36_spill] sm:$0xff] %v5635_v3 }
  0xa0   : > { %v5601_v24 = vmax.f32 %v663_v21, 0.0  ;;  %v693_v41 = vrot.slane %v668_v55, %v5288_v2  ;;  %v741_v45 = vrot.slane %v668_v55, %v5295_v6  ;;  %v797_v46 = vrot.slane %v668_v55, %v5297_v7 }
  0xa1   : > { %v853_v15 = vrot.slane %v668_v55, %v5300_v9  ;;  %v994_v53 = vadd.f32 %v986_v19, %v938_v57  ;;  %v909_v18 = vrot.slane %v668_v55, %v5302_v10  ;;  %v965_v54 = vrot.slane %v668_v55, %v5304_v11  ;;  %v5638_v57 = vld [vmem:[%s5208_s8 + $0x68] sm:$0xff] }
  0xa2   : > { %v716_v62 = vmul.f32 %v693_v41, %v5593_v27  ;;  %v764_v17 = vmul.f32 %v741_v45, %v5596_v35  ;;  %v820_v19 = vmul.f32 %v797_v46, %v5599_v8  ;;  %v1021_v25 = vrot.slane %v668_v55, %v5313_v14  ;;  %7465 = vst [vmem:[#allocation37_spill] sm:$0xff] %v5638_v57  ;;  %v5641_v45 = vld [vmem:[%s5208_s8 + $0x150] sm:$0xff] }
  0xa3   : > { %v1050_v20 = vadd.f32 %v1042_v38, %v994_v53  ;;  %v876_v21 = vmul.f32 %v853_v15, %v5610_v63  ;;  %7466 = vst [vmem:[#allocation38_spill] sm:$0xff] %v5641_v45  ;;  %v5644_v46 = vld [vmem:[%s5208_s8 + $0x190] sm:$0xff]  ;;  %v1077_v38 = vrot.slane %v668_v55, %v5326_v23  ;;  %v705_v15 = vrot.slane %v5601_v24, %v5288_v2 }
  0xa4   : > { %v772_v41 = vadd.f32 %v764_v17, %v716_v62  ;;  %7467 = vst [vmem:[#allocation39_spill] sm:$0xff] %v5644_v46  ;;  %v753_v53 = vrot.slane %v5601_v24, %v5295_v6  ;;  %v5655_v8 = vld [vmem:[%s5208_s8 + $0x1d0] sm:$0xff]  ;;  %v5660_v62 = vld [vmem:[%s7318_s4] sm:$0xff]  ;;  %v809_v55 = vrot.slane %v5601_v24, %v5297_v7  ;;  %v5665_v17 = vld [vmem:[%s5208_s8 + $0xe8] sm:$0xff]  ;;  %v865_v35 = vrot.slane %v5601_v24, %v5300_v9 }
  0xa5   : > { %v1106_v63 = vadd.f32 %v1098_v4, %v1050_v20  ;;  %7469 = vst [vmem:[#allocation41_spill] sm:$0xff] %v5655_v8  ;;  %7470 = vst [vmem:[#allocation42_spill] sm:$0xff] %v5665_v17  ;;  %v921_v27 = vrot.slane %v5601_v24, %v5302_v10  ;;  %v932_v20 = vmul.f32 %v909_v18, %v5630_v0 }
  0xa6   : > { %v828_v4 = vadd.f32 %v820_v19, %v772_v41  ;;  %v719_v16 = vmul.f32 %v705_v15, %v5635_v3  ;;  %v767_v40 = vmul.f32 %v753_v53, %v5638_v57  ;;  %v988_v5 = vmul.f32 %v965_v54, %v5641_v45  ;;  %v5742_v57 = vld [vmem:[%s5208_s8 + $0x138] sm:$0xff] }
  0xa7   : > { %1124 = vmatpush1.msra.mxu0 %v1106_v63  ;;  %v1044_v51 = vmul.f32 %v1021_v25, %v5644_v46  ;;  %v823_v44 = vmul.f32 %v809_v55, %v5652_v50  ;;  %v977_v19 = vrot.slane %v5601_v24, %v5304_v11  ;;  %v1100_v41 = vmul.f32 %v1077_v38, %v5655_v8  ;;  %v5698_v38 = vld [vmem:[%s7318_s4 + $0x8] sm:$0xff]  ;;  %v5708_v8 = vld [vmem:[%s5208_s8 + $0xb8] sm:$0xff] }
  0xa8   : > { %v884_v18 = vadd.f32 %v876_v21, %v828_v4  ;;  %4556 = vmatmul.mubr.msk.f32.vlgmr.msra.gmra.mrb[0].mxu0 %vm1116_vm12, %v5660_v62  ;;  %v775_v63 = vadd.f32 %v767_v40, %v719_v16  ;;  %v879_v54 = vmul.f32 %v865_v35, %v5665_v17  ;;  %v935_v25 = vmul.f32 %v921_v27, %v5675_v36  ;;  %v5702_v27 = vld [vmem:[%s5208_s8 + $0x38] sm:$0xff]  ;;  %v5715_v36 = vld [vmem:[%s5208_s8 + $0x1a8] sm:$0xff] }
  0xa9   : > { %v1033_v15 = vrot.slane %v5601_v24, %v5313_v14  ;;  %v1089_v53 = vrot.slane %v5601_v24, %v5326_v23  ;;  %v673_v21 = vmax.f32 %v665_v29, 0.0  ;;  %v7473_v55 = vmov 0.0   ;;  %v5705_v4 = vld [vmem:[%s5208_s8 + $0x78] sm:$0xff]  ;;  %7475 = vst [vmem:[#allocation46_spill] sm:$0xff] %v5708_v8 }
  0xaa   : > { %1193 = vmatprep.mubr.f32.mxu0 %v7473_v55  ;;  %v940_v40 = vadd.f32 %v932_v20, %v884_v18  ;;  %v831_v16 = vadd.f32 %v823_v44, %v775_v63  ;;  %v991_v35 = vmul.f32 %v977_v19, %v5681_v33  ;;  %7474 = vst [vmem:[#allocation45_spill] sm:$0xff] %v5705_v4  ;;  %v7476_v24 = vand.u32 2147483648, %v5425_v22  ;;  %v5721_v19 = vld [vmem:[%s5208_s8 + $0xf8] sm:$0xff] }
  0xab   : > { %v713_v17 = vrot.slane %v673_v21, %v5288_v2  ;;  %v761_v44 = vrot.slane %v673_v21, %v5295_v6  ;;  %v817_v20 = vrot.slane %v673_v21, %v5297_v7  ;;  %v873_v18 = vrot.slane %v673_v21, %v5300_v9  ;;  %v5745_v3 = vld [vmem:[%s5208_s8 + $0x178] sm:$0xff] }
  0xac   : > { %v628_v29 = vsel %vm626_vm14, %v7476_v24, %v625_v26  ;;  %v996_v63 = vadd.f32 %v988_v5, %v940_v40  ;;  %v887_v33 = vadd.f32 %v879_v54, %v831_v16  ;;  %v929_v50 = vrot.slane %v673_v21, %v5302_v10  ;;  %4557 = vmatmul.mubr.msk.f32.gmra.mrb[2].mxu0 %vm1116_vm12, %v5698_v38  ;;  %v5732_v26 = vld [vmem:[%s5208_s8 + $0x1e8] sm:$0xff] }
  0xad   : > { %v5727_v22 = vadd.f32 %v5586_v34, %v5618_v32  ;;  %v721_v24 = vmul.f32 %v713_v17, %v5702_v27  ;;  %v769_v46 = vmul.f32 %v761_v44, %v5705_v4  ;;  %v825_v5 = vmul.f32 %v817_v20, %v5708_v8  ;;  %1341 = vmatprep.mubr.f32.mxu0 %v7473_v55  ;;  %v5748_v17 = vld [vmem:[%s5208_s8 + $0x1b8] sm:$0xff] }
  0xae   : > { %v985_v54 = vrot.slane %v673_v21, %v5304_v11  ;;  %v1052_v40 = vadd.f32 %v1044_v51, %v996_v63  ;;  %v943_v16 = vadd.f32 %v935_v25, %v887_v33  ;;  %v1047_v34 = vmul.f32 %v1033_v15, %v5715_v36  ;;  %v5752_v20 = vld [vmem:[%s5208_s8 + $0x1f8] sm:$0xff] }
  0xaf   : > { %v881_v32 = vmul.f32 %v873_v18, %v5721_v19  ;;  %v777_v45 = vadd.f32 %v769_v46, %v721_v24  ;;  %v1041_v44 = vrot.slane %v673_v21, %v5313_v14  ;;  %7477 = vst [vmem:[#allocation47_spill] sm:$0xff] %v5752_v20  ;;  %v1097_v8 = vrot.slane %v673_v21, %v5326_v23 }
  0xb0   : > { %v654_v4 = vmul.f32 3.3333333, %v628_v29  ;;  %v1108_v51 = vadd.f32 %v1100_v41, %v1052_v40  ;;  %v999_v33 = vadd.f32 %v991_v35, %v943_v16  ;;  %v1103_v25 = vmul.f32 %v1089_v53, %v5732_v26  ;;  %v5776_v29 = vld [vmem:[%s5208_s8 + $0x60] sm:$0xff] }
  0xb1   : > { %4729 = vrsqrt.f32 %v5727_v22  ;;  %v833_v15 = vadd.f32 %v825_v5, %v777_v45  ;;  %v937_v18 = vmul.f32 %v929_v50, %v5742_v57  ;;  %v993_v46 = vmul.f32 %v985_v54, %v5745_v3  ;;  %7479 = vst [vmem:[#allocation49_spill] sm:$0xff] %v5776_v29 }
  0xb2   : > { %v662_v63 = vsub.f32 1.0, %v654_v4  ;;  %1201 = vmatpush1.msra.mxu1 %v1108_v51  ;;  %v1055_v24 = vadd.f32 %v1047_v34, %v999_v33  ;;  %v1049_v21 = vmul.f32 %v1041_v44, %v5748_v17  ;;  %v1105_v41 = vmul.f32 %v1097_v8, %v5752_v20  ;;  %v5773_v4 = vld [vmem:[%s5208_s8 + $0x20] sm:$0xff] }
  0xb3   : > { %vm638_vm15 = vcmp.eq.f32.partialorder %v5727_v22, inf  ;;  %v5764_v53 = vadd.f32 %v5622_v28, %v5394_v56  ;;  %4558 = vmatmul.mubr.msk.f32.vlgmr.msra.gmra.mrb[0].mxu1 %vm1116_vm12, %v5660_v62  ;;  %v889_v50 = vadd.f32 %v881_v32, %v833_v15  ;;  %vm640_vm0 = vcmp.eq.f32.partialorder %v5727_v22, 0.0  ;;  %7478 = vst [vmem:[#allocation48_spill] sm:$0xff] %v5773_v4  ;;  %v5779_v56 = vld [vmem:[%s5208_s8 + $0xa0] sm:$0xff] }
  0xb4   : > { %v5768_v45 = vmax.f32 %v662_v63, 0.0  ;;  %v641_v35 = vand.u32 2147483648, %v5727_v22  ;;  %v1111_v8 = vadd.f32 %v1103_v25, %v1055_v24  ;;  %7480 = vst [vmem:[#allocation50_spill] sm:$0xff] %v5779_v56  ;;  %1270 = vmatprep.mubr.f32.mxu1 %v7473_v55  ;;  %v1769_v28 = vsub.f32 %v5231_v30, %v5341_v43  ;;  %v5794_v32 = vld [vmem:[%s5208_s8 + $0xe0] sm:$0xff] }
  0xb5   : > { %4731 = vrsqrt.f32 %v5764_v53  ;;  %v1794_v5 = vsub.f32 %v5234_v31, %v5378_v37  ;;  %v945_v54 = vadd.f32 %v937_v18, %v889_v50  ;;  %7481 = vst [vmem:[#allocation51_spill] sm:$0xff] %v5794_v32  ;;  %v5797_v44 = vld [vmem:[%s5208_s8 + $0x120] sm:$0xff]  ;;  %vm1824_vm1 = vcmp.eq.f32.partialorder %v5764_v53, inf }
  0xb6   : > { %v701_v40 = vrot.slane %v5768_v45, %v5288_v2  ;;  %v749_v16 = vrot.slane %v5768_v45, %v5295_v6  ;;  %v805_v34 = vrot.slane %v5768_v45, %v5297_v7  ;;  %7482 = vst [vmem:[#allocation52_spill] sm:$0xff] %v5797_v44  ;;  %1277 = vmatprep.subr.mxu0 %v1111_v8  ;;  %v5805_v51 = vld [vmem:[%s5208_s8 + $0x160] sm:$0xff]  ;;  %vm1826_vm2 = vcmp.eq.f32.partialorder %v5764_v53, 0.0 }
  0xb7   : > { %v861_v30 = vrot.slane %v5768_v45, %v5300_v9  ;;  %v917_v31 = vrot.slane %v5768_v45, %v5302_v10  ;;  %7483 = vst [vmem:[#allocation53_spill] sm:$0xff] %v5805_v51  ;;  %v973_v33 = vrot.slane %v5768_v45, %v5304_v11  ;;  %v5810_v25 = vld [vmem:[%s5208_s8 + $0x1a0] sm:$0xff]  ;;  %v1029_v15 = vrot.slane %v5768_v45, %v5313_v14 }
  0xb8   : > { %7484 = vst [vmem:[#allocation54_spill] sm:$0xff] %v5810_v25  ;;  %v1001_v18 = vadd.f32 %v993_v46, %v945_v54  ;;  %v718_v63 = vmul.f32 %v701_v40, %v5773_v4  ;;  %v766_v24 = vmul.f32 %v749_v16, %v5776_v29  ;;  %v822_v50 = vmul.f32 %v805_v34, %v5779_v56 }
  0xb9   : > { %4559 = vmatmul.mubr.msk.f32.gmra.mrb[2].mxu1 %vm1116_vm12, %v5698_v38  ;;  %v878_v8 = vmul.f32 %v861_v30, %v5794_v32  ;;  %v934_v20 = vmul.f32 %v917_v31, %v5797_v44  ;;  %v990_v40 = vmul.f32 %v973_v33, %v5805_v51  ;;  %v1046_v16 = vmul.f32 %v1029_v15, %v5810_v25  ;;  %v7500_v25 = vld [vmem:[#allocation10_spill] sm:$0xff] }
  0xba   : > { %1418 = vmatprep.mubr.f32.mxu1 %v7473_v55  ;;  %v1057_v46 = vadd.f32 %v1049_v21, %v1001_v18  ;;  %v774_v54 = vadd.f32 %v766_v24, %v718_v63  ;;  %v1777_v30 = vmul.f32 %v1769_v28, %v1769_v28  ;;  %v1802_v31 = vmul.f32 %v1794_v5, %v1794_v5 }
  0xbb   : > { %v4730_v34 = vpop.eup %4729  ;;  %v1749_v44 = vsub.f32 %v5254_v42, %v5277_v60  ;;  %v1766_v32 = vsub.f32 %v5259_v47, %v5341_v43  ;;  %v1085_v21 = vrot.slane %v5768_v45, %v5326_v23  ;;  %v1791_v42 = vsub.f32 %v5262_v48, %v5378_v37 }
  0xbc   : > { %v1113_v56 = vadd.f32 %v1105_v41, %v1057_v46  ;;  %v830_v29 = vadd.f32 %v822_v50, %v774_v54  ;;  %v637_v18 = vmul.f32 %v4730_v34, %v5727_v22  ;;  %v1785_v28 = vadd.f32 %v1777_v30, %v5385_v49  ;;  %v5849_v41 = vld [vmem:[%s5208_s8 + $0x1e0] sm:$0xff] }
  0xbd   : > { %v1757_v5 = vmul.f32 %v1749_v44, %v1749_v44  ;;  %v1774_v33 = vmul.f32 %v1766_v32, %v1766_v32  ;;  %7486 = vst [vmem:[#allocation55_spill] sm:$0xff] %v5849_v41  ;;  %v1827_v15 = vand.u32 2147483648, %v5764_v53  ;;  %v1751_v63 = vsub.f32 %v5269_v58, %v5277_v60 }
  0xbe   : > { %1354 = vmatprep.subr.mxu1 %v1113_v56  ;;  %v886_v47 = vadd.f32 %v878_v8, %v830_v29  ;;  %v639_v45 = vsel %vm638_vm15, %v5727_v22, %v637_v18  ;;  %v5859_v44 = vadd.f32 %v1802_v31, %v1785_v28  ;;  %v1799_v56 = vmul.f32 %v1791_v42, %v1791_v42  ;;  %v5880_v31 = vld [vmem:[%s5208_s8 + $0x30] sm:$0xff] }
  0xbf   : > { %v4732_v49 = vpop.eup %4731  ;;  %v642_v32 = vsel %vm640_vm0, %v641_v35, %v639_v45  ;;  %v1782_v48 = vadd.f32 %v1774_v33, %v1757_v5  ;;  %v1768_v8 = vsub.f32 %v5272_v59, %v5341_v43  ;;  %v1102_v58 = vmul.f32 %v1085_v21, %v5849_v41  ;;  %7487 = vst [vmem:[#allocation56_spill] sm:$0xff] %v5880_v31  ;;  %v5883_v21 = vld [vmem:[%s5208_s8 + $0x70] sm:$0xff] }
  0xc0   : > { %v942_v29 = vadd.f32 %v934_v20, %v886_v47  ;;  %v656_v24 = vmul.f32 3.3333333, %v642_v32  ;;  %v1823_v50 = vmul.f32 %v4732_v49, %v5764_v53  ;;  %4733 = vrsqrt.f32 %v5859_v44  ;;  %7488 = vst [vmem:[#allocation57_spill] sm:$0xff] %v5883_v21  ;;  %v5886_v18 = vld [vmem:[%s5208_s8 + $0xb0] sm:$0xff]  ;;  %v493_v32 = vld [vmem:[%s5877_s6 + $0x8] sm:$0xff] }
  0xc1   : > { %v5870_v46 = vadd.f32 %v1799_v56, %v1782_v48  ;;  %v1776_v30 = vmul.f32 %v1768_v8, %v1768_v8  ;;  %7489 = vst [vmem:[#allocation58_spill] sm:$0xff] %v5886_v18  ;;  %v1754_v28 = vsub.f32 %v5308_v12, %v5277_v60  ;;  %v5897_v45 = vld [vmem:[%s5208_s8 + $0xf0] sm:$0xff]  ;;  %vm1838_vm3 = vcmp.eq.f32.partialorder %v5859_v44, inf }
  0xc2   : > { %v998_v22 = vadd.f32 %v990_v40, %v942_v29  ;;  %v664_v35 = vsub.f32 1.0, %v656_v24  ;;  %v1825_v20 = vsel %vm1824_vm1, %v5764_v53, %v1823_v50  ;;  %v1759_v40 = vmul.f32 %v1751_v63, %v1751_v63  ;;  %7490 = vst [vmem:[#allocation59_spill] sm:$0xff] %v5897_v45  ;;  %v5911_v24 = vld [vmem:[%s5208_s8 + $0x170] sm:$0xff] }
  0xc3   : > { %v1828_v54 = vsel %vm1826_vm2, %v1827_v15, %v1825_v20  ;;  %4735 = vrsqrt.f32 %v5870_v46  ;;  %7492 = vst [vmem:[#allocation61_spill] sm:$0xff] %v5911_v24  ;;  %v5914_v50 = vld [vmem:[%s5208_s8 + $0x1b0] sm:$0xff]  ;;  %vm1840_vm4 = vcmp.eq.f32.partialorder %v5859_v44, 0.0  ;;  %v1841_v20 = vand.u32 2147483648, %v5859_v44 }
  0xc4   : > { %v1054_v34 = vadd.f32 %v1046_v16, %v998_v22  ;;  %v672_v59 = vmax.f32 %v664_v35, 0.0  ;;  %v1872_v53 = vmul.f32 3.3333333, %v1828_v54  ;;  %v1793_v16 = vsub.f32 %v5286_v1, %v5378_v37  ;;  %v5901_v1 = vld [vmem:[%s5208_s8 + $0x130] sm:$0xff]  ;;  %7493 = vst [vmem:[#allocation62_spill] sm:$0xff] %v5914_v50  ;;  %v497_v35 = vld [vmem:[%s5877_s6 + $0x28] sm:$0xff] }
  0xc5   : > { %7491 = vst [vmem:[#allocation60_spill] sm:$0xff] %v5901_v1  ;;  %v5919_v22 = vld [vmem:[%s5208_s8 + $0x1f0] sm:$0xff]  ;;  %vm1817_vm5 = vcmp.eq.f32.partialorder %v5870_v46, inf  ;;  %vm1819_vm6 = vcmp.eq.f32.partialorder %v5870_v46, 0.0  ;;  %v1773_v51 = vsub.f32 %v7500_v25, %v5341_v43 }
  0xc6   : > { %v1110_v5 = vadd.f32 %v1102_v58, %v1054_v34  ;;  %v709_v33 = vrot.slane %v672_v59, %v5288_v2  ;;  %v757_v42 = vrot.slane %v672_v59, %v5295_v6  ;;  %v813_v47 = vrot.slane %v672_v59, %v5297_v7  ;;  %v492_v58 = vld [vmem:[%s5877_s6] sm:$0xff]  ;;  %7494 = vst [vmem:[#allocation63_spill] sm:$0xff] %v5919_v22 }
  0xc7   : > { %v869_v15 = vrot.slane %v672_v59, %v5300_v9  ;;  %v925_v12 = vrot.slane %v672_v59, %v5302_v10  ;;  %v981_v63 = vrot.slane %v672_v59, %v5304_v11  ;;  %v1037_v49 = vrot.slane %v672_v59, %v5313_v14 }
  0xc8   : > { %1278 = vmatpush1.msra.mxu0 %v1110_v5  ;;  %v720_v48 = vmul.f32 %v709_v33, %v5880_v31  ;;  %v768_v56 = vmul.f32 %v757_v42, %v5883_v21  ;;  %v824_v29 = vmul.f32 %v813_v47, %v5886_v18  ;;  %v1093_v8 = vrot.slane %v672_v59, %v5326_v23 }
  0xc9   : > { %4560 = vmatmul.mubr.msk.f32.vlgmr.msra.gmra.mrb[4].mxu0 %vm1116_vm12, %v5660_v62  ;;  %v880_v34 = vmul.f32 %v869_v15, %v5897_v45  ;;  %1437 = vmatprep.subr.mxu0 %v493_v32  ;;  %v1880_v59 = vsub.f32 1.0, %v1872_v53  ;;  %v1784_v5 = vadd.f32 %v1776_v30, %v1759_v40  ;;  %v936_v42 = vmul.f32 %v925_v12, %v5901_v1  ;;  %v7495_v12 = vld [vmem:[#allocation8_spill] sm:$0xff]  ;;  %v7499_v1 = vld [vmem:[#allocation13_spill] sm:$0xff] }
  0xca   : > { %v776_v54 = vadd.f32 %v768_v56, %v720_v48  ;;  %1347 = vmatprep.mubr.f32.mxu0 %v7473_v55  ;;  %v4734_v33 = vpop.eup %4733  ;;  %v992_v47 = vmul.f32 %v981_v63, %v5911_v24  ;;  %v1048_v18 = vmul.f32 %v1037_v49, %v5914_v50  ;;  %1438 = vmatpush1.msra.mxu0 %v492_v58  ;;  %v7498_v50 = vld [vmem:[#allocation12_spill] sm:$0xff] }
  0xcb   : > { %v1801_v48 = vmul.f32 %v1793_v16, %v1793_v16  ;;  %v1104_v15 = vmul.f32 %v1093_v8, %v5919_v22  ;;  %1591 = vmatprep.subr.mxu0 %v497_v35  ;;  %v5935_v53 = vmax.f32 %v1880_v59, 0.0  ;;  %v1762_v32 = vmul.f32 %v1754_v28, %v1754_v28  ;;  %v7496_v16 = vld [vmem:[#allocation9_spill] sm:$0xff]  ;;  %v5950_v28 = vld [vmem:[%s7318_s4 + $0x40] sm:$0xff] }
  0xcc   : > { %v832_v56 = vadd.f32 %v824_v29, %v776_v54  ;;  %v1837_v40 = vmul.f32 %v4734_v33, %v5859_v44  ;;  %v1771_v30 = vsub.f32 %v5311_v13, %v5341_v43  ;;  %v1796_v63 = vsub.f32 %v7495_v12, %v5378_v37  ;;  %v496_v54 = vld [vmem:[%s5877_s6 + $0x20] sm:$0xff] }
  0xcd   : > { %4561 = vmatmul.mubr.msk.f32.gmra.mrb[6].mxu0 %vm1116_vm12, %v5698_v38  ;;  %v1756_v49 = vsub.f32 %v7496_v16, %v5277_v60  ;;  %v1902_v8 = vrot.slane %v5935_v53, %v5288_v2  ;;  %v1942_v13 = vrot.slane %v5935_v53, %v5295_v6  ;;  %v1990_v58 = vrot.slane %v5935_v53, %v5297_v7  ;;  %v4736_v35 = vpop.eup %4735  ;;  %v7497_v16 = vld [vmem:[#allocation11_spill] sm:$0xff] }
  0xce   : > { %v888_v29 = vadd.f32 %v880_v34, %v832_v56  ;;  %1501 = vmatprep.mubr.f32.mxu0 %v7473_v55  ;;  %v2038_v34 = vrot.slane %v5935_v53, %v5300_v9  ;;  %v2086_v59 = vrot.slane %v5935_v53, %v5302_v10  ;;  %v2134_v33 = vrot.slane %v5935_v53, %v5304_v11 }
  0xcf   : > { %v5965_v56 = vadd.f32 %v1801_v48, %v1784_v5  ;;  %v1928_v22 = vmul.f32 %v1902_v8, %v7497_v16  ;;  %v1968_v24 = vmul.f32 %v1942_v13, %v7498_v50  ;;  %v2016_v45 = vmul.f32 %v1990_v58, %v7499_v1  ;;  %v5978_v5 = vld [vmem:[%s7318_s4 + $0x48] sm:$0xff]  ;;  %v7501_v1 = vld [vmem:[#allocation14_spill] sm:$0xff] }
  0xd0   : > { %v944_v12 = vadd.f32 %v936_v42, %v888_v29  ;;  %v1779_v41 = vmul.f32 %v1771_v30, %v1771_v30  ;;  %v1804_v21 = vmul.f32 %v1796_v63, %v1796_v63  ;;  %v1764_v31 = vmul.f32 %v1756_v49, %v1756_v49  ;;  %v7502_v30 = vld [vmem:[#allocation15_spill] sm:$0xff] }
  0xd1   : > { %4564 = vmatmul.mubr.msk.f32.vlgmr.msra.gmra.mrb[0].mxu0 %vm1116_vm12, %v5950_v28  ;;  %v1976_v50 = vadd.f32 %v1968_v24, %v1928_v22  ;;  %v2064_v42 = vmul.f32 %v2038_v34, %v7501_v1  ;;  %v1820_v48 = vand.u32 2147483648, %v5870_v46  ;;  %v2112_v63 = vmul.f32 %v2086_v59, %v7502_v30  ;;  %v7503_v24 = vld [vmem:[#allocation16_spill] sm:$0xff]  ;;  %v494_v34 = vld [vmem:[%s5877_s6 + $0x10] sm:$0xff] }
  0xd2   : > { %v1000_v4 = vadd.f32 %v992_v47, %v944_v12  ;;  %1592 = vmatpush1.msra.mxu0 %v496_v54  ;;  %1507 = vmatprep.mubr.f32.mxu0 %v7473_v55  ;;  %v2182_v25 = vrot.slane %v5935_v53, %v5313_v14  ;;  %v1839_v47 = vsel %vm1838_vm3, %v5859_v44, %v1837_v40  ;;  %4737 = vrsqrt.f32 %v5965_v56  ;;  %v499_v12 = vld [vmem:[%s5877_s6 + $0x38] sm:$0xff] }
  0xd3   : > { %v1816_v49 = vmul.f32 %v4736_v35, %v5870_v46  ;;  %v2024_v8 = vadd.f32 %v2016_v45, %v1976_v50  ;;  %v2160_v22 = vmul.f32 %v2134_v33, %v7503_v24  ;;  %v1842_v13 = vsel %vm1840_vm4, %v1841_v20, %v1839_v47 }
  0xd4   : > { %v1056_v29 = vadd.f32 %v1048_v18, %v1000_v4  ;;  %v2230_v58 = vrot.slane %v5935_v53, %v5326_v23  ;;  %v1874_v54 = vmul.f32 3.3333333, %v1842_v13  ;;  %v1787_v35 = vadd.f32 %v1779_v41, %v1762_v32  ;;  %v495_v18 = vld [vmem:[%s5877_s6 + $0x18] sm:$0xff] }
  0xd5   : > { %4565 = vmatmul.mubr.msk.f32.gmra.mrb[2].mxu0 %vm1116_vm12, %v5978_v5  ;;  %v1818_v40 = vsel %vm1817_vm5, %v5870_v46, %v1816_v49  ;;  %v2072_v45 = vadd.f32 %v2064_v42, %v2024_v8  ;;  %v1781_v20 = vmul.f32 %v1773_v51, %v1773_v51  ;;  %v7504_v46 = vld [vmem:[#allocation20_spill] sm:$0xff]  ;;  %v1834_v50 = vand.u32 2147483648, %v5965_v56  ;;  %v7505_v8 = vld [vmem:[#allocation17_spill] sm:$0xff] }
  0xd6   : > { %v1112_v4 = vadd.f32 %v1104_v15, %v1056_v29  ;;  %1655 = vmatprep.mubr.f32.mxu0 %v7473_v55  ;;  %v1821_v44 = vsel %vm1819_vm6, %v1820_v48, %v1818_v40  ;;  %v1882_v59 = vsub.f32 1.0, %v1874_v54  ;;  %v6005_v53 = vadd.f32 %v1804_v21, %v1787_v35  ;;  %v6042_v49 = vld [vmem:[%s5210_s9 + $0x20] sm:$0xff] }
  0xd7   : > { %v1871_v33 = vmul.f32 3.3333333, %v1821_v44  ;;  %v2120_v41 = vadd.f32 %v2112_v63, %v2072_v45  ;;  %v2208_v15 = vmul.f32 %v2182_v25, %v5470_v39  ;;  %v2256_v32 = vmul.f32 %v2230_v58, %v7504_v46  ;;  %v6020_v39 = vld [vmem:[%s5210_s9 + $0xb8] sm:$0xff]  ;;  %v6054_v40 = vld [vmem:[%s5210_s9 + $0x60] sm:$0xff]  ;;  %v7508_v44 = vld [vmem:[#allocation21_spill] sm:$0xff] }
  0xd8   : > { %1355 = vmatpush1.msra.mxu1 %v1112_v4  ;;  %v6012_v51 = vmax.f32 %v1882_v59, 0.0  ;;  %4739 = vrsqrt.f32 %v6005_v53  ;;  %v6017_v1 = vadd.f32 %v1781_v20, %v1764_v31  ;;  %vm1831_vm7 = vcmp.eq.f32.partialorder %v5965_v56, inf  ;;  %v7507_v58 = vld [vmem:[#allocation19_spill] sm:$0xff] }
  0xd9   : > { %4562 = vmatmul.mubr.msk.f32.vlgmr.msra.gmra.mrb[4].mxu1 %vm1116_vm12, %v5660_v62  ;;  %1514 = vmatprep.subr.mxu1 %v495_v18  ;;  %v1879_v16 = vsub.f32 1.0, %v1871_v33  ;;  %v2168_v21 = vadd.f32 %v2160_v22, %v2120_v41  ;;  %v1798_v62 = vsub.f32 %v6020_v39, %v5378_v37  ;;  %vm1833_vm8 = vcmp.eq.f32.partialorder %v5965_v56, 0.0  ;;  %v7506_v22 = vld [vmem:[#allocation18_spill] sm:$0xff] }
  0xda   : > { %1515 = vmatpush1.msra.mxu1 %v494_v34  ;;  %1424 = vmatprep.mubr.f32.mxu1 %v7473_v55  ;;  %v1910_v42 = vrot.slane %v6012_v51, %v5288_v2  ;;  %v1950_v48 = vrot.slane %v6012_v51, %v5295_v6  ;;  %v1998_v31 = vrot.slane %v6012_v51, %v5297_v7  ;;  %vm1852_vm9 = vcmp.eq.f32.partialorder %v6005_v53, inf  ;;  %v7509_v33 = vld [vmem:[#allocation22_spill] sm:$0xff] }
  0xdb   : > { %1668 = vmatprep.subr.mxu1 %v499_v12  ;;  %4568 = vmatmul.mubr.msk.f32.vlgmr.msra.gmra.mrb[4].mxu0 %vm1116_vm12, %v5950_v28  ;;  %v6032_v30 = vmax.f32 %v1879_v16, 0.0  ;;  %v2216_v63 = vadd.f32 %v2208_v15, %v2168_v21  ;;  %v2046_v25 = vrot.slane %v6012_v51, %v5300_v9  ;;  %v2094_v47 = vrot.slane %v6012_v51, %v5302_v10 }
  0xdc   : > { %1661 = vmatprep.mubr.f32.mxu0 %v7473_v55  ;;  %v6046_v29 = vsub.f32 %v6042_v49, %v5277_v60  ;;  %v1930_v24 = vmul.f32 %v1910_v42, %v7505_v8  ;;  %v1970_v13 = vmul.f32 %v1950_v48, %v7506_v22  ;;  %v2018_v54 = vmul.f32 %v1998_v31, %v7507_v58 }
  0xdd   : > { %4563 = vmatmul.mubr.msk.f32.gmra.mrb[6].mxu1 %vm1116_vm12, %v5698_v38  ;;  %v1770_v35 = vsub.f32 %v6054_v40, %v5341_v43  ;;  %v2264_v4 = vadd.f32 %v2256_v32, %v2216_v63  ;;  %v2142_v18 = vrot.slane %v6012_v51, %v5304_v11  ;;  %vm1854_vm10 = vcmp.eq.f32.partialorder %v6005_v53, 0.0  ;;  %v498_v38 = vld [vmem:[%s5877_s6 + $0x30] sm:$0xff]  ;;  %v4738_v32 = vpop.eup %4737 }
  0xde   : > { %1578 = vmatprep.mubr.f32.mxu1 %v7473_v55  ;;  %v1978_v45 = vadd.f32 %v1970_v13, %v1930_v24  ;;  %v2066_v20 = vmul.f32 %v2046_v25, %v7508_v44  ;;  %v2190_v34 = vrot.slane %v6012_v51, %v5313_v14  ;;  %v1898_v59 = vrot.slane %v6032_v30, %v5288_v2  ;;  %v7510_v63 = vld [vmem:[#allocation26_spill] sm:$0xff]  ;;  %v7511_v13 = vld [vmem:[#allocation23_spill] sm:$0xff]  ;;  %v7514_v44 = vld [vmem:[#allocation25_spill] sm:$0xff] }
  0xdf   : > { %4569 = vmatmul.mubr.msk.f32.gmra.mrb[6].mxu0 %vm1116_vm12, %v5978_v5  ;;  %2279 = vmatprep.subr.mxu0 %v2264_v4  ;;  %v2114_v12 = vmul.f32 %v2094_v47, %v7509_v33  ;;  %v1938_v41 = vrot.slane %v6032_v30, %v5295_v6  ;;  %v1986_v15 = vrot.slane %v6032_v30, %v5297_v7  ;;  %v1855_v47 = vand.u32 2147483648, %v6005_v53 }
  0xe0   : > { %v2034_v46 = vrot.slane %v6032_v30, %v5300_v9  ;;  %v2026_v16 = vadd.f32 %v2018_v54, %v1978_v45  ;;  %v2238_v21 = vrot.slane %v6012_v51, %v5326_v23  ;;  %v1927_v42 = vmul.f32 %v1898_v59, %v5523_v52  ;;  %v7512_v51 = vld [vmem:[#allocation24_spill] sm:$0xff]  ;;  %2343 = vmatprep.mubr.f32.mxu0 %v7473_v55 }
  0xe1   : > { %4566 = vmatmul.mubr.msk.f32.vlgmr.msra.gmra.mrb[0].mxu1 %vm1116_vm12, %v5950_v28  ;;  %v2082_v48 = vrot.slane %v6032_v30, %v5302_v10  ;;  %v1967_v31 = vmul.f32 %v1938_v41, %v5526_v61  ;;  %v2015_v25 = vmul.f32 %v1986_v15, %v7510_v63  ;;  %v1806_v8 = vmul.f32 %v1798_v62, %v1798_v62  ;;  %v7513_v61 = vld [vmem:[#allocation27_spill] sm:$0xff] }
  0xe2   : > { %1669 = vmatpush1.msra.mxu1 %v498_v38  ;;  %1584 = vmatprep.mubr.f32.mxu1 %v7473_v55  ;;  %v4740_v24 = vpop.eup %4739  ;;  %v2074_v22 = vadd.f32 %v2066_v20, %v2026_v16  ;;  %v2162_v58 = vmul.f32 %v2142_v18, %v7511_v13  ;;  %v2210_v54 = vmul.f32 %v2190_v34, %v7512_v51  ;;  %v7515_v34 = vld [vmem:[#allocation28_spill] sm:$0xff]  ;;  %v7516_v16 = vld [vmem:[#allocation29_spill] sm:$0xff]  ;;  %v6137_v51 = vstv %s6094_s11  ;;  %s7264_s11 = scalar_lea.vmem [#allocation6], %s4551_s10 }
  0xe3   : > { %v2130_v52 = vrot.slane %v6032_v30, %v5304_v11  ;;  %v1975_v4 = vadd.f32 %v1967_v31, %v1927_v42  ;;  %v2063_v38 = vmul.f32 %v2034_v46, %v7513_v61  ;;  %v1830_v45 = vmul.f32 %v4738_v32, %v5965_v56 }
  0xe4   : > { %v1851_v62 = vmul.f32 %v4740_v24, %v6005_v53  ;;  %v2122_v18 = vadd.f32 %v2114_v12, %v2074_v22  ;;  %v2258_v20 = vmul.f32 %v2238_v21, %v7514_v44  ;;  %v2111_v59 = vmul.f32 %v2082_v48, %v7515_v34  ;;  %v7517_v24 = vld [vmem:[#allocation30_spill] sm:$0xff] }
  0xe5   : > { %4567 = vmatmul.mubr.msk.f32.gmra.mrb[2].mxu1 %vm1116_vm12, %v5978_v5  ;;  %v2178_v33 = vrot.slane %v6032_v30, %v5313_v14  ;;  %v2023_v41 = vadd.f32 %v2015_v25, %v1975_v4  ;;  %v1832_v15 = vsel %vm1831_vm7, %v5965_v56, %v1830_v45  ;;  %v6113_v12 = vadd.f32 %v1806_v8, %v6017_v1  ;;  %v6148_v45 = vld [vmem:[%s5210_s9 + $0x30] sm:$0xff] }
  0xe6   : > { %1732 = vmatprep.mubr.f32.mxu1 %v7473_v55  ;;  %v1853_v46 = vsel %vm1852_vm9, %v6005_v53, %v1851_v62  ;;  %v2170_v32 = vadd.f32 %v2162_v58, %v2122_v18  ;;  %v2159_v21 = vmul.f32 %v2130_v52, %v7516_v16  ;;  %v1835_v42 = vsel %vm1833_vm8, %v1834_v50, %v1832_v15  ;;  %v6132_v58 = vld [vmem:[%s5210_s9 + $0xa0] sm:$0xff]  ;;  %v6153_v18 = vld [vmem:[%s5210_s9 + $0x70] sm:$0xff]  ;;  %v7520_v16 = vld [vmem:[#allocation33_spill] sm:$0xff] }
  0xe7   : > { %v1856_v48 = vsel %vm1854_vm10, %v1855_v47, %v1853_v46  ;;  %v2071_v31 = vadd.f32 %v2063_v38, %v2023_v41  ;;  %v2226_v63 = vrot.slane %v6032_v30, %v5326_v23  ;;  %v1873_v25 = vmul.f32 3.3333333, %v1835_v42  ;;  %v7519_v46 = vld [vmem:[#allocation32_spill] sm:$0xff]  ;;  %v7521_v42 = vld [vmem:[#allocation34_spill] sm:$0xff] }
  0xe8   : > { %v1876_v1 = vmul.f32 3.3333333, %v1856_v48  ;;  %v2218_v8 = vadd.f32 %v2210_v54, %v2170_v32  ;;  %v2207_v22 = vmul.f32 %v2178_v33, %v7517_v24  ;;  %v1761_v56 = vmul.f32 %v6046_v29, %v6046_v29  ;;  %v7518_v29 = vld [vmem:[#allocation31_spill] sm:$0xff] }
  0xe9   : > { %4570 = vmatmul.mubr.msk.f32.vlgmr.msra.gmra.mrb[4].mxu1 %vm1116_vm12, %v5950_v28  ;;  %v1778_v50 = vmul.f32 %v1770_v35, %v1770_v35  ;;  %v2119_v53 = vadd.f32 %v2111_v59, %v2071_v31  ;;  %v1881_v47 = vsub.f32 1.0, %v1873_v25  ;;  %4741 = vrsqrt.f32 %v6113_v12  ;;  %v6178_v31 = vld [vmem:[%s7318_s4 + $0x10] sm:$0xff] }
  0xea   : > { %1738 = vmatprep.mubr.f32.mxu1 %v7473_v55  ;;  %v1884_v13 = vsub.f32 1.0, %v1876_v1  ;;  %v2266_v30 = vadd.f32 %v2258_v20, %v2218_v8  ;;  %v1795_v28 = vsub.f32 %v6132_v58, %v5378_v37  ;;  %v2255_v35 = vmul.f32 %v2226_v63, %v7518_v29  ;;  %v6183_v8 = vld [vmem:[%s5210_s9 + $0xb0] sm:$0xff] }
  0xeb   : > { %v2167_v54 = vadd.f32 %v2159_v21, %v2119_v53  ;;  %v6140_v52 = vmax.f32 %v1881_v47, 0.0  ;;  %v1869_v4 = vand.u32 2147483648, %v6113_v12  ;;  %v1786_v38 = vadd.f32 %v1778_v50, %v1761_v56  ;;  %v7522_v56 = vld [vmem:[#allocation35_spill] sm:$0xff] }
  0xec   : > { %2356 = vmatprep.subr.mxu1 %v2266_v30  ;;  %v6145_v61 = vmax.f32 %v1884_v13, 0.0  ;;  %v1755_v62 = vsub.f32 %v6148_v45, %v5277_v60  ;;  %v1772_v44 = vsub.f32 %v6153_v18, %v5341_v43  ;;  %vm1866_vm11 = vcmp.eq.f32.partialorder %v6113_v12, inf  ;;  %v7523_v30 = vld [vmem:[#allocation38_spill] sm:$0xff] }
  0xed   : > { %4571 = vmatmul.mubr.msk.f32.gmra.mrb[6].mxu1 %vm1116_vm12, %v5978_v5  ;;  %v2215_v20 = vadd.f32 %v2207_v22, %v2167_v54  ;;  %v1906_v34 = vrot.slane %v6140_v52, %v5288_v2  ;;  %v1946_v5 = vrot.slane %v6140_v52, %v5295_v6  ;;  %v1994_v59 = vrot.slane %v6140_v52, %v5297_v7 }
  0xee   : > { %2420 = vmatprep.mubr.f32.mxu1 %v7473_v55  ;;  %v2042_v60 = vrot.slane %v6140_v52, %v5300_v9  ;;  %v2090_v43 = vrot.slane %v6140_v52, %v5302_v10  ;;  %v2138_v33 = vrot.slane %v6140_v52, %v5304_v11  ;;  %vm1868_vm13 = vcmp.eq.f32.partialorder %v6113_v12, 0.0 }
  0xef   : > { %v1803_v41 = vmul.f32 %v1795_v28, %v1795_v28  ;;  %v2263_v15 = vadd.f32 %v2255_v35, %v2215_v20  ;;  %v1929_v32 = vmul.f32 %v1906_v34, %v7519_v46  ;;  %v1969_v21 = vmul.f32 %v1946_v5, %v7520_v16  ;;  %v7525_v20 = vld [vmem:[#allocation37_spill] sm:$0xff]  ;;  %v6210_v5 = vld [vmem:[%s7318_s4 + $0x18] sm:$0xff] }
  0xf0   : > { %v2017_v48 = vmul.f32 %v1994_v59, %v7521_v42  ;;  %v2186_v63 = vrot.slane %v6140_v52, %v5313_v14  ;;  %v1763_v25 = vmul.f32 %v1755_v62, %v1755_v62  ;;  %v1780_v1 = vmul.f32 %v1772_v44, %v1772_v44  ;;  %v7524_v62 = vld [vmem:[#allocation36_spill] sm:$0xff]  ;;  %v7526_v59 = vld [vmem:[#allocation39_spill] sm:$0xff] }
  0xf1   : > { %v1797_v24 = vsub.f32 %v6183_v8, %v5378_v37  ;;  %2280 = vmatpush1.msra.mxu0 %v2263_v15  ;;  %v1977_v22 = vadd.f32 %v1969_v21, %v1929_v32  ;;  %v2065_v50 = vmul.f32 %v2042_v60, %v7522_v56  ;;  %v1918_v53 = vrot.slane %v6145_v61, %v5288_v2  ;;  %v7528_v21 = vld [vmem:[#allocation42_spill] sm:$0xff] }
  0xf2   : > { %v1958_v47 = vrot.slane %v6145_v61, %v5295_v6  ;;  %v2113_v13 = vmul.f32 %v2090_v43, %v5630_v0  ;;  %v2161_v28 = vmul.f32 %v2138_v33, %v7523_v30  ;;  %4575 = vmatmul.mubr.msk.f32.vlgmr.msra.gmra.mrb[0].mxu0 %vm1116_vm12, %v6178_v31  ;;  %v2006_v37 = vrot.slane %v6145_v61, %v5297_v7  ;;  %v7527_v33 = vld [vmem:[#allocation40_spill] sm:$0xff] }
  0xf3   : > { %v2054_v54 = vrot.slane %v6145_v61, %v5300_v9  ;;  %v4742_v29 = vpop.eup %4741  ;;  %v2025_v35 = vadd.f32 %v2017_v48, %v1977_v22  ;;  %v1932_v44 = vmul.f32 %v1918_v53, %v7524_v62  ;;  %v2102_v0 = vrot.slane %v6145_v61, %v5302_v10  ;;  %2349 = vmatprep.mubr.f32.mxu0 %v7473_v55 }
  0xf4   : > { %v1972_v34 = vmul.f32 %v1958_v47, %v7525_v20  ;;  %v2209_v60 = vmul.f32 %v2186_v63, %v7526_v59  ;;  %v2234_v43 = vrot.slane %v6140_v52, %v5326_v23  ;;  %v2020_v15 = vmul.f32 %v2006_v37, %v7527_v33  ;;  %v6249_v20 = vld [vmem:[%s5210_s9 + $0x8] sm:$0xff] }
  0xf5   : > { %v2150_v46 = vrot.slane %v6145_v61, %v5304_v11  ;;  %v2073_v32 = vadd.f32 %v2065_v50, %v2025_v35  ;;  %v2068_v42 = vmul.f32 %v2054_v54, %v7528_v21  ;;  %v2198_v48 = vrot.slane %v6145_v61, %v5313_v14  ;;  %v7529_v50 = vld [vmem:[#allocation43_spill] sm:$0xff]  ;;  %v7530_v54 = vld [vmem:[#allocation41_spill] sm:$0xff] }
  0xf6   : > { %v1980_v16 = vadd.f32 %v1972_v34, %v1932_v44  ;;  %v1865_v63 = vmul.f32 %v4742_v29, %v6113_v12  ;;  %v6224_v22 = vadd.f32 %v1803_v41, %v1786_v38  ;;  %v1788_v52 = vadd.f32 %v1780_v1, %v1763_v25  ;;  %4576 = vmatmul.mubr.msk.f32.gmra.mrb[2].mxu0 %vm1116_vm12, %v6210_v5 }
  0xf7   : > { %v1805_v56 = vmul.f32 %v1797_v24, %v1797_v24  ;;  %v2121_v53 = vadd.f32 %v2113_v13, %v2073_v32  ;;  %v2116_v30 = vmul.f32 %v2102_v0, %v7529_v50  ;;  %v2246_v37 = vrot.slane %v6145_v61, %v5326_v23  ;;  %2497 = vmatprep.mubr.f32.mxu0 %v7473_v55  ;;  %v7531_v24 = vld [vmem:[#allocation44_spill] sm:$0xff]  ;;  %v6270_v32 = vld [vmem:[%s5210_s9 + $0x18] sm:$0xff] }
  0xf8   : > { %v2028_v47 = vadd.f32 %v2020_v15, %v1980_v16  ;;  %v2257_v35 = vmul.f32 %v2234_v43, %v7530_v54  ;;  %v1867_v38 = vsel %vm1866_vm11, %v6113_v12, %v1865_v63  ;;  %4743 = vrsqrt.f32 %v6224_v22  ;;  %v6255_v43 = vld [vmem:[%s5210_s9 + $0x48] sm:$0xff] }
  0xf9   : > { %v6238_v41 = vstv %s6187_s14  ;;  %v2169_v25 = vadd.f32 %v2161_v28, %v2121_v53  ;;  %v2164_v13 = vmul.f32 %v2150_v46, %v7531_v24  ;;  %v1870_v61 = vsel %vm1868_vm13, %v1869_v4, %v1867_v38  ;;  %v6301_v38 = vld [vmem:[%s5210_s9 + $0x98] sm:$0xff]  ;;  %s4392_s14 = scalar_lea.vmem (%p7656_p5), %s7319_s5, %s4612_s26 }
  0xfa   : > { %v2076_v1 = vadd.f32 %v2068_v42, %v2028_v47  ;;  %v2212_v29 = vmul.f32 %v2198_v48, %v5715_v36  ;;  %v1878_v62 = vmul.f32 3.3333333, %v1870_v61  ;;  %v6246_v44 = vadd.f32 %v1805_v56, %v1788_v52  ;;  %v6276_v48 = vld [vmem:[%s5210_s9 + $0x88] sm:$0xff]  ;;  %v6281_v52 = vld [vmem:[%s5210_s9 + $0x58] sm:$0xff]  ;;  %7532 = vst [vmem:[#allocation8_spill] sm:$0xff] %v6301_v38 }
  0xfb   : > { %v2608_v34 = vsub.f32 %v6249_v20, %v6137_v51  ;;  %v2217_v28 = vadd.f32 %v2209_v60, %v2169_v25  ;;  %v2260_v59 = vmul.f32 %v2246_v37, %v5732_v26  ;;  %v2625_v12 = vsub.f32 %v6255_v43, %v6238_v41 }
  0xfc   : > { %v2124_v0 = vadd.f32 %v2116_v30, %v2076_v1  ;;  %v1886_v4 = vsub.f32 1.0, %v1878_v62  ;;  %vm1845_vm14 = vcmp.eq.f32.partialorder %v6224_v22, inf  ;;  %4745 = vrsqrt.f32 %v6246_v44 }
  0xfd   : > { %v6262_v36 = vstv %s6218_s17  ;;  %v2265_v33 = vadd.f32 %v2257_v35, %v2217_v28  ;;  %vm1847_vm15 = vcmp.eq.f32.partialorder %v6224_v22, 0.0  ;;  %v1848_v26 = vand.u32 2147483648, %v6224_v22 }
  0xfe   : > { %v2172_v60 = vadd.f32 %v2164_v13, %v2124_v0  ;;  %v6266_v15 = vmax.f32 %v1886_v4, 0.0  ;;  %vm1859_vm0 = vcmp.eq.f32.partialorder %v6246_v44, inf  ;;  %v2616_v46 = vmul.f32 %v2608_v34, %v2608_v34  ;;  %v7533_v13 = vld [vmem:[#allocation45_spill] sm:$0xff] }
  0xff   : > { %v2610_v16 = vsub.f32 %v6270_v32, %v6137_v51  ;;  %2357 = vmatpush1.msra.mxu1 %v2265_v33  ;;  %vm1861_vm1 = vcmp.eq.f32.partialorder %v6246_v44, 0.0  ;;  %v2633_v42 = vmul.f32 %v2625_v12, %v2625_v12  ;;  %v2650_v63 = vsub.f32 %v6276_v48, %v6262_v36  ;;  %v6313_v12 = vld [vmem:[%s5210_s9] sm:$0xff] }
 0x100   : > { %v2220_v21 = vadd.f32 %v2212_v29, %v2172_v60  ;;  %v2627_v56 = vsub.f32 %v6281_v52, %v6238_v41  ;;  %4577 = vmatmul.mubr.msk.f32.vlgmr.msra.gmra.mrb[0].mxu1 %vm1116_vm12, %v6178_v31  ;;  %v1926_v53 = vrot.slane %v6266_v15, %v5288_v2  ;;  %v1966_v47 = vrot.slane %v6266_v15, %v5295_v6  ;;  %v7534_v29 = vld [vmem:[#allocation46_spill] sm:$0xff] }
 0x101   : > { %v2014_v50 = vrot.slane %v6266_v15, %v5297_v7  ;;  %v2062_v30 = vrot.slane %v6266_v15, %v5300_v9  ;;  %v2110_v54 = vrot.slane %v6266_v15, %v5302_v10  ;;  %v2158_v35 = vrot.slane %v6266_v15, %v5304_v11  ;;  %2426 = vmatprep.mubr.f32.mxu1 %v7473_v55 }
 0x102   : > { %v2268_v37 = vadd.f32 %v2260_v59, %v2220_v21  ;;  %v2652_v25 = vsub.f32 %v6301_v38, %v6262_v36  ;;  %v4744_v1 = vpop.eup %4743  ;;  %v1934_v24 = vmul.f32 %v1926_v53, %v5702_v27  ;;  %v1974_v61 = vmul.f32 %v1966_v47, %v7533_v13  ;;  %7535 = vst [vmem:[#allocation9_spill] sm:$0xff] %v6313_v12 }
 0x103   : > { %v2022_v62 = vmul.f32 %v2014_v50, %v7534_v29  ;;  %v1862_v34 = vand.u32 2147483648, %v6246_v44  ;;  %v2070_v28 = vmul.f32 %v2062_v30, %v5721_v19  ;;  %v2206_v0 = vrot.slane %v6266_v15, %v5313_v14 }
 0x104   : > { %2433 = vmatprep.subr.mxu0 %v2268_v37  ;;  %v2618_v59 = vmul.f32 %v2610_v16, %v2610_v16  ;;  %v2607_v4 = vsub.f32 %v6313_v12, %v6137_v51  ;;  %v1982_v27 = vadd.f32 %v1974_v61, %v1934_v24  ;;  %v1844_v33 = vmul.f32 %v4744_v1, %v6224_v22  ;;  %v6329_v24 = vld [vmem:[%s5210_s9 + $0x40] sm:$0xff] }
 0x105   : > { %4578 = vmatmul.mubr.msk.f32.gmra.mrb[2].mxu1 %vm1116_vm12, %v6210_v5  ;;  %v2641_v60 = vadd.f32 %v2633_v42, %v2616_v46  ;;  %v2658_v21 = vmul.f32 %v2650_v63, %v2650_v63  ;;  %v2118_v19 = vmul.f32 %v2110_v54, %v5742_v57  ;;  %v2166_v53 = vmul.f32 %v2158_v35, %v5745_v3  ;;  %v6346_v61 = vld [vmem:[%s5210_s9 + $0x80] sm:$0xff] }
 0x106   : > { %2574 = vmatprep.mubr.f32.mxu1 %v7473_v55  ;;  %v2635_v16 = vmul.f32 %v2627_v56, %v2627_v56  ;;  %v2660_v47 = vmul.f32 %v2652_v25, %v2652_v25  ;;  %v4746_v50 = vpop.eup %4745  ;;  %v2030_v30 = vadd.f32 %v2022_v62, %v1982_v27  ;;  %v1846_v37 = vsel %vm1845_vm14, %v6224_v22, %v1844_v33 }
 0x107   : > { %v6326_v1 = vadd.f32 %v2658_v21, %v2641_v60  ;;  %7536 = vst [vmem:[#allocation11_spill] sm:$0xff] %v6329_v24  ;;  %v2624_v57 = vsub.f32 %v6329_v24, %v6238_v41  ;;  %v2214_v3 = vmul.f32 %v2206_v0, %v5748_v17  ;;  %v1849_v46 = vsel %vm1847_vm15, %v1848_v26, %v1846_v37 }
 0x108   : > { %v1858_v42 = vmul.f32 %v4746_v50, %v6246_v44  ;;  %v2643_v63 = vadd.f32 %v2635_v16, %v2618_v59  ;;  %v2078_v56 = vadd.f32 %v2070_v28, %v2030_v30  ;;  %v2254_v54 = vrot.slane %v6266_v15, %v5326_v23  ;;  %7537 = vst [vmem:[#allocation12_spill] sm:$0xff] %v6346_v61  ;;  %v7538_v59 = vld [vmem:[#allocation47_spill] sm:$0xff] }
 0x109   : > { %v1875_v35 = vmul.f32 3.3333333, %v1849_v46  ;;  %4747 = vrsqrt.f32 %v6326_v1  ;;  %v2615_v17 = vmul.f32 %v2607_v4, %v2607_v4  ;;  %v2649_v22 = vsub.f32 %v6346_v61, %v6262_v36 }
 0x10a   : > { %v1860_v25 = vsel %vm1859_vm0, %v6246_v44, %v1858_v42  ;;  %v6343_v13 = vadd.f32 %v2660_v47, %v2643_v63  ;;  %v2126_v26 = vadd.f32 %v2118_v19, %v2078_v56  ;;  %v2632_v62 = vmul.f32 %v2624_v57, %v2624_v57  ;;  %v7540_v42 = vld [vmem:[#allocation49_spill] sm:$0xff]  ;;  %v7541_v56 = vld [vmem:[#allocation50_spill] sm:$0xff] }
 0x10b   : > { %v1883_v29 = vsub.f32 1.0, %v1875_v35  ;;  %v1863_v15 = vsel %vm1861_vm1, %v1862_v34, %v1860_v25  ;;  %v2262_v27 = vmul.f32 %v2254_v54, %v7538_v59  ;;  %v2685_v4 = vand.u32 2147483648, %v6326_v1  ;;  %v6371_v25 = vld [vmem:[%s5210_s9 + $0x10] sm:$0xff]  ;;  %v7545_v59 = vld [vmem:[#allocation52_spill] sm:$0xff] }
 0x10c   : > { %v1877_v28 = vmul.f32 3.3333333, %v1863_v15  ;;  %v2174_v0 = vadd.f32 %v2166_v53, %v2126_v26  ;;  %4749 = vrsqrt.f32 %v6343_v13  ;;  %v2640_v21 = vadd.f32 %v2632_v62, %v2615_v17  ;;  %7542 = vst [vmem:[#allocation13_spill] sm:$0xff] %v6371_v25 }
 0x10d   : > { %v1891_v33 = vmax.f32 %v1883_v29, 0.0  ;;  %v2657_v16 = vmul.f32 %v2649_v22, %v2649_v22  ;;  %vm2682_vm2 = vcmp.eq.f32.partialorder %v6326_v1, inf  ;;  %vm2684_vm3 = vcmp.eq.f32.partialorder %v6326_v1, 0.0  ;;  %v7543_v29 = vld [vmem:[#allocation51_spill] sm:$0xff] }
 0x10e   : > { %v1885_v60 = vsub.f32 1.0, %v1877_v28  ;;  %v2222_v47 = vadd.f32 %v2214_v3, %v2174_v0  ;;  %v7539_v3 = vld [vmem:[#allocation48_spill] sm:$0xff]  ;;  %vm2696_vm4 = vcmp.eq.f32.partialorder %v6343_v13, inf  ;;  %vm2698_vm5 = vcmp.eq.f32.partialorder %v6343_v13, 0.0  ;;  %v6377_v28 = vld [vmem:[%s5210_s9 + $0x50] sm:$0xff] }
 0x10f   : > { %v1914_v19 = vrot.slane %v1891_v33, %v5288_v2  ;;  %v1954_v44 = vrot.slane %v1891_v33, %v5295_v6  ;;  %v2002_v34 = vrot.slane %v1891_v33, %v5297_v7  ;;  %v2050_v53 = vrot.slane %v1891_v33, %v5300_v9  ;;  %7544 = vst [vmem:[#allocation10_spill] sm:$0xff] %v6377_v28 }
 0x110   : > { %v2098_v50 = vrot.slane %v1891_v33, %v5302_v10  ;;  %v2146_v30 = vrot.slane %v1891_v33, %v5304_v11  ;;  %v2194_v37 = vrot.slane %v1891_v33, %v5313_v14  ;;  %v2270_v57 = vadd.f32 %v2262_v27, %v2222_v47  ;;  %v7546_v47 = vld [vmem:[#allocation53_spill] sm:$0xff] }
 0x111   : > { %v1931_v46 = vmul.f32 %v1914_v19, %v7539_v3  ;;  %v1971_v63 = vmul.f32 %v1954_v44, %v7540_v42  ;;  %v2019_v54 = vmul.f32 %v2002_v34, %v7541_v56  ;;  %v2699_v35 = vand.u32 2147483648, %v6343_v13  ;;  %v7547_v44 = vld [vmem:[#allocation54_spill] sm:$0xff] }
 0x112   : > { %v2609_v17 = vsub.f32 %v6371_v25, %v6137_v51  ;;  %2510 = vmatprep.subr.mxu1 %v2270_v57  ;;  %v2067_v15 = vmul.f32 %v2050_v53, %v7543_v29  ;;  %v1893_v62 = vmax.f32 %v1885_v60, 0.0  ;;  %v2626_v0 = vsub.f32 %v6377_v28, %v6238_v41  ;;  %v7548_v29 = vld [vmem:[#allocation56_spill] sm:$0xff]  ;;  %v7551_v28 = vld [vmem:[#allocation58_spill] sm:$0xff] }
 0x113   : > { %v4748_v22 = vpop.eup %4747  ;;  %v1979_v26 = vadd.f32 %v1971_v63, %v1931_v46  ;;  %v2115_v27 = vmul.f32 %v2098_v50, %v7545_v59  ;;  %v2163_v19 = vmul.f32 %v2146_v30, %v7546_v47  ;;  %v2211_v34 = vmul.f32 %v2194_v37, %v7547_v44  ;;  %v7550_v47 = vld [vmem:[#allocation55_spill] sm:$0xff]  ;;  %v6398_v25 = vld [vmem:[%s5210_s9 + $0x90] sm:$0xff] }
 0x114   : > { %v2242_v3 = vrot.slane %v1891_v33, %v5326_v23  ;;  %v1922_v57 = vrot.slane %v1893_v62, %v5288_v2  ;;  %v1962_v53 = vrot.slane %v1893_v62, %v5295_v6  ;;  %v6387_v60 = vadd.f32 %v2657_v16, %v2640_v21 }
 0x115   : > { %v2027_v42 = vadd.f32 %v2019_v54, %v1979_v26  ;;  %v2010_v46 = vrot.slane %v1893_v62, %v5297_v7  ;;  %v2058_v63 = vrot.slane %v1893_v62, %v5300_v9  ;;  %v2106_v50 = vrot.slane %v1893_v62, %v5302_v10  ;;  %v7549_v54 = vld [vmem:[#allocation57_spill] sm:$0xff] }
 0x116   : > { %v2681_v30 = vmul.f32 %v4748_v22, %v6326_v1  ;;  %v4750_v56 = vpop.eup %4749  ;;  %v1933_v33 = vmul.f32 %v1922_v57, %v7548_v29  ;;  %v1973_v26 = vmul.f32 %v1962_v53, %v7549_v54  ;;  %v2617_v59 = vmul.f32 %v2609_v17, %v2609_v17  ;;  %v7552_v22 = vld [vmem:[#allocation59_spill] sm:$0xff] }
 0x117   : > { %v2075_v37 = vadd.f32 %v2067_v15, %v2027_v42  ;;  %v2259_v44 = vmul.f32 %v2242_v3, %v7550_v47  ;;  %v2021_v21 = vmul.f32 %v2010_v46, %v7551_v28  ;;  %v2634_v16 = vmul.f32 %v2626_v0, %v2626_v0  ;;  %v7553_v42 = vld [vmem:[#allocation60_spill] sm:$0xff]  ;;  %v7556_v47 = vld [vmem:[#allocation63_spill] sm:$0xff] }
 0x118   : > { %v2651_v61 = vsub.f32 %v6398_v25, %v6262_v36  ;;  %v1981_v12 = vadd.f32 %v1973_v26, %v1933_v33  ;;  %v2069_v38 = vmul.f32 %v2058_v63, %v7552_v22  ;;  %v2154_v15 = vrot.slane %v1893_v62, %v5304_v11 }
 0x119   : > { %v2123_v24 = vadd.f32 %v2115_v27, %v2075_v37  ;;  %v2117_v57 = vmul.f32 %v2106_v50, %v7553_v42  ;;  %v2202_v17 = vrot.slane %v1893_v62, %v5313_v14  ;;  %v2683_v28 = vsel %vm2682_vm2, %v6326_v1, %v2681_v30  ;;  %v7554_v30 = vld [vmem:[#allocation61_spill] sm:$0xff]  ;;  %v7555_v1 = vld [vmem:[#allocation62_spill] sm:$0xff] }
 0x11a   : > { %v2695_v0 = vmul.f32 %v4750_v56, %v6343_v13  ;;  %v2029_v53 = vadd.f32 %v2021_v21, %v1981_v12  ;;  %v2686_v27 = vsel %vm2684_vm3, %v2685_v4, %v2683_v28  ;;  %4751 = vrsqrt.f32 %v6387_v60 }
 0x11b   : > { %v2171_v3 = vadd.f32 %v2163_v19, %v2123_v24  ;;  %v2250_v46 = vrot.slane %v1893_v62, %v5326_v23  ;;  %v2730_v63 = vmul.f32 3.3333333, %v2686_v27  ;;  %v2165_v33 = vmul.f32 %v2154_v15, %v7554_v30  ;;  %v6430_v15 = vld [vmem:[%s5210_s9 + $0x68] sm:$0xff] }
 0x11c   : > { %v2697_v50 = vsel %vm2696_vm4, %v6343_v13, %v2695_v0  ;;  %v2077_v29 = vadd.f32 %v2069_v38, %v2029_v53  ;;  %v2213_v24 = vmul.f32 %v2202_v17, %v7555_v1  ;;  %v2642_v54 = vadd.f32 %v2634_v16, %v2617_v59  ;;  %v6425_v38 = vld [vmem:[%s5210_s9 + $0x28] sm:$0xff] }
 0x11d   : > { %v2219_v37 = vadd.f32 %v2211_v34, %v2171_v3  ;;  %v2700_v12 = vsel %vm2698_vm5, %v2699_v35, %v2697_v50  ;;  %v2738_v4 = vsub.f32 1.0, %v2730_v63  ;;  %v2659_v26 = vmul.f32 %v2651_v61, %v2651_v61  ;;  %v6435_v59 = vld [vmem:[%s5210_s9 + $0xa8] sm:$0xff] }
 0x11e   : > { %v2732_v19 = vmul.f32 3.3333333, %v2700_v12  ;;  %v2125_v56 = vadd.f32 %v2117_v57, %v2077_v29  ;;  %v2261_v21 = vmul.f32 %v2250_v46, %v7556_v47  ;;  %v2612_v13 = vsub.f32 %v6425_v38, %v6137_v51  ;;  %v6458_v27 = vld [vmem:[%s5208_s8 + $0x8] sm:$0xff] }
 0x11f   : > { %v2267_v62 = vadd.f32 %v2259_v44, %v2219_v37  ;;  %v6422_v22 = vmax.f32 %v2738_v4, 0.0  ;;  %v2629_v44 = vsub.f32 %v6430_v15, %v6238_v41  ;;  %v2654_v61 = vsub.f32 %v6435_v59, %v6262_v36  ;;  %v6462_v63 = vld [vmem:[%s5208_s8 + $0x48] sm:$0xff]  ;;  %v6470_v4 = vld [vmem:[%s5210_s9 + $0x38] sm:$0xff] }
 0x120   : > { %v2173_v35 = vadd.f32 %v2165_v33, %v2125_v56  ;;  %v2740_v34 = vsub.f32 1.0, %v2732_v19  ;;  %vm2675_vm6 = vcmp.eq.f32.partialorder %v6387_v60, inf  ;;  %vm2677_vm7 = vcmp.eq.f32.partialorder %v6387_v60, 0.0  ;;  %v6466_v37 = vld [vmem:[%s5208_s8 + $0x88] sm:$0xff]  ;;  %7557 = vst [vmem:[#allocation14_spill] sm:$0xff] %v6470_v4 }
 0x121   : > { %2434 = vmatpush1.msra.mxu0 %v2267_v62  ;;  %v2760_v16 = vrot.slane %v6422_v22, %v5288_v2  ;;  %v2800_v42 = vrot.slane %v6422_v22, %v5295_v6  ;;  %v2848_v57 = vrot.slane %v6422_v22, %v5297_v7  ;;  %v2896_v17 = vrot.slane %v6422_v22, %v5300_v9  ;;  %v6475_v56 = vld [vmem:[%s5208_s8 + $0xc8] sm:$0xff] }
 0x122   : > { %4579 = vmatmul.mubr.msk.f32.vlgmr.msra.gmra.mrb[4].mxu0 %vm1116_vm12, %v6178_v31  ;;  %v2221_v28 = vadd.f32 %v2213_v24, %v2173_v35  ;;  %v2944_v0 = vrot.slane %v6422_v22, %v5302_v10  ;;  %v6454_v53 = vadd.f32 %v2659_v26, %v2642_v54  ;;  %v2620_v30 = vmul.f32 %v2612_v13, %v2612_v13 }
 0x123   : > { %2503 = vmatprep.mubr.f32.mxu0 %v7473_v55  ;;  %v2786_v46 = vmul.f32 %v6458_v27, %v2760_v16  ;;  %v2826_v50 = vmul.f32 %v6462_v63, %v2800_v42  ;;  %v2874_v29 = vmul.f32 %v6466_v37, %v2848_v57  ;;  %v2637_v1 = vmul.f32 %v2629_v44, %v2629_v44 }
 0x124   : > { %v4752_v33 = vpop.eup %4751  ;;  %v2269_v12 = vadd.f32 %v2261_v21, %v2221_v28  ;;  %v2662_v24 = vmul.f32 %v2654_v61, %v2654_v61  ;;  %v2614_v19 = vsub.f32 %v6470_v4, %v6137_v51  ;;  %v2922_v54 = vmul.f32 %v6475_v56, %v2896_v17  ;;  %v6485_v21 = vld [vmem:[%s5208_s8 + $0x108] sm:$0xff]  ;;  %v6537_v4 = vld [vmem:[%s5208_s8 + $0xd8] sm:$0xff] }
 0x125   : > { %v2834_v62 = vadd.f32 %v2826_v50, %v2786_v46  ;;  %v2992_v26 = vrot.slane %v6422_v22, %v5304_v11  ;;  %v6480_v47 = vmax.f32 %v2740_v34, 0.0  ;;  %7558 = vst [vmem:[#allocation15_spill] sm:$0xff] %v6485_v21  ;;  %v2970_v13 = vmul.f32 %v6485_v21, %v2944_v0  ;;  %v6511_v0 = vld [vmem:[%s5208_s8 + $0x148] sm:$0xff]  ;;  %v6515_v50 = vld [vmem:[%s5208_s8 + $0x18] sm:$0xff]  ;;  %7563 = vst [vmem:[#allocation19_spill] sm:$0xff] %v6537_v4 }
 0x126   : > { %4580 = vmatmul.mubr.msk.f32.gmra.mrb[6].mxu0 %vm1116_vm12, %v6210_v5  ;;  %2511 = vmatpush1.msra.mxu1 %v2269_v12  ;;  %v3040_v35 = vrot.slane %v6422_v22, %v5313_v14  ;;  %v3088_v44 = vrot.slane %v6422_v22, %v5326_v23  ;;  %4753 = vrsqrt.f32 %v6454_v53  ;;  %v2674_v22 = vmul.f32 %v4752_v33, %v6387_v60  ;;  %v6519_v33 = vld [vmem:[%s5208_s8 + $0x58] sm:$0xff] }
 0x127   : > { %3201 = vmatprep.mubr.f32.mxu0 %v7473_v55  ;;  %4581 = vmatmul.mubr.msk.f32.vlgmr.msra.gmra.mrb[4].mxu1 %vm1116_vm12, %v6178_v31  ;;  %v2882_v34 = vadd.f32 %v2874_v29, %v2834_v62  ;;  %v2768_v61 = vrot.slane %v6480_v47, %v5288_v2  ;;  %v2808_v16 = vrot.slane %v6480_v47, %v5295_v6  ;;  %v6523_v62 = vld [vmem:[%s5208_s8 + $0x188] sm:$0xff]  ;;  %vm2689_vm8 = vcmp.eq.f32.partialorder %v6454_v53, inf }
 0x128   : > { %v2856_v42 = vrot.slane %v6480_v47, %v5297_v7  ;;  %v2904_v57 = vrot.slane %v6480_v47, %v5300_v9  ;;  %v2952_v31 = vrot.slane %v6480_v47, %v5302_v10  ;;  %v3000_v17 = vrot.slane %v6480_v47, %v5304_v11  ;;  %2580 = vmatprep.mubr.f32.mxu1 %v7473_v55 }
 0x129   : > { %v2930_v28 = vadd.f32 %v2922_v54, %v2882_v34  ;;  %7559 = vst [vmem:[#allocation16_spill] sm:$0xff] %v6511_v0  ;;  %v3018_v46 = vmul.f32 %v6511_v0, %v2992_v26  ;;  %7560 = vst [vmem:[#allocation20_spill] sm:$0xff] %v6515_v50  ;;  %v2788_v29 = vmul.f32 %v6515_v50, %v2768_v61  ;;  %v6527_v54 = vld [vmem:[%s5208_s8 + $0x1c8] sm:$0xff]  ;;  %v6531_v26 = vld [vmem:[%s5208_s8 + $0x98] sm:$0xff]  ;;  %vm2691_vm9 = vcmp.eq.f32.partialorder %v6454_v53, 0.0 }
 0x12a   : > { %7561 = vst [vmem:[#allocation17_spill] sm:$0xff] %v6519_v33  ;;  %v2828_v12 = vmul.f32 %v6519_v33, %v2808_v16  ;;  %v3066_v3 = vmul.f32 %v6523_v62, %v3040_v35  ;;  %v3114_v34 = vmul.f32 %v6527_v54, %v3088_v44  ;;  %7562 = vst [vmem:[#allocation18_spill] sm:$0xff] %v6531_v26  ;;  %v6541_v33 = vld [vmem:[%s5208_s8 + $0x118] sm:$0xff] }
 0x12b   : > { %v2876_v0 = vmul.f32 %v6531_v26, %v2856_v42  ;;  %v3048_v61 = vrot.slane %v6480_v47, %v5313_v14  ;;  %v2978_v50 = vadd.f32 %v2970_v13, %v2930_v28  ;;  %v2924_v16 = vmul.f32 %v6537_v4, %v2904_v57  ;;  %7564 = vst [vmem:[#allocation21_spill] sm:$0xff] %v6541_v33  ;;  %v6547_v44 = vld [vmem:[%s5208_s8 + $0x158] sm:$0xff] }
 0x12c   : > { %v2836_v21 = vadd.f32 %v2828_v12, %v2788_v29  ;;  %v2972_v35 = vmul.f32 %v6541_v33, %v2952_v31  ;;  %4582 = vmatmul.mubr.msk.f32.gmra.mrb[6].mxu1 %vm1116_vm12, %v6210_v5  ;;  %7565 = vst [vmem:[#allocation22_spill] sm:$0xff] %v6547_v44  ;;  %v3020_v42 = vmul.f32 %v6547_v44, %v3000_v17  ;;  %v6555_v57 = vld [vmem:[%s5210_s9 + $0x78] sm:$0xff]  ;;  %v7566_v17 = vand.u32 2147483648, %v6387_v60 }
 0x12d   : > { %v2676_v13 = vsel %vm2675_vm6, %v6387_v60, %v2674_v22  ;;  %3278 = vmatprep.mubr.f32.mxu1 %v7473_v55  ;;  %v2645_v28 = vadd.f32 %v2637_v1, %v2620_v30  ;;  %v2631_v31 = vsub.f32 %v6555_v57, %v6238_v41  ;;  %v3026_v29 = vadd.f32 %v3018_v46, %v2978_v50 }
 0x12e   : > { %v2884_v12 = vadd.f32 %v2876_v0, %v2836_v21  ;;  %v3096_v5 = vrot.slane %v6480_v47, %v5326_v23  ;;  %v2679_v44 = vsel %vm2677_vm7, %v7566_v17, %v2676_v13  ;;  %v2622_v30 = vmul.f32 %v2614_v19, %v2614_v19  ;;  %v6572_v0 = vld [vmem:[%s5208_s8 + $0x198] sm:$0xff]  ;;  %v6596_v17 = vld [vmem:[%s5208_s8] sm:$0xff] }
 0x12f   : > { %v2729_v22 = vmul.f32 3.3333333, %v2679_v44  ;;  %v6565_v33 = vadd.f32 %v2662_v24, %v2645_v28  ;;  %v2639_v1 = vmul.f32 %v2631_v31, %v2631_v31  ;;  %v3074_v4 = vadd.f32 %v3066_v3, %v3026_v29 }
 0x130   : > { %v2932_v26 = vadd.f32 %v2924_v16, %v2884_v12  ;;  %v2656_v46 = vsub.f32 %v6020_v39, %v6262_v36  ;;  %v2611_v21 = vsub.f32 %v6042_v49, %v6137_v51  ;;  %v4754_v47 = vpop.eup %4753  ;;  %v3068_v60 = vmul.f32 %v6572_v0, %v3048_v61  ;;  %v6581_v16 = vld [vmem:[%s5208_s8 + $0x1d8] sm:$0xff] }
 0x131   : > { %v2737_v50 = vsub.f32 1.0, %v2729_v22  ;;  %4755 = vrsqrt.f32 %v6565_v33  ;;  %v3122_v24 = vadd.f32 %v3114_v34, %v3074_v4  ;;  %v2688_v3 = vmul.f32 %v4754_v47, %v6454_v53 }
 0x132   : > { %v2980_v19 = vadd.f32 %v2972_v35, %v2932_v26  ;;  %v2628_v39 = vsub.f32 %v6054_v40, %v6238_v41  ;;  %v3116_v49 = vmul.f32 %v6581_v16, %v3096_v5  ;;  %v2692_v61 = vand.u32 2147483648, %v6454_v53 }
 0x133   : > { %v2745_v44 = vmax.f32 %v2737_v50, 0.0  ;;  %3137 = vmatprep.subr.mxu0 %v3122_v24  ;;  %v2647_v4 = vadd.f32 %v2639_v1, %v2622_v30  ;;  %v2664_v34 = vmul.f32 %v2656_v46, %v2656_v46  ;;  %v2619_v26 = vmul.f32 %v2611_v21, %v2611_v21  ;;  %v6600_v30 = vld [vmem:[%s5208_s8 + $0x40] sm:$0xff] }
 0x134   : > { %v3028_v13 = vadd.f32 %v3020_v42, %v2980_v19  ;;  %v2690_v12 = vsel %vm2689_vm8, %v6454_v53, %v2688_v3  ;;  %v2636_v5 = vmul.f32 %v2628_v39, %v2628_v39  ;;  %v2653_v42 = vsub.f32 %v6132_v58, %v6262_v36  ;;  %v6604_v46 = vld [vmem:[%s5208_s8 + $0x80] sm:$0xff] }
 0x135   : > { %v2756_v35 = vrot.slane %v2745_v44, %v5288_v2  ;;  %v2796_v40 = vrot.slane %v2745_v44, %v5295_v6  ;;  %v2844_v28 = vrot.slane %v2745_v44, %v5297_v7  ;;  %v2892_v31 = vrot.slane %v2745_v44, %v5300_v9  ;;  %v6611_v24 = vld [vmem:[%s5208_s8 + $0xc0] sm:$0xff] }
 0x136   : > { %v3076_v29 = vadd.f32 %v3068_v60, %v3028_v13  ;;  %v2940_v47 = vrot.slane %v2745_v44, %v5302_v10  ;;  %v2988_v50 = vrot.slane %v2745_v44, %v5304_v11  ;;  %vm2710_vm10 = vcmp.eq.f32.partialorder %v6565_v33, inf }
 0x137   : > { %v2785_v22 = vmul.f32 %v6596_v17, %v2756_v35  ;;  %v2825_v1 = vmul.f32 %v6600_v30, %v2796_v40  ;;  %v2873_v21 = vmul.f32 %v6604_v46, %v2844_v28  ;;  %v2921_v19 = vmul.f32 %v6611_v24, %v2892_v31 }
 0x138   : > { %v3124_v60 = vadd.f32 %v3116_v49, %v3076_v29  ;;  %v2693_v3 = vsel %vm2691_vm9, %v2692_v61, %v2690_v12  ;;  %v6616_v39 = vadd.f32 %v2664_v34, %v2647_v4  ;;  %v3036_v13 = vrot.slane %v2745_v44, %v5313_v14  ;;  %v6628_v34 = vld [vmem:[%s5208_s8 + $0x140] sm:$0xff] }
 0x139   : > { %v2833_v58 = vadd.f32 %v2825_v1, %v2785_v22  ;;  %v2731_v35 = vmul.f32 3.3333333, %v2693_v3  ;;  %v2644_v49 = vadd.f32 %v2636_v5, %v2619_v26  ;;  %v2661_v40 = vmul.f32 %v2653_v42, %v2653_v42  ;;  %v6620_v22 = vld [vmem:[%s5208_s8 + $0x100] sm:$0xff] }
 0x13a   : > { %3214 = vmatprep.subr.mxu1 %v3124_v60  ;;  %v2969_v1 = vmul.f32 %v6620_v22, %v2940_v47  ;;  %v3084_v31 = vrot.slane %v2745_v44, %v5326_v23  ;;  %4757 = vrsqrt.f32 %v6616_v39  ;;  %vm2712_vm11 = vcmp.eq.f32.partialorder %v6565_v33, 0.0  ;;  %v6637_v44 = vld [vmem:[%s5208_s8 + $0x180] sm:$0xff] }
 0x13b   : > { %v4756_v28 = vpop.eup %4755  ;;  %v2881_v29 = vadd.f32 %v2873_v21, %v2833_v58  ;;  %v2739_v53 = vsub.f32 1.0, %v2731_v35  ;;  %v3017_v26 = vmul.f32 %v6628_v34, %v2988_v50  ;;  %v2713_v12 = vand.u32 2147483648, %v6565_v33  ;;  %7567 = vst [vmem:[#allocation26_spill] sm:$0xff] %v6637_v44  ;;  %v6648_v58 = vld [vmem:[%s5208_s8 + $0x1c0] sm:$0xff] }
 0x13c   : > { %v2709_v61 = vmul.f32 %v4756_v28, %v6565_v33  ;;  %v6632_v5 = vadd.f32 %v2661_v40, %v2644_v49  ;;  %v3065_v42 = vmul.f32 %v6637_v44, %v3036_v13  ;;  %v2613_v60 = vsub.f32 %v6148_v45, %v6137_v51  ;;  %7568 = vst [vmem:[#allocation23_spill] sm:$0xff] %v6648_v58  ;;  %v6760_v44 = vld [vmem:[%s5208_s8 + $0xa8] sm:$0xff] }
 0x13d   : > { %v2929_v4 = vadd.f32 %v2921_v19, %v2881_v29  ;;  %v6640_v21 = vmax.f32 %v2739_v53, 0.0  ;;  %v3113_v19 = vmul.f32 %v6648_v58, %v3084_v31  ;;  %vm2724_vm13 = vcmp.eq.f32.partialorder %v6616_v39, inf  ;;  %v6677_v29 = vld [vmem:[%s5208_s8 + $0x50] sm:$0xff]  ;;  %7579 = vst [vmem:[#allocation35_spill] sm:$0xff] %v6760_v44 }
 0x13e   : > { %v2711_v47 = vsel %vm2710_vm10, %v6565_v33, %v2709_v61  ;;  %v2630_v3 = vsub.f32 %v6153_v18, %v6238_v41  ;;  %vm2726_vm14 = vcmp.eq.f32.partialorder %v6616_v39, 0.0  ;;  %4759 = vrsqrt.f32 %v6632_v5  ;;  %v6673_v41 = vld [vmem:[%s5208_s8 + $0x10] sm:$0xff]  ;;  %7570 = vst [vmem:[#allocation27_spill] sm:$0xff] %v6677_v29 }
 0x13f   : > { %v2977_v50 = vadd.f32 %v2969_v1, %v2929_v4  ;;  %v2764_v13 = vrot.slane %v6640_v21, %v5288_v2  ;;  %v2804_v35 = vrot.slane %v6640_v21, %v5295_v6  ;;  %v2852_v51 = vrot.slane %v6640_v21, %v5297_v7  ;;  %7569 = vst [vmem:[#allocation24_spill] sm:$0xff] %v6673_v41  ;;  %v6681_v33 = vld [vmem:[%s5208_s8 + $0x90] sm:$0xff] }
 0x140   : > { %v2900_v45 = vrot.slane %v6640_v21, %v5300_v9  ;;  %v2714_v40 = vsel %vm2712_vm11, %v2713_v12, %v2711_v47  ;;  %v2655_v18 = vsub.f32 %v6183_v8, %v6262_v36  ;;  %7571 = vst [vmem:[#allocation25_spill] sm:$0xff] %v6681_v33  ;;  %v2948_v8 = vrot.slane %v6640_v21, %v5302_v10  ;;  %v6691_v12 = vld [vmem:[%s5208_s8 + $0xd0] sm:$0xff] }
 0x141   : > { %v3025_v49 = vadd.f32 %v3017_v26, %v2977_v50  ;;  %v2787_v28 = vmul.f32 %v6673_v41, %v2764_v13  ;;  %v2827_v1 = vmul.f32 %v6677_v29, %v2804_v35  ;;  %v2875_v31 = vmul.f32 %v6681_v33, %v2852_v51  ;;  %7572 = vst [vmem:[#allocation28_spill] sm:$0xff] %v6691_v12  ;;  %v6698_v51 = vld [vmem:[%s7318_s4 + $0x20] sm:$0xff]  ;;  %v6756_v29 = vld [vmem:[%s5208_s8 + $0x68] sm:$0xff] }
 0x142   : > { %v2996_v53 = vrot.slane %v6640_v21, %v5304_v11  ;;  %v3044_v61 = vrot.slane %v6640_v21, %v5313_v14  ;;  %v2621_v4 = vmul.f32 %v2613_v60, %v2613_v60  ;;  %v2923_v47 = vmul.f32 %v6691_v12, %v2900_v45  ;;  %7578 = vst [vmem:[#allocation34_spill] sm:$0xff] %v6756_v29 }
 0x143   : > { %v3073_v36 = vadd.f32 %v3065_v42, %v3025_v49  ;;  %v2835_v26 = vadd.f32 %v2827_v1, %v2787_v28  ;;  %v2734_v50 = vmul.f32 3.3333333, %v2714_v40  ;;  %v2727_v13 = vand.u32 2147483648, %v6616_v39  ;;  %v6704_v1 = vld [vmem:[%s5208_s8 + $0x110] sm:$0xff] }
 0x144   : > { %v4758_v35 = vpop.eup %4757  ;;  %v2638_v49 = vmul.f32 %v2630_v3, %v2630_v3  ;;  %v2663_v58 = vmul.f32 %v2655_v18, %v2655_v18  ;;  %v6701_v60 = vstv %s6634_s23  ;;  %7573 = vst [vmem:[#allocation29_spill] sm:$0xff] %v6704_v1  ;;  %v2971_v45 = vmul.f32 %v6704_v1, %v2948_v8  ;;  %v6714_v18 = vld [vmem:[%s5208_s8 + $0x190] sm:$0xff] }
 0x145   : > { %v3121_v42 = vadd.f32 %v3113_v19, %v3073_v36  ;;  %v2883_v28 = vadd.f32 %v2875_v31, %v2835_v26  ;;  %v2742_v40 = vsub.f32 1.0, %v2734_v50  ;;  %v2723_v12 = vmul.f32 %v4758_v35, %v6616_v39  ;;  %v6710_v19 = vld [vmem:[%s5208_s8 + $0x150] sm:$0xff]  ;;  %7575 = vst [vmem:[#allocation31_spill] sm:$0xff] %v6714_v18 }
 0x146   : > { %vm2703_vm15 = vcmp.eq.f32.partialorder %v6632_v5, inf  ;;  %7574 = vst [vmem:[#allocation30_spill] sm:$0xff] %v6710_v19  ;;  %v3019_v3 = vmul.f32 %v6710_v19, %v2996_v53  ;;  %v3067_v31 = vmul.f32 %v6714_v18, %v3044_v61  ;;  %v3092_v36 = vrot.slane %v6640_v21, %v5326_v23  ;;  %v6732_v21 = vld [vmem:[%s7318_s4 + $0x28] sm:$0xff] }
 0x147   : > { %3138 = vmatpush1.msra.mxu0 %v3121_v42  ;;  %v2646_v8 = vadd.f32 %v2638_v49, %v2621_v4  ;;  %v2931_v26 = vadd.f32 %v2923_v47, %v2883_v28  ;;  %v2750_v50 = vmax.f32 %v2742_v40, 0.0  ;;  %v2725_v35 = vsel %vm2724_vm13, %v6616_v39, %v2723_v12  ;;  %v6744_v40 = vld [vmem:[%s5208_s8 + $0x1d0] sm:$0xff] }
 0x148   : > { %4586 = vmatmul.mubr.msk.f32.vlgmr.msra.gmra.mrb[0].mxu0 %vm1116_vm12, %v6698_v51  ;;  %vm2705_vm0 = vcmp.eq.f32.partialorder %v6632_v5, 0.0  ;;  %v2706_v53 = vand.u32 2147483648, %v6632_v5  ;;  %v6735_v61 = vstv %s6668_s24  ;;  %v6738_v4 = vstv %s6670_s29  ;;  %v4760_v28 = vpop.eup %4759  ;;  %7576 = vst [vmem:[#allocation32_spill] sm:$0xff] %v6744_v40 }
 0x149   : > { %v6726_v42 = vadd.f32 %v2663_v58, %v2646_v8  ;;  %3207 = vmatprep.mubr.f32.mxu0 %v7473_v55  ;;  %v2979_v12 = vadd.f32 %v2971_v45, %v2931_v26  ;;  %v2776_v47 = vrot.slane %v2750_v50, %v5288_v2  ;;  %v2816_v58 = vrot.slane %v2750_v50, %v5295_v6  ;;  %v6752_v26 = vld [vmem:[%s5208_s8 + $0x28] sm:$0xff] }
 0x14a   : > { %v2864_v49 = vrot.slane %v2750_v50, %v5297_v7  ;;  %v3115_v8 = vmul.f32 %v6744_v40, %v3092_v36  ;;  %v2912_v18 = vrot.slane %v2750_v50, %v5300_v9  ;;  %v2960_v19 = vrot.slane %v2750_v50, %v5302_v10  ;;  %7577 = vst [vmem:[#allocation33_spill] sm:$0xff] %v6752_v26 }
 0x14b   : > { %v2728_v1 = vsel %vm2726_vm14, %v2727_v13, %v2725_v35  ;;  %v3027_v45 = vadd.f32 %v3019_v3, %v2979_v12  ;;  %v2790_v33 = vmul.f32 %v6752_v26, %v2776_v47  ;;  %v2830_v41 = vmul.f32 %v6756_v29, %v2816_v58  ;;  %v6774_v58 = vld [vmem:[%s5208_s8 + $0xe8] sm:$0xff] }
 0x14c   : > { %v2878_v36 = vmul.f32 %v6760_v44, %v2864_v49  ;;  %4587 = vmatmul.mubr.msk.f32.gmra.mrb[2].mxu0 %vm1116_vm12, %v6732_v21  ;;  %v3008_v39 = vrot.slane %v2750_v50, %v5304_v11  ;;  %v3466_v13 = vsub.f32 %v6249_v20, %v6701_v60  ;;  %v3483_v3 = vsub.f32 %v6255_v43, %v6735_v61 }
 0x14d   : > { %3355 = vmatprep.mubr.f32.mxu0 %v7473_v55  ;;  %v3508_v35 = vsub.f32 %v6276_v48, %v6738_v4  ;;  %v3075_v12 = vadd.f32 %v3067_v31, %v3027_v45  ;;  %v2838_v47 = vadd.f32 %v2830_v41, %v2790_v33  ;;  %v2926_v49 = vmul.f32 %v6774_v58, %v2912_v18  ;;  %v6782_v48 = vld [vmem:[%s5208_s8 + $0x128] sm:$0xff] }
 0x14e   : > { %v2736_v44 = vmul.f32 3.3333333, %v2728_v1  ;;  %v3056_v29 = vrot.slane %v2750_v50, %v5313_v14  ;;  %v3104_v26 = vrot.slane %v2750_v50, %v5326_v23  ;;  %v2702_v20 = vmul.f32 %v4760_v28, %v6632_v5  ;;  %7580 = vst [vmem:[#allocation38_spill] sm:$0xff] %v6782_v48  ;;  %v6789_v28 = vld [vmem:[%s5208_s8 + $0x168] sm:$0xff] }
 0x14f   : > { %4761 = vrsqrt.f32 %v6726_v42  ;;  %v3123_v43 = vadd.f32 %v3115_v8, %v3075_v12  ;;  %v2886_v40 = vadd.f32 %v2878_v36, %v2838_v47  ;;  %v2974_v41 = vmul.f32 %v6782_v48, %v2960_v19  ;;  %7581 = vst [vmem:[#allocation36_spill] sm:$0xff] %v6789_v28  ;;  %v6890_v48 = vld [vmem:[%s5208_s8 + $0xe0] sm:$0xff] }
 0x150   : > { %v2744_v33 = vsub.f32 1.0, %v2736_v44  ;;  %v2704_v1 = vsel %vm2703_vm15, %v6632_v5, %v2702_v20  ;;  %v3474_v18 = vmul.f32 %v3466_v13, %v3466_v13  ;;  %v3491_v31 = vmul.f32 %v3483_v3, %v3483_v3  ;;  %v6799_v44 = vld [vmem:[%s5208_s8 + $0x1a8] sm:$0xff]  ;;  %7595 = vst [vmem:[#allocation50_spill] sm:$0xff] %v6890_v48 }
 0x151   : > { %3215 = vmatpush1.msra.mxu1 %v3123_v43  ;;  %v2934_v50 = vadd.f32 %v2926_v49, %v2886_v40  ;;  %v3022_v45 = vmul.f32 %v6789_v28, %v3008_v39  ;;  %v2707_v36 = vsel %vm2705_vm0, %v2706_v53, %v2704_v1  ;;  %7582 = vst [vmem:[#allocation37_spill] sm:$0xff] %v6799_v44  ;;  %v6803_v13 = vld [vmem:[%s5208_s8 + $0x1e8] sm:$0xff]  ;;  %vm2717_vm1 = vcmp.eq.f32.partialorder %v6726_v42, inf  ;;  %v6821_v43 = vld [vmem:[%s5208_s8 + $0x38] sm:$0xff] }
 0x152   : > { %v6792_v8 = vmax.f32 %v2744_v33, 0.0  ;;  %4588 = vmatmul.mubr.msk.f32.vlgmr.msra.gmra.mrb[0].mxu1 %vm1116_vm12, %v6698_v51  ;;  %v3070_v19 = vmul.f32 %v6799_v44, %v3056_v29  ;;  %7583 = vst [vmem:[#allocation39_spill] sm:$0xff] %v6803_v13  ;;  %v3118_v40 = vmul.f32 %v6803_v13, %v3104_v26  ;;  %v2733_v3 = vmul.f32 3.3333333, %v2707_v36  ;;  %7584 = vst [vmem:[#allocation40_spill] sm:$0xff] %v6821_v43  ;;  %v6825_v33 = vld [vmem:[%s5208_s8 + $0x78] sm:$0xff] }
 0x153   : > { %v3516_v39 = vmul.f32 %v3508_v35, %v3508_v35  ;;  %v2982_v12 = vadd.f32 %v2974_v41, %v2934_v50  ;;  %3284 = vmatprep.mubr.f32.mxu1 %v7473_v55  ;;  %v3499_v49 = vadd.f32 %v3491_v31, %v3474_v18  ;;  %7585 = vst [vmem:[#allocation42_spill] sm:$0xff] %v6825_v33  ;;  %v6829_v50 = vld [vmem:[%s5208_s8 + $0xb8] sm:$0xff]  ;;  %vm2719_vm2 = vcmp.eq.f32.partialorder %v6726_v42, 0.0 }
 0x154   : > { %v2784_v5 = vrot.slane %v6792_v8, %v5288_v2  ;;  %v2824_v53 = vrot.slane %v6792_v8, %v5295_v6  ;;  %v2872_v47 = vrot.slane %v6792_v8, %v5297_v7  ;;  %v2920_v29 = vrot.slane %v6792_v8, %v5300_v9  ;;  %7586 = vst [vmem:[#allocation43_spill] sm:$0xff] %v6829_v50  ;;  %v6856_v28 = vld [vmem:[%s5208_s8 + $0x178] sm:$0xff] }
 0x155   : > { %v2968_v26 = vrot.slane %v6792_v8, %v5302_v10  ;;  %v3016_v35 = vrot.slane %v6792_v8, %v5304_v11  ;;  %v3030_v20 = vadd.f32 %v3022_v45, %v2982_v12  ;;  %v3064_v13 = vrot.slane %v6792_v8, %v5313_v14  ;;  %7590 = vst [vmem:[#allocation45_spill] sm:$0xff] %v6856_v28 }
 0x156   : > { %v2792_v41 = vmul.f32 %v6821_v43, %v2784_v5  ;;  %v2832_v1 = vmul.f32 %v6825_v33, %v2824_v53  ;;  %v2880_v36 = vmul.f32 %v6829_v50, %v2872_v47  ;;  %v2720_v18 = vand.u32 2147483648, %v6726_v42  ;;  %4589 = vmatmul.mubr.msk.f32.gmra.mrb[2].mxu1 %vm1116_vm12, %v6732_v21  ;;  %v6841_v5 = vld [vmem:[%s5208_s8 + $0xf8] sm:$0xff] }
 0x157   : > { %v3468_v31 = vsub.f32 %v6270_v32, %v6701_v60  ;;  %v3078_v45 = vadd.f32 %v3070_v19, %v3030_v20  ;;  %7587 = vst [vmem:[#allocation41_spill] sm:$0xff] %v6841_v5  ;;  %v2928_v53 = vmul.f32 %v6841_v5, %v2920_v29  ;;  %v2741_v47 = vsub.f32 1.0, %v2733_v3  ;;  %3432 = vmatprep.mubr.f32.mxu1 %v7473_v55  ;;  %v6846_v33 = vld [vmem:[%s5208_s8 + $0x138] sm:$0xff]  ;;  %v7589_v19 = vld [vmem:[#allocation8_spill] sm:$0xff] }
 0x158   : > { %v2840_v12 = vadd.f32 %v2832_v1, %v2792_v41  ;;  %7588 = vst [vmem:[#allocation44_spill] sm:$0xff] %v6846_v33  ;;  %v2976_v43 = vmul.f32 %v6846_v33, %v2968_v26  ;;  %v6849_v44 = vadd.f32 %v3516_v39, %v3499_v49  ;;  %v3485_v32 = vsub.f32 %v6281_v52, %v6735_v61  ;;  %v6860_v5 = vld [vmem:[%s5208_s8 + $0x1b8] sm:$0xff] }
 0x159   : > { %v4762_v50 = vpop.eup %4761  ;;  %v3510_v20 = vsub.f32 %v7589_v19, %v6738_v4  ;;  %v3126_v41 = vadd.f32 %v3118_v40, %v3078_v45  ;;  %v3024_v3 = vmul.f32 %v6856_v28, %v3016_v35  ;;  %v2749_v29 = vmax.f32 %v2741_v47, 0.0  ;;  %7591 = vst [vmem:[#allocation46_spill] sm:$0xff] %v6860_v5  ;;  %v6873_v47 = vld [vmem:[%s5208_s8 + $0x20] sm:$0xff]  ;;  %v6885_v28 = vld [vmem:[%s5208_s8 + $0x1f8] sm:$0xff] }
 0x15a   : > { %v2888_v1 = vadd.f32 %v2880_v36, %v2840_v12  ;;  %v3072_v26 = vmul.f32 %v6860_v5, %v3064_v13  ;;  %v3112_v39 = vrot.slane %v6792_v8, %v5326_v23  ;;  %v2716_v52 = vmul.f32 %v4762_v50, %v6726_v42  ;;  %7594 = vst [vmem:[#allocation49_spill] sm:$0xff] %v6885_v28 }
 0x15b   : > { %4763 = vrsqrt.f32 %v6849_v44  ;;  %3291 = vmatprep.subr.mxu0 %v3126_v41  ;;  %v2772_v35 = vrot.slane %v2749_v29, %v5288_v2  ;;  %v2812_v49 = vrot.slane %v2749_v29, %v5295_v6  ;;  %v2860_v36 = vrot.slane %v2749_v29, %v5297_v7 }
 0x15c   : > { %v2936_v40 = vadd.f32 %v2928_v53, %v2888_v1  ;;  %v2908_v13 = vrot.slane %v2749_v29, %v5300_v9  ;;  %v2956_v45 = vrot.slane %v2749_v29, %v5302_v10  ;;  %v3476_v8 = vmul.f32 %v3468_v31, %v3468_v31  ;;  %v6877_v53 = vld [vmem:[%s5208_s8 + $0x60] sm:$0xff] }
 0x15d   : > { %v3493_v12 = vmul.f32 %v3485_v32, %v3485_v32  ;;  %v2789_v19 = vmul.f32 %v6873_v47, %v2772_v35  ;;  %7592 = vst [vmem:[#allocation47_spill] sm:$0xff] %v6877_v53  ;;  %v2829_v41 = vmul.f32 %v6877_v53, %v2812_v49  ;;  %v6881_v1 = vld [vmem:[%s5208_s8 + $0xa0] sm:$0xff]  ;;  %v3120_v33 = vmul.f32 %v6885_v28, %v3112_v39 }
 0x15e   : > { %v2984_v50 = vadd.f32 %v2976_v43, %v2936_v40  ;;  %7593 = vst [vmem:[#allocation48_spill] sm:$0xff] %v6881_v1  ;;  %v2877_v5 = vmul.f32 %v6881_v1, %v2860_v36  ;;  %v3004_v31 = vrot.slane %v2749_v29, %v5304_v11  ;;  %v3518_v43 = vmul.f32 %v3510_v20, %v3510_v20  ;;  %v6897_v53 = vld [vmem:[%s5208_s8 + $0x120] sm:$0xff] }
 0x15f   : > { %v2837_v40 = vadd.f32 %v2829_v41, %v2789_v19  ;;  %v2925_v35 = vmul.f32 %v6890_v48, %v2908_v13  ;;  %v2718_v49 = vsel %vm2717_vm1, %v6726_v42, %v2716_v52  ;;  %7596 = vst [vmem:[#allocation51_spill] sm:$0xff] %v6897_v53  ;;  %v2973_v36 = vmul.f32 %v6897_v53, %v2956_v45  ;;  %v7597_v48 = vld [vmem:[#allocation9_spill] sm:$0xff]  ;;  %v6910_v1 = vld [vmem:[%s5208_s8 + $0x160] sm:$0xff] }
 0x160   : > { %v3032_v32 = vadd.f32 %v3024_v3, %v2984_v50  ;;  %v3052_v39 = vrot.slane %v2749_v29, %v5313_v14  ;;  %v2721_v20 = vsel %vm2719_vm2, %v2720_v18, %v2718_v49  ;;  %v3501_v3 = vadd.f32 %v3493_v12, %v3476_v8  ;;  %7598 = vst [vmem:[#allocation52_spill] sm:$0xff] %v6910_v1  ;;  %v7600_v8 = vld [vmem:[#allocation11_spill] sm:$0xff]  ;;  %v7602_v49 = vld [vmem:[#allocation12_spill] sm:$0xff] }
 0x161   : > { %v2885_v19 = vadd.f32 %v2877_v5, %v2837_v40  ;;  %v3100_v13 = vrot.slane %v2749_v29, %v5326_v23  ;;  %v2735_v41 = vmul.f32 3.3333333, %v2721_v20  ;;  %vm3540_vm3 = vcmp.eq.f32.partialorder %v6849_v44, inf  ;;  %v6914_v5 = vld [vmem:[%s5208_s8 + $0x1a0] sm:$0xff] }
 0x162   : > { %v3080_v50 = vadd.f32 %v3072_v26, %v3032_v32  ;;  %v6905_v52 = vadd.f32 %v3518_v43, %v3501_v3  ;;  %v3465_v45 = vsub.f32 %v7597_v48, %v6701_v60  ;;  %v3021_v42 = vmul.f32 %v6910_v1, %v3004_v31  ;;  %7599 = vst [vmem:[#allocation53_spill] sm:$0xff] %v6914_v5  ;;  %v6961_v1 = vld [vmem:[%s5208_s8 + $0xf0] sm:$0xff] }
 0x163   : > { %v2933_v28 = vadd.f32 %v2925_v35, %v2885_v19  ;;  %v2743_v18 = vsub.f32 1.0, %v2735_v41  ;;  %v3069_v29 = vmul.f32 %v6914_v5, %v3052_v39  ;;  %vm3542_vm4 = vcmp.eq.f32.partialorder %v6849_v44, 0.0 }
 0x164   : > { %v3128_v53 = vadd.f32 %v3120_v33, %v3080_v50  ;;  %4765 = vrsqrt.f32 %v6905_v52  ;;  %v3482_v12 = vsub.f32 %v7600_v8, %v6735_v61  ;;  %v6922_v33 = vld [vmem:[%s5208_s8 + $0x1e0] sm:$0xff]  ;;  %v3543_v32 = vand.u32 2147483648, %v6849_v44 }
 0x165   : > { %v4764_v26 = vpop.eup %4763  ;;  %v2981_v48 = vadd.f32 %v2973_v36, %v2933_v28  ;;  %7601 = vst [vmem:[#allocation54_spill] sm:$0xff] %v6922_v33  ;;  %v3117_v43 = vmul.f32 %v6922_v33, %v3100_v13  ;;  %v6925_v31 = vmax.f32 %v2743_v18, 0.0  ;;  %v3473_v35 = vmul.f32 %v3465_v45, %v3465_v45  ;;  %v7604_v45 = vld [vmem:[#allocation10_spill] sm:$0xff] }
 0x166   : > { %3368 = vmatprep.subr.mxu1 %v3128_v53  ;;  %v3539_v40 = vmul.f32 %v4764_v26, %v6849_v44  ;;  %v3507_v39 = vsub.f32 %v7602_v49, %v6738_v4  ;;  %v7603_v53 = vld [vmem:[#allocation13_spill] sm:$0xff]  ;;  %v3490_v41 = vmul.f32 %v3482_v12, %v3482_v12  ;;  %v6946_v26 = vld [vmem:[%s5208_s8 + $0x30] sm:$0xff]  ;;  %vm3554_vm5 = vcmp.eq.f32.partialorder %v6905_v52, inf }
 0x167   : > { %v3467_v28 = vsub.f32 %v7603_v53, %v6701_v60  ;;  %v3029_v36 = vadd.f32 %v3021_v42, %v2981_v48  ;;  %v2780_v20 = vrot.slane %v6925_v31, %v5288_v2  ;;  %v2820_v3 = vrot.slane %v6925_v31, %v5295_v6  ;;  %v6950_v48 = vld [vmem:[%s5208_s8 + $0x70] sm:$0xff] }
 0x168   : > { %v2868_v50 = vrot.slane %v6925_v31, %v5297_v7  ;;  %v2916_v19 = vrot.slane %v6925_v31, %v5300_v9  ;;  %v2964_v13 = vrot.slane %v6925_v31, %v5302_v10  ;;  %v3484_v42 = vsub.f32 %v7604_v45, %v6735_v61  ;;  %7605 = vst [vmem:[#allocation56_spill] sm:$0xff] %v6950_v48  ;;  %v6954_v53 = vld [vmem:[%s5208_s8 + $0xb0] sm:$0xff] }
 0x169   : > { %v3077_v18 = vadd.f32 %v3069_v29, %v3029_v36  ;;  %v2791_v8 = vmul.f32 %v6946_v26, %v2780_v20  ;;  %v2831_v49 = vmul.f32 %v6950_v48, %v2820_v3  ;;  %7606 = vst [vmem:[#allocation57_spill] sm:$0xff] %v6954_v53  ;;  %v3012_v12 = vrot.slane %v6925_v31, %v5304_v11 }
 0x16a   : > { %v2879_v33 = vmul.f32 %v6954_v53, %v2868_v50  ;;  %v3515_v45 = vmul.f32 %v3507_v39, %v3507_v39  ;;  %v3475_v29 = vmul.f32 %v3467_v28, %v3467_v28  ;;  %v2927_v20 = vmul.f32 %v6961_v1, %v2916_v19  ;;  %v6972_v28 = vld [vmem:[%s5208_s8 + $0x130] sm:$0xff] }
 0x16b   : > { %v3125_v36 = vadd.f32 %v3117_v43, %v3077_v18  ;;  %v2839_v5 = vadd.f32 %v2831_v49, %v2791_v8  ;;  %v3541_v3 = vsel %vm3540_vm3, %v6849_v44, %v3539_v40  ;;  %v3498_v53 = vadd.f32 %v3490_v41, %v3473_v35 }
 0x16c   : > { %v3544_v50 = vsel %vm3542_vm4, %v3543_v32, %v3541_v3  ;;  %v3492_v48 = vmul.f32 %v3484_v42, %v3484_v42  ;;  %v3509_v39 = vsub.f32 %v6398_v25, %v6738_v4  ;;  %v2975_v18 = vmul.f32 %v6972_v28, %v2964_v13  ;;  %v6987_v32 = vld [vmem:[%s5208_s8 + $0x170] sm:$0xff] }
 0x16d   : > { %3292 = vmatpush1.msra.mxu0 %v3125_v36  ;;  %v2887_v43 = vadd.f32 %v2879_v33, %v2839_v5  ;;  %v3060_v19 = vrot.slane %v6925_v31, %v5313_v14  ;;  %v3588_v8 = vmul.f32 3.3333333, %v3544_v50  ;;  %v3108_v44 = vrot.slane %v6925_v31, %v5326_v23  ;;  %7607 = vst [vmem:[#allocation55_spill] sm:$0xff] %v6987_v32 }
 0x16e   : > { %v4766_v40 = vpop.eup %4765  ;;  %4590 = vmatmul.mubr.msk.f32.vlgmr.msra.gmra.mrb[4].mxu0 %vm1116_vm12, %v6698_v51  ;;  %vm3556_vm6 = vcmp.eq.f32.partialorder %v6905_v52, 0.0  ;;  %v6982_v25 = vadd.f32 %v3515_v45, %v3498_v53  ;;  %v3470_v5 = vsub.f32 %v6425_v38, %v6701_v60  ;;  %v3023_v35 = vmul.f32 %v6987_v32, %v3012_v12  ;;  %v6995_v45 = vld [vmem:[%s5208_s8 + $0x1b0] sm:$0xff] }
 0x16f   : > { %v2935_v33 = vadd.f32 %v2927_v20, %v2887_v43  ;;  %v3596_v13 = vsub.f32 1.0, %v3588_v8  ;;  %v3553_v31 = vmul.f32 %v4766_v40, %v6905_v52  ;;  %3361 = vmatprep.mubr.f32.mxu0 %v7473_v55  ;;  %v3557_v41 = vand.u32 2147483648, %v6905_v52  ;;  %7608 = vst [vmem:[#allocation58_spill] sm:$0xff] %v6995_v45  ;;  %v7002_v20 = vld [vmem:[%s5208_s8 + $0x1f0] sm:$0xff] }
 0x170   : > { %4767 = vrsqrt.f32 %v6982_v25  ;;  %v3500_v42 = vadd.f32 %v3492_v48, %v3475_v29  ;;  %v3517_v49 = vmul.f32 %v3509_v39, %v3509_v39  ;;  %v3071_v38 = vmul.f32 %v6995_v45, %v3060_v19  ;;  %7609 = vst [vmem:[#allocation59_spill] sm:$0xff] %v7002_v20 }
 0x171   : > { %v2983_v53 = vadd.f32 %v2975_v18, %v2935_v33  ;;  %v3604_v36 = vmax.f32 %v3596_v13, 0.0  ;;  %v3555_v12 = vsel %vm3554_vm5, %v6905_v52, %v3553_v31  ;;  %v3119_v3 = vmul.f32 %v7002_v20, %v3108_v44 }
 0x172   : > { %4591 = vmatmul.mubr.msk.f32.gmra.mrb[6].mxu0 %vm1116_vm12, %v6732_v21  ;;  %v3478_v50 = vmul.f32 %v3470_v5, %v3470_v5  ;;  %v3487_v48 = vsub.f32 %v6430_v15, %v6735_v61  ;;  %v3512_v29 = vsub.f32 %v6435_v59, %v6738_v4  ;;  %v3558_v44 = vsel %vm3556_vm6, %v3557_v41, %v3555_v12 }
 0x173   : > { %v3031_v39 = vadd.f32 %v3023_v35, %v2983_v53  ;;  %v3618_v43 = vrot.slane %v3604_v36, %v5288_v2  ;;  %v3658_v18 = vrot.slane %v3604_v36, %v5295_v6  ;;  %v3706_v19 = vrot.slane %v3604_v36, %v5297_v7  ;;  %4059 = vmatprep.mubr.f32.mxu0 %v7473_v55 }
 0x174   : > { %v3754_v8 = vrot.slane %v3604_v36, %v5300_v9  ;;  %v3802_v40 = vrot.slane %v3604_v36, %v5302_v10  ;;  %v7019_v15 = vadd.f32 %v3517_v49, %v3500_v42  ;;  %v3850_v31 = vrot.slane %v3604_v36, %v5304_v11 }
 0x175   : > { %v3079_v5 = vadd.f32 %v3071_v38, %v3031_v39  ;;  %v3644_v59 = vmul.f32 %v6458_v27, %v3618_v43  ;;  %v3684_v33 = vmul.f32 %v6462_v63, %v3658_v18  ;;  %v3732_v35 = vmul.f32 %v6466_v37, %v3706_v19  ;;  %v7610_v27 = vld [vmem:[#allocation14_spill] sm:$0xff] }
 0x176   : > { %v3780_v13 = vmul.f32 %v6475_v56, %v3754_v8  ;;  %v3898_v53 = vrot.slane %v3604_v36, %v5313_v14  ;;  %v3495_v20 = vmul.f32 %v3487_v48, %v3487_v48  ;;  %v3946_v52 = vrot.slane %v3604_v36, %v5326_v23  ;;  %v7611_v56 = vld [vmem:[#allocation15_spill] sm:$0xff]  ;;  %v7612_v36 = vld [vmem:[#allocation16_spill] sm:$0xff] }
 0x177   : > { %v3127_v45 = vadd.f32 %v3119_v3, %v3079_v5  ;;  %v3692_v32 = vadd.f32 %v3684_v33, %v3644_v59  ;;  %v3590_v41 = vmul.f32 3.3333333, %v3558_v44  ;;  %vm3533_vm7 = vcmp.eq.f32.partialorder %v6982_v25, inf }
 0x178   : > { %vm3535_vm8 = vcmp.eq.f32.partialorder %v6982_v25, 0.0  ;;  %4769 = vrsqrt.f32 %v7019_v15  ;;  %v3472_v63 = vsub.f32 %v7610_v27, %v6701_v60  ;;  %v3828_v42 = vmul.f32 %v7611_v56, %v3802_v40  ;;  %v7615_v27 = vld [vmem:[#allocation18_spill] sm:$0xff] }
 0x179   : > { %3369 = vmatpush1.msra.mxu1 %v3127_v45  ;;  %v3740_v37 = vadd.f32 %v3732_v35, %v3692_v32  ;;  %v3598_v49 = vsub.f32 1.0, %v3590_v41  ;;  %v3536_v38 = vand.u32 2147483648, %v6982_v25  ;;  %v3876_v3 = vmul.f32 %v7612_v36, %v3850_v31  ;;  %v7613_v31 = vld [vmem:[#allocation20_spill] sm:$0xff] }
 0x17a   : > { %v4768_v12 = vpop.eup %4767  ;;  %4592 = vmatmul.mubr.msk.f32.vlgmr.msra.gmra.mrb[4].mxu1 %vm1116_vm12, %v6698_v51  ;;  %v3924_v48 = vmul.f32 %v6523_v62, %v3898_v53  ;;  %v3503_v39 = vadd.f32 %v3495_v20, %v3478_v50  ;;  %v3520_v43 = vmul.f32 %v3512_v29, %v3512_v29  ;;  %v3972_v45 = vmul.f32 %v6527_v54, %v3946_v52  ;;  %v4867_v20 = vld [vmem:[%s5210_s9 + $0xb8] sm:$0xff]  ;;  %v7614_v52 = vld [vmem:[#allocation17_spill] sm:$0xff] }
 0x17b   : > { %v3788_v18 = vadd.f32 %v3780_v13, %v3740_v37  ;;  %v3606_v32 = vmax.f32 %v3598_v49, 0.0  ;;  %vm3547_vm9 = vcmp.eq.f32.partialorder %v7019_v15, inf  ;;  %v3550_v19 = vand.u32 2147483648, %v7019_v15  ;;  %3438 = vmatprep.mubr.f32.mxu1 %v7473_v55  ;;  %v4869_v49 = vld [vmem:[%s5210_s9 + $0x60] sm:$0xff] }
 0x17c   : > { %v3532_v8 = vmul.f32 %v4768_v12, %v6982_v25  ;;  %vm3549_vm10 = vcmp.eq.f32.partialorder %v7019_v15, 0.0  ;;  %v3480_v51 = vmul.f32 %v3472_v63, %v3472_v63  ;;  %v3489_v62 = vsub.f32 %v6555_v57, %v6735_v61  ;;  %v4868_v57 = vld [vmem:[%s5210_s9 + $0x20] sm:$0xff] }
 0x17d   : > { %v3514_v50 = vsub.f32 %v4867_v20, %v6738_v4  ;;  %v3836_v54 = vadd.f32 %v3828_v42, %v3788_v18  ;;  %v3626_v29 = vrot.slane %v3606_v32, %v5288_v2  ;;  %v3666_v40 = vrot.slane %v3606_v32, %v5295_v6 }
 0x17e   : > { %v3714_v44 = vrot.slane %v3606_v32, %v5297_v7  ;;  %v3762_v5 = vrot.slane %v3606_v32, %v5300_v9  ;;  %v3810_v59 = vrot.slane %v3606_v32, %v5302_v10  ;;  %4593 = vmatmul.mubr.msk.f32.gmra.mrb[6].mxu1 %vm1116_vm12, %v6732_v21  ;;  %v7056_v33 = vadd.f32 %v3520_v43, %v3503_v39  ;;  %v7616_v39 = vld [vmem:[#allocation19_spill] sm:$0xff] }
 0x17f   : > { %v3469_v35 = vsub.f32 %v4868_v57, %v6701_v60  ;;  %v3884_v13 = vadd.f32 %v3876_v3, %v3836_v54  ;;  %v3646_v53 = vmul.f32 %v7613_v31, %v3626_v29  ;;  %v3686_v41 = vmul.f32 %v7614_v52, %v3666_v40  ;;  %4136 = vmatprep.mubr.f32.mxu1 %v7473_v55 }
 0x180   : > { %v3734_v63 = vmul.f32 %v7615_v27, %v3714_v44  ;;  %v3858_v37 = vrot.slane %v3606_v32, %v5304_v11  ;;  %v3497_v56 = vmul.f32 %v3489_v62, %v3489_v62  ;;  %v3522_v42 = vmul.f32 %v3514_v50, %v3514_v50 }
 0x181   : > { %v3486_v21 = vsub.f32 %v4869_v49, %v6735_v61  ;;  %v3932_v12 = vadd.f32 %v3924_v48, %v3884_v13  ;;  %v3694_v36 = vadd.f32 %v3686_v41, %v3646_v53  ;;  %v3782_v43 = vmul.f32 %v7616_v39, %v3762_v5  ;;  %v7617_v48 = vld [vmem:[#allocation21_spill] sm:$0xff]  ;;  %v7618_v53 = vld [vmem:[#allocation22_spill] sm:$0xff] }
 0x182   : > { %v3534_v3 = vsel %vm3533_vm7, %v6982_v25, %v3532_v8  ;;  %v4770_v18 = vpop.eup %4769  ;;  %v3906_v20 = vrot.slane %v3606_v32, %v5313_v14  ;;  %4771 = vrsqrt.f32 %v7056_v33  ;;  %v3477_v62 = vmul.f32 %v3469_v35, %v3469_v35 }
 0x183   : > { %v3537_v54 = vsel %vm3535_vm8, %v3536_v38, %v3534_v3  ;;  %v3980_v50 = vadd.f32 %v3972_v45, %v3932_v12  ;;  %v3742_v29 = vadd.f32 %v3734_v63, %v3694_v36  ;;  %v3830_v40 = vmul.f32 %v7617_v48, %v3810_v59  ;;  %v4870_v59 = vld [vmem:[%s5210_s9 + $0xa0] sm:$0xff] }
 0x184   : > { %v3587_v44 = vmul.f32 3.3333333, %v3537_v54  ;;  %v3954_v5 = vrot.slane %v3606_v32, %v5326_v23  ;;  %v3546_v57 = vmul.f32 %v4770_v18, %v7019_v15  ;;  %v3505_v8 = vadd.f32 %v3497_v56, %v3480_v51 }
 0x185   : > { %v3494_v13 = vmul.f32 %v3486_v21, %v3486_v21  ;;  %3995 = vmatprep.subr.mxu0 %v3980_v50  ;;  %v3790_v31 = vadd.f32 %v3782_v43, %v3742_v29  ;;  %v3878_v25 = vmul.f32 %v7618_v53, %v3858_v37  ;;  %v3926_v52 = vmul.f32 %v6572_v0, %v3906_v20 }
 0x186   : > { %v3595_v38 = vsub.f32 1.0, %v3587_v44  ;;  %v3548_v45 = vsel %vm3547_vm9, %v7019_v15, %v3546_v57  ;;  %v7083_v35 = vadd.f32 %v3522_v42, %v3505_v8  ;;  %v3511_v32 = vsub.f32 %v4870_v59, %v6738_v4 }
 0x187   : > { %v3838_v41 = vadd.f32 %v3830_v40, %v3790_v31  ;;  %v3551_v51 = vsel %vm3549_vm10, %v3550_v19, %v3548_v45  ;;  %vm3568_vm11 = vcmp.eq.f32.partialorder %v7056_v33, inf  ;;  %v3974_v63 = vmul.f32 %v6581_v16, %v3954_v5  ;;  %v7619_v31 = vld [vmem:[#allocation26_spill] sm:$0xff] }
 0x188   : > { %v3603_v27 = vmax.f32 %v3595_v38, 0.0  ;;  %v3589_v37 = vmul.f32 3.3333333, %v3551_v51  ;;  %4773 = vrsqrt.f32 %v7083_v35  ;;  %v3502_v0 = vadd.f32 %v3494_v13, %v3477_v62  ;;  %v4871_v62 = vld [vmem:[%s5210_s9 + $0x30] sm:$0xff]  ;;  %v7620_v51 = vld [vmem:[#allocation24_spill] sm:$0xff] }
 0x189   : > { %v3886_v56 = vadd.f32 %v3878_v25, %v3838_v41  ;;  %v3519_v36 = vmul.f32 %v3511_v32, %v3511_v32  ;;  %vm3570_vm13 = vcmp.eq.f32.partialorder %v7056_v33, 0.0  ;;  %v3571_v54 = vand.u32 2147483648, %v7056_v33 }
 0x18a   : > { %v3614_v42 = vrot.slane %v3603_v27, %v5288_v2  ;;  %v3654_v49 = vrot.slane %v3603_v27, %v5295_v6  ;;  %v3702_v21 = vrot.slane %v3603_v27, %v5297_v7  ;;  %v3750_v12 = vrot.slane %v3603_v27, %v5300_v9 }
 0x18b   : > { %v3798_v15 = vrot.slane %v3603_v27, %v5302_v10  ;;  %v3846_v19 = vrot.slane %v3603_v27, %v5304_v11  ;;  %v3934_v16 = vadd.f32 %v3926_v52, %v3886_v56  ;;  %v3894_v20 = vrot.slane %v3603_v27, %v5313_v14  ;;  %v7622_v56 = vld [vmem:[#allocation25_spill] sm:$0xff] }
 0x18c   : > { %v3643_v39 = vmul.f32 %v6596_v17, %v3614_v42  ;;  %v3683_v43 = vmul.f32 %v6600_v30, %v3654_v49  ;;  %v3731_v3 = vmul.f32 %v6604_v46, %v3702_v21  ;;  %v4772_v18 = vpop.eup %4771  ;;  %v3471_v50 = vsub.f32 %v4871_v62, %v6701_v60  ;;  %v4872_v46 = vld [vmem:[%s5210_s9 + $0x70] sm:$0xff]  ;;  %v7623_v49 = vld [vmem:[#allocation23_spill] sm:$0xff] }
 0x18d   : > { %v3982_v29 = vadd.f32 %v3974_v63, %v3934_v16  ;;  %v3779_v40 = vmul.f32 %v6611_v24, %v3750_v12  ;;  %v3597_v17 = vsub.f32 1.0, %v3589_v37  ;;  %v3567_v44 = vmul.f32 %v4772_v18, %v7056_v33  ;;  %v7621_v37 = vld [vmem:[#allocation27_spill] sm:$0xff]  ;;  %v7624_v16 = vld [vmem:[#allocation28_spill] sm:$0xff] }
 0x18e   : > { %v3691_v48 = vadd.f32 %v3683_v43, %v3643_v39  ;;  %vm3582_vm14 = vcmp.eq.f32.partialorder %v7083_v35, inf  ;;  %v7109_v30 = vadd.f32 %v3519_v36, %v3502_v0  ;;  %v3488_v5 = vsub.f32 %v4872_v46, %v6735_v61  ;;  %v7626_v46 = vld [vmem:[#allocation30_spill] sm:$0xff] }
 0x18f   : > { %4072 = vmatprep.subr.mxu1 %v3982_v29  ;;  %v3827_v8 = vmul.f32 %v6620_v22, %v3798_v15  ;;  %v3875_v60 = vmul.f32 %v6628_v34, %v3846_v19  ;;  %v3605_v13 = vmax.f32 %v3597_v17, 0.0  ;;  %v3923_v53 = vmul.f32 %v7619_v31, %v3894_v20  ;;  %v4873_v17 = vld [vmem:[%s5210_s9 + $0xb0] sm:$0xff] }
 0x190   : > { %v3739_v57 = vadd.f32 %v3731_v3, %v3691_v48  ;;  %v3942_v24 = vrot.slane %v3603_v27, %v5326_v23  ;;  %4775 = vrsqrt.f32 %v7109_v30  ;;  %v3479_v25 = vmul.f32 %v3471_v50, %v3471_v50  ;;  %v7625_v48 = vld [vmem:[#allocation29_spill] sm:$0xff]  ;;  %v7149_v31 = vld [vmem:[%s7318_s4 + $0x30] sm:$0xff] }
 0x191   : > { %v3622_v52 = vrot.slane %v3605_v13, %v5288_v2  ;;  %v3662_v45 = vrot.slane %v3605_v13, %v5295_v6  ;;  %v3710_v61 = vrot.slane %v3605_v13, %v5297_v7  ;;  %v3758_v22 = vrot.slane %v3605_v13, %v5300_v9 }
 0x192   : > { %v3787_v38 = vadd.f32 %v3779_v40, %v3739_v57  ;;  %v4774_v59 = vpop.eup %4773  ;;  %v3806_v34 = vrot.slane %v3605_v13, %v5302_v10  ;;  %v3569_v32 = vsel %vm3568_vm11, %v7056_v33, %v3567_v44  ;;  %v3496_v41 = vmul.f32 %v3488_v5, %v3488_v5 }
 0x193   : > { %v3645_v63 = vmul.f32 %v7620_v51, %v3622_v52  ;;  %v3685_v0 = vmul.f32 %v7621_v37, %v3662_v45  ;;  %v3733_v42 = vmul.f32 %v7622_v56, %v3710_v61  ;;  %v3971_v21 = vmul.f32 %v7623_v49, %v3942_v24  ;;  %v7627_v24 = vld [vmem:[#allocation31_spill] sm:$0xff]  ;;  %v7629_v37 = vld [vmem:[#allocation33_spill] sm:$0xff]  ;;  %v7630_v56 = vld [vmem:[#allocation34_spill] sm:$0xff] }
 0x194   : > { %v3835_v27 = vadd.f32 %v3827_v8, %v3787_v38  ;;  %v3854_v12 = vrot.slane %v3605_v13, %v5304_v11  ;;  %vm3584_vm15 = vcmp.eq.f32.partialorder %v7083_v35, 0.0  ;;  %v3585_v15 = vand.u32 2147483648, %v7083_v35  ;;  %v7631_v49 = vld [vmem:[#allocation35_spill] sm:$0xff] }
 0x195   : > { %v3693_v36 = vadd.f32 %v3685_v0, %v3645_v63  ;;  %v3781_v39 = vmul.f32 %v7624_v16, %v3758_v22  ;;  %v3572_v43 = vsel %vm3570_vm13, %v3571_v54, %v3569_v32  ;;  %v3902_v3 = vrot.slane %v3605_v13, %v5313_v14  ;;  %v7169_v63 = vld [vmem:[%s7318_s4 + $0x38] sm:$0xff] }
 0x196   : > { %v3883_v19 = vadd.f32 %v3875_v60, %v3835_v27  ;;  %v3592_v18 = vmul.f32 3.3333333, %v3572_v43  ;;  %v3581_v20 = vmul.f32 %v4774_v59, %v7083_v35  ;;  %v3504_v62 = vadd.f32 %v3496_v41, %v3479_v25  ;;  %v7628_v41 = vld [vmem:[#allocation32_spill] sm:$0xff] }
 0x197   : > { %v3741_v29 = vadd.f32 %v3733_v42, %v3693_v36  ;;  %v3829_v40 = vmul.f32 %v7625_v48, %v3806_v34  ;;  %v3513_v44 = vsub.f32 %v4873_v17, %v6738_v4  ;;  %v3877_v5 = vmul.f32 %v7626_v46, %v3854_v12 }
 0x198   : > { %v3931_v50 = vadd.f32 %v3923_v53, %v3883_v19  ;;  %v3600_v57 = vsub.f32 1.0, %v3592_v18  ;;  %v3583_v33 = vsel %vm3582_vm14, %v7083_v35, %v3581_v20  ;;  %v3950_v60 = vrot.slane %v3605_v13, %v5326_v23 }
 0x199   : > { %v3789_v8 = vadd.f32 %v3781_v39, %v3741_v29  ;;  %v3586_v53 = vsel %vm3584_vm15, %v3585_v15, %v3583_v33  ;;  %v3925_v25 = vmul.f32 %v7627_v24, %v3902_v3  ;;  %vm3561_vm0 = vcmp.eq.f32.partialorder %v7109_v30, inf  ;;  %v7632_v29 = vld [vmem:[#allocation38_spill] sm:$0xff]  ;;  %v7635_v24 = vld [vmem:[#allocation40_spill] sm:$0xff] }
 0x19a   : > { %v3979_v54 = vadd.f32 %v3971_v21, %v3931_v50  ;;  %v4776_v4 = vpop.eup %4775  ;;  %v3608_v38 = vmax.f32 %v3600_v57, 0.0  ;;  %v3594_v45 = vmul.f32 3.3333333, %v3586_v53  ;;  %v3521_v13 = vmul.f32 %v3513_v44, %v3513_v44 }
 0x19b   : > { %v3837_v52 = vadd.f32 %v3829_v40, %v3789_v8  ;;  %v3560_v61 = vmul.f32 %v4776_v4, %v7109_v30  ;;  %v3973_v27 = vmul.f32 %v7628_v41, %v3950_v60  ;;  %vm3563_vm1 = vcmp.eq.f32.partialorder %v7109_v30, 0.0  ;;  %v7633_v40 = vld [vmem:[#allocation36_spill] sm:$0xff] }
 0x19c   : > { %3996 = vmatpush1.msra.mxu0 %v3979_v54  ;;  %v3634_v59 = vrot.slane %v3608_v38, %v5288_v2  ;;  %v3674_v35 = vrot.slane %v3608_v38, %v5295_v6  ;;  %v3722_v22 = vrot.slane %v3608_v38, %v5297_v7  ;;  %v3770_v34 = vrot.slane %v3608_v38, %v5300_v9  ;;  %v7634_v54 = vld [vmem:[#allocation37_spill] sm:$0xff] }
 0x19d   : > { %4597 = vmatmul.mubr.msk.f32.vlgmr.msra.gmra.mrb[0].mxu0 %vm1116_vm12, %v7149_v31  ;;  %v3885_v32 = vadd.f32 %v3877_v5, %v3837_v52  ;;  %v3564_v51 = vand.u32 2147483648, %v7109_v30  ;;  %v3818_v12 = vrot.slane %v3608_v38, %v5302_v10  ;;  %v3866_v19 = vrot.slane %v3608_v38, %v5304_v11 }
 0x19e   : > { %4065 = vmatprep.mubr.f32.mxu0 %v7473_v55  ;;  %v3648_v0 = vmul.f32 %v7629_v37, %v3634_v59  ;;  %v3688_v42 = vmul.f32 %v7630_v56, %v3674_v35  ;;  %v3736_v21 = vmul.f32 %v7631_v49, %v3722_v22  ;;  %v7176_v36 = vadd.f32 %v3521_v13, %v3504_v62  ;;  %v7638_v13 = vld [vmem:[#allocation39_spill] sm:$0xff]  ;;  %v7640_v56 = vld [vmem:[#allocation44_spill] sm:$0xff] }
 0x19f   : > { %v3933_v15 = vadd.f32 %v3925_v25, %v3885_v32  ;;  %v3784_v39 = vmul.f32 %v6774_v58, %v3770_v34  ;;  %v3602_v43 = vsub.f32 1.0, %v3594_v45  ;;  %v3562_v3 = vsel %vm3561_vm0, %v7109_v30, %v3560_v61  ;;  %v7637_v45 = vld [vmem:[#allocation43_spill] sm:$0xff]  ;;  %v7639_v32 = vld [vmem:[#allocation41_spill] sm:$0xff] }
 0x1a0   : > { %v3696_v16 = vadd.f32 %v3688_v42, %v3648_v0  ;;  %v3914_v20 = vrot.slane %v3608_v38, %v5313_v14  ;;  %v3565_v50 = vsel %vm3563_vm1, %v3564_v51, %v3562_v3  ;;  %v3832_v48 = vmul.f32 %v7632_v29, %v3818_v12 }
 0x1a1   : > { %4598 = vmatmul.mubr.msk.f32.gmra.mrb[2].mxu0 %vm1116_vm12, %v7169_v63  ;;  %v3981_v18 = vadd.f32 %v3973_v27, %v3933_v15  ;;  %v3610_v58 = vmax.f32 %v3602_v43, 0.0  ;;  %v3880_v17 = vmul.f32 %v7633_v40, %v3866_v19  ;;  %v3962_v44 = vrot.slane %v3608_v38, %v5326_v23  ;;  %v7636_v38 = vld [vmem:[#allocation42_spill] sm:$0xff]  ;;  %v7643_v40 = vld [vmem:[#allocation47_spill] sm:$0xff] }
 0x1a2   : > { %4213 = vmatprep.mubr.f32.mxu0 %v7473_v55  ;;  %v3744_v62 = vadd.f32 %v3736_v21, %v3696_v16  ;;  %v3591_v46 = vmul.f32 3.3333333, %v3565_v50  ;;  %4777 = vrsqrt.f32 %v7176_v36  ;;  %v3928_v8 = vmul.f32 %v7634_v54, %v3914_v20  ;;  %v7641_v21 = vld [vmem:[#allocation45_spill] sm:$0xff] }
 0x1a3   : > { %4073 = vmatpush1.msra.mxu1 %v3981_v18  ;;  %v3642_v30 = vrot.slane %v3610_v58, %v5288_v2  ;;  %v3682_v57 = vrot.slane %v3610_v58, %v5295_v6  ;;  %v3730_v33 = vrot.slane %v3610_v58, %v5297_v7  ;;  %v3778_v60 = vrot.slane %v3610_v58, %v5300_v9  ;;  %v7642_v18 = vld [vmem:[#allocation46_spill] sm:$0xff] }
 0x1a4   : > { %4599 = vmatmul.mubr.msk.f32.vlgmr.msra.gmra.mrb[0].mxu1 %vm1116_vm12, %v7149_v31  ;;  %v3792_v5 = vadd.f32 %v3784_v39, %v3744_v62  ;;  %v3826_v53 = vrot.slane %v3610_v58, %v5302_v10  ;;  %v3976_v59 = vmul.f32 %v7638_v13, %v3962_v44  ;;  %v3874_v35 = vrot.slane %v3610_v58, %v5304_v11  ;;  %v7644_v44 = vld [vmem:[#allocation48_spill] sm:$0xff] }
 0x1a5   : > { %4142 = vmatprep.mubr.f32.mxu1 %v7473_v55  ;;  %v3650_v25 = vmul.f32 %v7635_v24, %v3642_v30  ;;  %v3690_v52 = vmul.f32 %v7636_v38, %v3682_v57  ;;  %v3738_v61 = vmul.f32 %v7637_v45, %v3730_v33  ;;  %v3786_v41 = vmul.f32 %v7639_v32, %v3778_v60  ;;  %v7645_v33 = vld [vmem:[#allocation49_spill] sm:$0xff]  ;;  %v7646_v60 = vld [vmem:[#allocation50_spill] sm:$0xff]  ;;  %v7648_v45 = vld [vmem:[#allocation52_spill] sm:$0xff] }
 0x1a6   : > { %v3840_v4 = vadd.f32 %v3832_v48, %v3792_v5  ;;  %v3599_v27 = vsub.f32 1.0, %v3591_v46  ;;  %v3922_v51 = vrot.slane %v3610_v58, %v5313_v14  ;;  %v3834_v42 = vmul.f32 %v7640_v56, %v3826_v53  ;;  %v7650_v56 = vld [vmem:[#allocation54_spill] sm:$0xff] }
 0x1a7   : > { %v3698_v34 = vadd.f32 %v3690_v52, %v3650_v25  ;;  %v3882_v12 = vmul.f32 %v7641_v21, %v3874_v35  ;;  %v3970_v15 = vrot.slane %v3610_v58, %v5326_v23  ;;  %vm3575_vm2 = vcmp.eq.f32.partialorder %v7176_v36, inf  ;;  %v7647_v25 = vld [vmem:[#allocation51_spill] sm:$0xff] }
 0x1a8   : > { %v3888_v22 = vadd.f32 %v3880_v17, %v3840_v4  ;;  %4600 = vmatmul.mubr.msk.f32.gmra.mrb[2].mxu1 %vm1116_vm12, %v7169_v63  ;;  %v3607_v49 = vmax.f32 %v3599_v27, 0.0  ;;  %v3930_v20 = vmul.f32 %v7642_v18, %v3922_v51  ;;  %v3578_v30 = vand.u32 2147483648, %v7176_v36  ;;  %v7649_v27 = vld [vmem:[#allocation53_spill] sm:$0xff] }
 0x1a9   : > { %4290 = vmatprep.mubr.f32.mxu1 %v7473_v55  ;;  %v3746_v0 = vadd.f32 %v3738_v61, %v3698_v34  ;;  %v3978_v54 = vmul.f32 %v7645_v33, %v3970_v15  ;;  %vm3577_vm3 = vcmp.eq.f32.partialorder %v7176_v36, 0.0  ;;  %v7652_v18 = vld [vmem:[#allocation57_spill] sm:$0xff] }
 0x1aa   : > { %v3936_v37 = vadd.f32 %v3928_v8, %v3888_v22  ;;  %v3630_v39 = vrot.slane %v3607_v49, %v5288_v2  ;;  %v3670_v43 = vrot.slane %v3607_v49, %v5295_v6  ;;  %v3718_v50 = vrot.slane %v3607_v49, %v5297_v7 }
 0x1ab   : > { %v3794_v16 = vadd.f32 %v3786_v41, %v3746_v0  ;;  %v3766_v62 = vrot.slane %v3607_v49, %v5300_v9  ;;  %v3814_v58 = vrot.slane %v3607_v49, %v5302_v10  ;;  %v3862_v5 = vrot.slane %v3607_v49, %v5304_v11 }
 0x1ac   : > { %v3984_v19 = vadd.f32 %v3976_v59, %v3936_v37  ;;  %v4778_v3 = vpop.eup %4777  ;;  %v3647_v48 = vmul.f32 %v6873_v47, %v3630_v39  ;;  %v3687_v17 = vmul.f32 %v7643_v40, %v3670_v43  ;;  %v3735_v46 = vmul.f32 %v7644_v44, %v3718_v50  ;;  %v7651_v43 = vld [vmem:[#allocation56_spill] sm:$0xff]  ;;  %v7655_v44 = vld [vmem:[#allocation59_spill] sm:$0xff] }
 0x1ad   : > { %v3842_v29 = vadd.f32 %v3834_v42, %v3794_v16  ;;  %v3783_v53 = vmul.f32 %v7646_v60, %v3766_v62  ;;  %v3574_v47 = vmul.f32 %v4778_v3, %v7176_v36  ;;  %v3831_v38 = vmul.f32 %v7647_v25, %v3814_v58 }
 0x1ae   : > { %4149 = vmatprep.subr.mxu0 %v3984_v19  ;;  %v3695_v8 = vadd.f32 %v3687_v17, %v3647_v48  ;;  %v3910_v52 = vrot.slane %v3607_v49, %v5313_v14  ;;  %v3879_v61 = vmul.f32 %v7648_v45, %v3862_v5  ;;  %v3958_v22 = vrot.slane %v3607_v49, %v5326_v23  ;;  %v7653_v48 = vld [vmem:[#allocation55_spill] sm:$0xff] }
 0x1af   : > { %v3890_v57 = vadd.f32 %v3882_v12, %v3842_v29  ;;  %v3576_v13 = vsel %vm3575_vm2, %v7176_v36, %v3574_v47 }
 0x1b0   : > { %v3743_v24 = vadd.f32 %v3735_v46, %v3695_v8  ;;  %v3579_v34 = vsel %vm3577_vm3, %v3578_v30, %v3576_v13  ;;  %v3927_v51 = vmul.f32 %v7649_v27, %v3910_v52  ;;  %v3975_v42 = vmul.f32 %v7650_v56, %v3958_v22 }
 0x1b1   : > { %v3938_v4 = vadd.f32 %v3930_v20, %v3890_v57  ;;  %v3593_v32 = vmul.f32 3.3333333, %v3579_v34 }
 0x1b2   : > { %v3791_v35 = vadd.f32 %v3783_v53, %v3743_v24 }
 0x1b3   : > { %v3986_v59 = vadd.f32 %v3978_v54, %v3938_v4  ;;  %v3601_v37 = vsub.f32 1.0, %v3593_v32 }
 0x1b4   : > { %v3839_v41 = vadd.f32 %v3831_v38, %v3791_v35 }
 0x1b5   : > { %4226 = vmatprep.subr.mxu1 %v3986_v59  ;;  %v3609_v21 = vmax.f32 %v3601_v37, 0.0 }
 0x1b6   : > { %v3887_v0 = vadd.f32 %v3879_v61, %v3839_v41 }
 0x1b7   : > { %v3638_v15 = vrot.slane %v3609_v21, %v5288_v2  ;;  %v3678_v36 = vrot.slane %v3609_v21, %v5295_v6  ;;  %v3726_v19 = vrot.slane %v3609_v21, %v5297_v7  ;;  %v3774_v49 = vrot.slane %v3609_v21, %v5300_v9 }
 0x1b8   : > { %v3935_v12 = vadd.f32 %v3927_v51, %v3887_v0  ;;  %v3822_v50 = vrot.slane %v3609_v21, %v5302_v10  ;;  %v3870_v2 = vrot.slane %v3609_v21, %v5304_v11  ;;  %v3918_v9 = vrot.slane %v3609_v21, %v5313_v14 }
 0x1b9   : > { %v3649_v39 = vmul.f32 %v6946_v26, %v3638_v15  ;;  %v3689_v3 = vmul.f32 %v7651_v43, %v3678_v36  ;;  %v3737_v20 = vmul.f32 %v7652_v18, %v3726_v19  ;;  %v3785_v29 = vmul.f32 %v6961_v1, %v3774_v49  ;;  %v7654_v1 = vld [vmem:[#allocation58_spill] sm:$0xff] }
 0x1ba   : > { %v3983_v16 = vadd.f32 %v3975_v42, %v3935_v12  ;;  %v3833_v7 = vmul.f32 %v6972_v28, %v3822_v50  ;;  %v3881_v10 = vmul.f32 %v7653_v48, %v3870_v2  ;;  %v3966_v40 = vrot.slane %v3609_v21, %v5326_v23 }
 0x1bb   : > { %v3697_v62 = vadd.f32 %v3689_v3, %v3649_v39  ;;  %v3929_v17 = vmul.f32 %v7654_v1, %v3918_v9 }
 0x1bc   : > { %4150 = vmatpush1.msra.mxu0 %v3983_v16  ;;  %v3977_v46 = vmul.f32 %v7655_v44, %v3966_v40 }
 0x1bd   : > { %4601 = vmatmul.mubr.msk.f32.vlgmr.msra.gmra.mrb[4].mxu0 %vm1116_vm12, %v7149_v31  ;;  %v3745_v6 = vadd.f32 %v3737_v20, %v3697_v62 }
 0x1be   : > { %4219 = vmatprep.mubr.f32.mxu0 %v7473_v55 }
 0x1bf   : > { %v3793_v26 = vadd.f32 %v3785_v29, %v3745_v6 }
 0x1c1   : > { %4602 = vmatmul.mubr.msk.f32.gmra.mrb[6].mxu0 %vm1116_vm12, %v7169_v63  ;;  %v3841_v11 = vadd.f32 %v3833_v7, %v3793_v26 }
 0x1c3   : > { %v3889_v58 = vadd.f32 %v3881_v10, %v3841_v11 }
 0x1c5   : > { %v3937_v5 = vadd.f32 %v3929_v17, %v3889_v58 }
 0x1c7   : > { %v3985_v30 = vadd.f32 %v3977_v46, %v3937_v5 }
 0x1c9   : > { %4227 = vmatpush1.msra.mxu1 %v3985_v30 }
 0x1ca   : > { %4603 = vmatmul.mubr.msk.f32.vlgmr.msra.gmra.mrb[4].mxu1 %vm1116_vm12, %v7149_v31 }
 0x1cb   : > { %4296 = vmatprep.mubr.f32.mxu1 %v7473_v55 }
 0x1ce   : > { %4604 = vmatmul.mubr.msk.f32.gmra.mrb[6].mxu1 %vm1116_vm12, %v7169_v63 }
 0x270   : > { %v4061_v14 = vpop.f32.mrb[0].mxu0 }
 0x271   : > { %vm4319_vm4 = vcmp.ge.f32.partialorder %v4061_v14, 0.0  ;;  %v4335_v23 = vmul.f32 0.1, %v4061_v14  ;;  %v4063_v28 = vpop.f32.mrb[1].mxu0 }
 0x272   : > { %vm4320_vm5 = vcmp.ge.f32.partialorder %v4063_v28, 0.0  ;;  %v4336_v57 = vmul.f32 0.1, %v4063_v28 }
 0x273   : > { %v4351_v33 = vsel %vm4319_vm4, %v4061_v14, %v4335_v23 }
 0x274   : > { %4367 = vst [vmem:[%s7264_s11] sm:$0xff] %v4351_v33  ;;  %v4352_v31 = vsel %vm4320_vm5, %v4063_v28, %v4336_v57  ;;  %v4067_v55 = vpop.f32.mrb[2].mxu0 }
 0x275   : > { %4368 = vst [vmem:[%s7264_s11 + $0x8] sm:$0xff] %v4352_v31  ;;  %vm4327_vm6 = vcmp.ge.f32.partialorder %v4067_v55, 0.0  ;;  %v4343_v63 = vmul.f32 0.1, %v4067_v55  ;;  %v4069_v54 = vpop.f32.mrb[3].mxu0 }
 0x276   : > { %vm4328_vm12 = vcmp.ge.f32.partialorder %v4069_v54, 0.0  ;;  %v4344_v8 = vmul.f32 0.1, %v4069_v54 }
 0x277   : > { %v4359_v60 = vsel %vm4327_vm6, %v4067_v55, %v4343_v63  ;;  %v4138_v53 = vpop.f32.mrb[0].mxu1 }
 0x278   : > { %4375 = vst [vmem:[%s7264_s11 + $0x40] sm:$0xff] %v4359_v60  ;;  %v4360_v47 = vsel %vm4328_vm12, %v4069_v54, %v4344_v8  ;;  %vm4321_vm7 = vcmp.ge.f32.partialorder %v4138_v53, 0.0  ;;  %v4337_v4 = vmul.f32 0.1, %v4138_v53  ;;  %v4140_v24 = vpop.f32.mrb[1].mxu1 }
 0x279   : > { %4376 = vst [vmem:[%s7264_s11 + $0x48] sm:$0xff] %v4360_v47  ;;  %vm4322_vm8 = vcmp.ge.f32.partialorder %v4140_v24, 0.0  ;;  %v4338_v25 = vmul.f32 0.1, %v4140_v24 }
 0x27a   : > { %v4353_v38 = vsel %vm4321_vm7, %v4138_v53, %v4337_v4 }
 0x27b   : > { %4369 = vst [vmem:[%s7264_s11 + $0x10] sm:$0xff] %v4353_v38  ;;  %v4354_v52 = vsel %vm4322_vm8, %v4140_v24, %v4338_v25  ;;  %v4144_v45 = vpop.f32.mrb[2].mxu1  ;;  %v4405_v2 = vld [vmem:[%s7264_s11] sm:$0xff] (%p7656_p5) }
 0x27c   : > { %4370 = vst [vmem:[%s7264_s11 + $0x18] sm:$0xff] %v4354_v52  ;;  %vm4329_vm9 = vcmp.ge.f32.partialorder %v4144_v45, 0.0  ;;  %v4345_v61 = vmul.f32 0.1, %v4144_v45  ;;  %v4146_v13 = vpop.f32.mrb[3].mxu1  ;;  %v4407_v6 = vld [vmem:[%s7264_s11 + $0x8] sm:$0xff] (%p7656_p5)  ;;  %4406 = vst [vmem:[%s4392_s14] sm:$0xff] (%p7656_p5), %v4405_v2 }
 0x27d   : > { %vm4330_vm10 = vcmp.ge.f32.partialorder %v4146_v13, 0.0  ;;  %v4346_v59 = vmul.f32 0.1, %v4146_v13  ;;  %4408 = vst [vmem:[%s4392_s14 + $0x8] sm:$0xff] (%p7656_p5), %v4407_v6 }
 0x27e   : > { %v4361_v35 = vsel %vm4329_vm9, %v4144_v45, %v4345_v61 }
 0x27f   : > { %4377 = vst [vmem:[%s7264_s11 + $0x50] sm:$0xff] %v4361_v35  ;;  %v4362_v22 = vsel %vm4330_vm10, %v4146_v13, %v4346_v59  ;;  %v4421_v11 = vld [vmem:[%s7264_s11 + $0x40] sm:$0xff] (%p7656_p5) }
 0x280   : > { %4378 = vst [vmem:[%s7264_s11 + $0x58] sm:$0xff] %v4362_v22  ;;  %4422 = vst [vmem:[%s4392_s14 + $0x80] sm:$0xff] (%p7656_p5), %v4421_v11  ;;  %v4423_v1 = vld [vmem:[%s7264_s11 + $0x48] sm:$0xff] (%p7656_p5) }
 0x281   : > { %4424 = vst [vmem:[%s4392_s14 + $0x88] sm:$0xff] (%p7656_p5), %v4423_v1 }
 0x282   : > { %v4409_v7 = vld [vmem:[%s7264_s11 + $0x10] sm:$0xff] (%p7656_p5) }
 0x283   : > { %v4411_v9 = vld [vmem:[%s7264_s11 + $0x18] sm:$0xff] (%p7656_p5)  ;;  %4410 = vst [vmem:[%s4392_s14 + $0x10] sm:$0xff] (%p7656_p5), %v4409_v7 }
 0x284   : > { %4412 = vst [vmem:[%s4392_s14 + $0x18] sm:$0xff] (%p7656_p5), %v4411_v9 }
 0x286   : > { %v4425_v17 = vld [vmem:[%s7264_s11 + $0x50] sm:$0xff] (%p7656_p5) }
 0x287   : > { %v4427_v58 = vld [vmem:[%s7264_s11 + $0x58] sm:$0xff] (%p7656_p5)  ;;  %4426 = vst [vmem:[%s4392_s14 + $0x90] sm:$0xff] (%p7656_p5), %v4425_v17 }
 0x288   : > { %4428 = vst [vmem:[%s4392_s14 + $0x98] sm:$0xff] (%p7656_p5), %v4427_v58 }
 0x290   : > { %v4215_v34 = vpop.f32.mrb[4].mxu0 }
 0x291   : > { %vm4323_vm11 = vcmp.ge.f32.partialorder %v4215_v34, 0.0  ;;  %v4339_v32 = vmul.f32 0.1, %v4215_v34  ;;  %v4217_v41 = vpop.f32.mrb[5].mxu0 }
 0x292   : > { %vm4324_vm13 = vcmp.ge.f32.partialorder %v4217_v41, 0.0  ;;  %v4340_v27 = vmul.f32 0.1, %v4217_v41 }
 0x293   : > { %v4355_v51 = vsel %vm4323_vm11, %v4215_v34, %v4339_v32 }
 0x294   : > { %4371 = vst [vmem:[%s7264_s11 + $0x20] sm:$0xff] %v4355_v51  ;;  %v4356_v37 = vsel %vm4324_vm13, %v4217_v41, %v4340_v27  ;;  %v4221_v0 = vpop.f32.mrb[6].mxu0 }
 0x295   : > { %4372 = vst [vmem:[%s7264_s11 + $0x28] sm:$0xff] %v4356_v37  ;;  %vm4331_vm14 = vcmp.ge.f32.partialorder %v4221_v0, 0.0  ;;  %v4347_v56 = vmul.f32 0.1, %v4221_v0  ;;  %v4223_v42 = vpop.f32.mrb[7].mxu0 }
 0x296   : > { %vm4332_vm15 = vcmp.ge.f32.partialorder %v4223_v42, 0.0  ;;  %v4348_v21 = vmul.f32 0.1, %v4223_v42 }
 0x297   : > { %v4363_v12 = vsel %vm4331_vm14, %v4221_v0, %v4347_v56 }
 0x298   : > { %4379 = vst [vmem:[%s7264_s11 + $0x60] sm:$0xff] %v4363_v12  ;;  %v4364_v15 = vsel %vm4332_vm15, %v4223_v42, %v4348_v21 }
 0x299   : > { %4380 = vst [vmem:[%s7264_s11 + $0x68] sm:$0xff] %v4364_v15 }
 0x29b   : > { %v4413_v26 = vld [vmem:[%s7264_s11 + $0x20] sm:$0xff] (%p7656_p5) }
 0x29c   : > { %v4415_v48 = vld [vmem:[%s7264_s11 + $0x28] sm:$0xff] (%p7656_p5)  ;;  %4414 = vst [vmem:[%s4392_s14 + $0x20] sm:$0xff] (%p7656_p5), %v4413_v26 }
 0x29d   : > { %v4292_v36 = vpop.f32.mrb[4].mxu1  ;;  %4416 = vst [vmem:[%s4392_s14 + $0x28] sm:$0xff] (%p7656_p5), %v4415_v48 }
 0x29e   : > { %vm4325_vm0 = vcmp.ge.f32.partialorder %v4292_v36, 0.0  ;;  %v4341_v19 = vmul.f32 0.1, %v4292_v36  ;;  %v4294_v49 = vpop.f32.mrb[5].mxu1 }
 0x29f   : > { %vm4326_vm1 = vcmp.ge.f32.partialorder %v4294_v49, 0.0  ;;  %v4342_v16 = vmul.f32 0.1, %v4294_v49  ;;  %v4429_v44 = vld [vmem:[%s7264_s11 + $0x60] sm:$0xff] (%p7656_p5) }
 0x2a0   : > { %v4357_v39 = vsel %vm4325_vm0, %v4292_v36, %v4341_v19  ;;  %4389 = sbr.rel (!%p7656_p5) target bundleno = 687 (0x2af), region = 94  ;;  %v4431_v46 = vld [vmem:[%s7264_s11 + $0x68] sm:$0xff] (%p7656_p5)  ;;  %4430 = vst [vmem:[%s4392_s14 + $0xa0] sm:$0xff] (%p7656_p5), %v4429_v44 }
 0x2a1   : > { %4373 = vst [vmem:[%s7264_s11 + $0x30] sm:$0xff] %v4357_v39  ;;  %v4358_v43 = vsel %vm4326_vm1, %v4294_v49, %v4342_v16  ;;  %v4298_v3 = vpop.f32.mrb[6].mxu1  ;;  %4432 = vst [vmem:[%s4392_s14 + $0xa8] sm:$0xff] (%p7656_p5), %v4431_v46 }
 0x2a2   : > { %4374 = vst [vmem:[%s7264_s11 + $0x38] sm:$0xff] %v4358_v43  ;;  %vm4333_vm2 = vcmp.ge.f32.partialorder %v4298_v3, 0.0  ;;  %v4349_v18 = vmul.f32 0.1, %v4298_v3  ;;  %v4300_v20 = vpop.f32.mrb[7].mxu1 }
 0x2a3   : > { %vm4334_vm3 = vcmp.ge.f32.partialorder %v4300_v20, 0.0  ;;  %v4350_v50 = vmul.f32 0.1, %v4300_v20 }
 0x2a4   : > { %v4365_v62 = vsel %vm4333_vm2, %v4298_v3, %v4349_v18 }
 0x2a5   : > { %4381 = vst [vmem:[%s7264_s11 + $0x70] sm:$0xff] %v4365_v62  ;;  %v4366_v29 = vsel %vm4334_vm3, %v4300_v20, %v4350_v50 }
 0x2a6   : > { %4382 = vst [vmem:[%s7264_s11 + $0x78] sm:$0xff] %v4366_v29 }
 0x2a8   : > { %v4417_v10 = vld [vmem:[%s7264_s11 + $0x30] sm:$0xff] }
 0x2a9   : > { %v4419_v40 = vld [vmem:[%s7264_s11 + $0x38] sm:$0xff]  ;;  %4418 = vst [vmem:[%s4392_s14 + $0x30] sm:$0xff] %v4417_v10 }
 0x2aa   : > { %4420 = vst [vmem:[%s4392_s14 + $0x38] sm:$0xff] %v4419_v40 }
 0x2ac   : > { %v4433_v5 = vld [vmem:[%s7264_s11 + $0x70] sm:$0xff] }
 0x2ad   : > { %4434 = vst [vmem:[%s4392_s14 + $0xb0] sm:$0xff] %v4433_v5  ;;  %v4435_v30 = vld [vmem:[%s7264_s11 + $0x78] sm:$0xff] }
 0x2ae   : > { %4436 = vst [vmem:[%s4392_s14 + $0xb8] sm:$0xff] %v4435_v30 }
 0x2af PF: > { %p13_p8 = scmp.ge.s32.totalorder %s4968_s22, 4   ;;  %s7657_s18 = smov %s4911_s19 }
 0x2b0   : > { %s7658_s19 = smov %s4978_s25  ;;  %s7659_s20 = smov %s4968_s22 }
 0x2b1   :  { %15 = sbr.rel (!%p13_p8) target bundleno = 2 (0x2), region = 160 }
 0x2b8   :  { %4452 = vsyncpa [#allocation5], 1 }
 0x2b9   :  { %4454 = vsyncpa [#allocation5 + $0x1], 1 }

</bundles_post_ra>
